<compile_context>
chip_gen: v7x
topology: tpu7x:2x2x1
jax: 0.10.0
libtpu: 0.0.40
codegen_flags: <defaults>
</compile_context>

<pallas_src>
from functools import partial

import jax
import jax.numpy as jnp
from jax.experimental import pallas as pl
from jax.experimental.pallas import tpu as pltpu


# ----------------------------------------------------------------------------
# Kernel
# ----------------------------------------------------------------------------
def _spatial_attention_kernel(x_ref, wmask_ref, bconv_ref, o_ref, *,
                              W, K, SUB, C_CHUNK):
    """One grid step: NB images -> NB spatial-attention maps.

    x_ref:     (NB, C, HW)    lane-dense input block (VMEM)
    wmask_ref: (2*K*K, HW)    per-tap weight * validity mask (VMEM, resident)
    bconv_ref: (1,)           conv bias (SMEM)
    o_ref:     (NB, HW)       sigmoid(conv(...)) output block (VMEM)
    """
    NB, C, HW = x_ref.shape
    P = K // 2
    n_sub = NB // SUB          # SUB divides NB by construction (wrapper)
    n_cchunk = C // C_CHUNK    # C_CHUNK divides C by construction (wrapper)
    inv_c = 1.0 / float(C)
    bias = bconv_ref[0]

    def sub_body(si, carry):
        b0 = pl.multiple_of(si * SUB, SUB)

        # ---- channel pooling: sum & max over C, C_CHUNK sublanes at a time ----
        def c_body(ci, sm):
            s_acc, m_acc = sm
            c0 = pl.multiple_of(ci * C_CHUNK, C_CHUNK)
            xc = x_ref[pl.ds(b0, SUB), pl.ds(c0, C_CHUNK), :].astype(jnp.float32)
            return (s_acc + jnp.sum(xc, axis=1),
                    jnp.maximum(m_acc, jnp.max(xc, axis=1)))

        s_acc, m_acc = jax.lax.fori_loop(
            0, n_cchunk, c_body,
            (jnp.zeros((SUB, HW), jnp.float32),
             jnp.full((SUB, HW), -jnp.inf, jnp.float32)))
        maps = (s_acc * inv_c, m_acc)          # (channel-mean map, channel-max map)

        # ---- KxK "same" conv via circular lane rolls + weight*mask table ----
        acc = jnp.zeros((SUB, HW), jnp.float32) + bias
        for c in range(2):                     # unrolled: 2*K*K taps
            for kh in range(K):
                for kw in range(K):
                    s = (kh - P) * W + (kw - P)          # flat tap shift
                    if s == 0:
                        tap = maps[c]
                    else:
                        # tap[i] = maps[c][(i + s) mod HW]; wrapped lanes are
                        # zeroed by wmask (their true source is out of image).
                        tap = pltpu.roll(maps[c], shift=(-s) % HW, axis=1)
                    t = c * K * K + kh * K + kw
                    acc = acc + tap * wmask_ref[t:t + 1, :]

        o_ref[pl.ds(b0, SUB), :] = jax.nn.sigmoid(acc).astype(o_ref.dtype)
        return carry

    jax.lax.fori_loop(0, n_sub, sub_body, 0)


# ----------------------------------------------------------------------------
# Sizing helpers
# ----------------------------------------------------------------------------
def _vmem_capacity_bytes():
    """Physical VMEM of the local TPU; assume the smallest (v7x, 64 MiB) if
    the query is unavailable so the sizing stays safe everywhere."""
    try:
        return int(pltpu.get_tpu_info().vmem_capacity_bytes)
    except Exception:
        return 64 * 1024 * 1024


def _pick_batch_block(N, C, HW, itemsize, vmem_cap, requested=None):
    """Batch-block size NB for the grid.

    Budget ~ VMEM/8 (the input block is double-buffered by the pipeline):
    ~8 MiB on v7x (64 MiB VMEM), ~16 MiB on v5e/v6e (128 MiB).  Capped at N//2
    so dimension_semantics=("parallel",) can shard the grid across v7x's two
    TensorCores.  NB is rounded to a multiple of 8 (output sublane tile); the
    grid uses pl.cdiv, so NB does NOT have to divide N (no NB=1 cliff).
    """
    budget = max(vmem_cap // 8, 1 << 20)
    per_image = max(C * HW * itemsize, 1)
    cap = max(1, budget // per_image)
    if requested is not None:
        cap = max(1, min(cap, int(requested)))
    cap = min(cap, max(1, N // 2))          # >=2 grid steps when N allows it
    nb = min(N, cap)
    if nb >= 8:
        nb -= nb % 8                        # keep (8,128) output tiles aligned
    else:
        nb = N                              # tiny batch: one full block
    return max(nb, 1)


def _pick_c_chunk(C, dtype):
    """Channel chunk for the pooling loop (bounds the vreg live-set)."""
    base = 16 if dtype == jnp.bfloat16 else 8
    if C > base and C % base == 0:
        return base
    return C


# ----------------------------------------------------------------------------
# Wrapper
# ----------------------------------------------------------------------------
def spatial_attention_forward(x, wconv, bconv, kernel_size=7, batch_block=None):
    """x: (N, C, H, W); wconv: flat (2*K*K,) ordered [c, kh, kw]; bconv: (1,)."""
    assert kernel_size in (3, 7), "kernel size must be 3 or 7"
    N, C, H, W = x.shape
    K = kernel_size
    P = K // 2
    HW = H * W

    vmem_cap = _vmem_capacity_bytes()
    itemsize = jnp.dtype(x.dtype).itemsize
    NB = _pick_batch_block(N, C, HW, itemsize, vmem_cap, batch_block)
    SUB = 8 if NB % 8 == 0 else NB
    C_CHUNK = _pick_c_chunk(C, x.dtype)

    # Precompute the weight * validity table (plain XLA, tiny).
    # wmask[c*K*K + kh*K + kw, i] = w[c,kh,kw] if pixel i shifted by
    # (kh-P, kw-P) stays inside the HxW image, else 0.
    idx = jnp.arange(HW, dtype=jnp.int32)
    row = idx // W
    col = idx % W
    dk = jnp.arange(K, dtype=jnp.int32) - P
    row_ok = (row[None, :] + dk[:, None] >= 0) & (row[None, :] + dk[:, None] < H)
    col_ok = (col[None, :] + dk[:, None] >= 0) & (col[None, :] + dk[:, None] < W)
    valid = (row_ok[:, None, :] & col_ok[None, :, :]).astype(jnp.float32)  # (K,K,HW)
    w = wconv.reshape(2, K, K).astype(jnp.float32)
    wmask = (w[:, :, :, None] * valid[None]).reshape(2 * K * K, HW)

    x_flat = x.reshape(N, C, HW)                      # lane-dense layout
    bconv_f32 = bconv.reshape(1).astype(jnp.float32)  # SMEM scalar

    kernel = partial(_spatial_attention_kernel, W=W, K=K, SUB=SUB, C_CHUNK=C_CHUNK)

    out_flat = pl.pallas_call(
        kernel,
        out_shape=jax.ShapeDtypeStruct((N, HW), x.dtype),
        grid_spec=pltpu.PrefetchScalarGridSpec(
            num_scalar_prefetch=0,
            grid=(pl.cdiv(N, NB),),
            in_specs=[
                pl.BlockSpec((NB, C, HW), lambda n: (n, 0, 0)),        # x (lane-dense)
                pl.BlockSpec((2 * K * K, HW), lambda n: (0, 0)),       # weight*mask table
                pl.BlockSpec(memory_space=pltpu.MemorySpace.SMEM),     # conv bias
            ],
            out_specs=pl.BlockSpec((NB, HW), lambda n: (n, 0)),        # 2-D lane-dense out
        ),
        compiler_params=pltpu.CompilerParams(
            dimension_semantics=("parallel",),           # batch steps independent
            vmem_limit_bytes=(vmem_cap * 5) // 8,        # ~40 MiB v7x / ~80 MiB v5e/v6e
        ),
    )(x_flat, wmask, bconv_f32)

    return out_flat.reshape(N, 1, H, W)


# ----------------------------------------------------------------------------
# Pure-JAX reference mirroring the PyTorch SpatialAttention.forward
# ----------------------------------------------------------------------------
def spatial_attention_reference(x, wconv, bconv, kernel_size=7):
    K = kernel_size
    P = K // 2
    avg_c = jnp.mean(x, axis=1, keepdims=True)
    max_c = jnp.max(x, axis=1, keepdims=True)
    s = jnp.concatenate([avg_c, max_c], axis=1)          # (N, 2, H, W)
    conv = jax.lax.conv_general_dilated(
        s, wconv.reshape(1, 2, K, K).astype(s.dtype), (1, 1), [(P, P), (P, P)],
        dimension_numbers=("NCHW", "OIHW", "NCHW"))
    return jax.nn.sigmoid(conv + bconv.reshape(1, 1, 1, 1))


if __name__ == "__main__":
    N, C, H, W = 16, 32, 16, 16
    K = 7

    key = jax.random.PRNGKey(0)
    k1, k2, k3 = jax.random.split(key, 3)
    x = jax.random.normal(k1, (N, C, H, W), jnp.float32)
    # deterministic synthetic conv params (normal, std=0.01, like normal_init)
    wconv = jax.random.normal(k2, (2 * K * K,), jnp.float32) * 0.01  # flat [c, kh, kw]
    bconv = jax.random.normal(k3, (1,), jnp.float32) * 0.01

    # N=16 -> NB=8 (capped at N//2, multiple of 8) -> 2 grid steps, SUB=8,
    # C chunked 4 x 8: exercises the batch tiling, the sub-batch loop and the
    # chunked channel reduction.
    out = spatial_attention_forward(x, wconv, bconv, kernel_size=K)
    jax.block_until_ready(out)

    ref = spatial_attention_reference(x, wconv, bconv, kernel_size=K)
    assert out.shape == ref.shape, (out.shape, ref.shape)
    max_err = float(jnp.max(jnp.abs(out - ref)))
    assert jnp.allclose(out, ref, rtol=1e-5, atol=1e-5), f"max abs err {max_err}"
    print("KERNEL_OK")
</pallas_src>

<mosaic_0001>
module attributes {stable_mosaic.version = 11 : i64} {
  func.func @_spatial_attention_kernel(%arg0: i32, %arg1: memref<8x32x256xf32, #tpu.memory_space<vmem>>, %arg2: memref<98x256xf32, #tpu.memory_space<vmem>>, %arg3: memref<1xf32, #tpu.memory_space<smem>>, %arg4: memref<8x256xf32, #tpu.memory_space<vmem>>) attributes {dimension_semantics = [#tpu.dimension_semantics<parallel>], iteration_bounds = array<i64: 2>, scalar_prefetch = 0 : i64, scratch_operands = 0 : i64, tpu.core_type = #tpu.core_type<tc>, window_params = [{transform_indices = @transform_0, window_bounds = array<i64: 8, 32, 256>}, {pipeline_mode = #tpu.pipeline_mode<synchronous>, transform_indices = @transform_1, window_bounds = array<i64: 98, 256>}, {transform_indices = @transform_2, window_bounds = array<i64: 1>}, {transform_indices = @transform_3, window_bounds = array<i64: 8, 256>}]} {
    %c0 = arith.constant 0 : index
    %0 = memref.load %arg3[%c0] : memref<1xf32, #tpu.memory_space<smem>>
    %c0_i32 = arith.constant 0 : i32
    %c8_i32 = arith.constant 8 : i32
    %1 = arith.muli %c0_i32, %c8_i32 : i32
    %2 = tpu.assume_multiple %1, 8 : i32
    %cst = arith.constant 0.000000e+00 : f32
    %3 = vector.broadcast %cst : f32 to vector<8x256xf32>
    %cst_0 = arith.constant 0xFF800000 : f32
    %4 = vector.broadcast %cst_0 : f32 to vector<8x256xf32>
    %c0_i32_1 = arith.constant 0 : i32
    %c4_i32 = arith.constant 4 : i32
    %5 = arith.addi %c0_i32_1, %c4_i32 : i32
    %c1_i32 = arith.constant 1 : i32
    %6:2 = scf.for %arg5 = %c0_i32_1 to %5 step %c1_i32 iter_args(%arg6 = %3, %arg7 = %4) -> (vector<8x256xf32>, vector<8x256xf32>)  : i32 {
      %c8_i32_156 = arith.constant 8 : i32
      %507 = arith.muli %arg5, %c8_i32_156 : i32
      %508 = tpu.assume_multiple %507, 8 : i32
      %509 = arith.index_cast %2 : i32 to index
      %510 = arith.index_cast %508 : i32 to index
      %c0_157 = arith.constant 0 : index
      %511 = vector.load %arg1[%509, %510, %c0_157] : memref<8x32x256xf32, #tpu.memory_space<vmem>>, vector<8x8x256xf32>
      %cst_158 = arith.constant dense<0.000000e+00> : vector<8x256xf32>
      %512 = vector.multi_reduction <add>, %511, %cst_158 [1] : vector<8x8x256xf32> to vector<8x256xf32>
      %513 = arith.addf %arg6, %512 : vector<8x256xf32>
      %cst_159 = arith.constant dense<0xFF800000> : vector<8x256xf32>
      %514 = vector.multi_reduction <maximumf>, %511, %cst_159 [1] : vector<8x8x256xf32> to vector<8x256xf32>
      %515 = arith.maximumf %arg7, %514 : vector<8x256xf32>
      scf.yield %513, %515 : vector<8x256xf32>, vector<8x256xf32>
    }
    %c4_i32_2 = arith.constant 4 : i32
    %cst_3 = arith.constant 3.125000e-02 : f32
    %7 = vector.broadcast %cst_3 : f32 to vector<8x256xf32>
    %8 = arith.mulf %6#0, %7 : vector<8x256xf32>
    %cst_4 = arith.constant 0.000000e+00 : f32
    %9 = vector.broadcast %cst_4 : f32 to vector<8x256xf32>
    %10 = vector.broadcast %0 : f32 to vector<8x256xf32>
    %11 = arith.addf %9, %10 : vector<8x256xf32>
    %c51_i32 = arith.constant 51 : i32
    %12 = tpu.dynamic_rotate %8 by %c51_i32 dim 1 : vector<8x256xf32>, i32 -> vector<8x256xf32>
    %c0_5 = arith.constant 0 : index
    %c0_6 = arith.constant 0 : index
    %13 = vector.load %arg2[%c0_5, %c0_6] : memref<98x256xf32, #tpu.memory_space<vmem>>, vector<1x256xf32>
    %14 = vector.broadcast %13 : vector<1x256xf32> to vector<8x256xf32>
    %15 = arith.mulf %12, %14 : vector<8x256xf32>
    %16 = arith.addf %11, %15 : vector<8x256xf32>
    %c50_i32 = arith.constant 50 : i32
    %17 = tpu.dynamic_rotate %8 by %c50_i32 dim 1 : vector<8x256xf32>, i32 -> vector<8x256xf32>
    %c1 = arith.constant 1 : index
    %c0_7 = arith.constant 0 : index
    %18 = vector.load %arg2[%c1, %c0_7] : memref<98x256xf32, #tpu.memory_space<vmem>>, vector<1x256xf32>
    %19 = vector.broadcast %18 : vector<1x256xf32> to vector<8x256xf32>
    %20 = arith.mulf %17, %19 : vector<8x256xf32>
    %21 = arith.addf %16, %20 : vector<8x256xf32>
    %c49_i32 = arith.constant 49 : i32
    %22 = tpu.dynamic_rotate %8 by %c49_i32 dim 1 : vector<8x256xf32>, i32 -> vector<8x256xf32>
    %c2 = arith.constant 2 : index
    %c0_8 = arith.constant 0 : index
    %23 = vector.load %arg2[%c2, %c0_8] : memref<98x256xf32, #tpu.memory_space<vmem>>, vector<1x256xf32>
    %24 = vector.broadcast %23 : vector<1x256xf32> to vector<8x256xf32>
    %25 = arith.mulf %22, %24 : vector<8x256xf32>
    %26 = arith.addf %21, %25 : vector<8x256xf32>
    %c48_i32 = arith.constant 48 : i32
    %27 = tpu.dynamic_rotate %8 by %c48_i32 dim 1 : vector<8x256xf32>, i32 -> vector<8x256xf32>
    %c3 = arith.constant 3 : index
    %c0_9 = arith.constant 0 : index
    %28 = vector.load %arg2[%c3, %c0_9] : memref<98x256xf32, #tpu.memory_space<vmem>>, vector<1x256xf32>
    %29 = vector.broadcast %28 : vector<1x256xf32> to vector<8x256xf32>
    %30 = arith.mulf %27, %29 : vector<8x256xf32>
    %31 = arith.addf %26, %30 : vector<8x256xf32>
    %c47_i32 = arith.constant 47 : i32
    %32 = tpu.dynamic_rotate %8 by %c47_i32 dim 1 : vector<8x256xf32>, i32 -> vector<8x256xf32>
    %c4 = arith.constant 4 : index
    %c0_10 = arith.constant 0 : index
    %33 = vector.load %arg2[%c4, %c0_10] : memref<98x256xf32, #tpu.memory_space<vmem>>, vector<1x256xf32>
    %34 = vector.broadcast %33 : vector<1x256xf32> to vector<8x256xf32>
    %35 = arith.mulf %32, %34 : vector<8x256xf32>
    %36 = arith.addf %31, %35 : vector<8x256xf32>
    %c46_i32 = arith.constant 46 : i32
    %37 = tpu.dynamic_rotate %8 by %c46_i32 dim 1 : vector<8x256xf32>, i32 -> vector<8x256xf32>
    %c5 = arith.constant 5 : index
    %c0_11 = arith.constant 0 : index
    %38 = vector.load %arg2[%c5, %c0_11] : memref<98x256xf32, #tpu.memory_space<vmem>>, vector<1x256xf32>
    %39 = vector.broadcast %38 : vector<1x256xf32> to vector<8x256xf32>
    %40 = arith.mulf %37, %39 : vector<8x256xf32>
    %41 = arith.addf %36, %40 : vector<8x256xf32>
    %c45_i32 = arith.constant 45 : i32
    %42 = tpu.dynamic_rotate %8 by %c45_i32 dim 1 : vector<8x256xf32>, i32 -> vector<8x256xf32>
    %c6 = arith.constant 6 : index
    %c0_12 = arith.constant 0 : index
    %43 = vector.load %arg2[%c6, %c0_12] : memref<98x256xf32, #tpu.memory_space<vmem>>, vector<1x256xf32>
    %44 = vector.broadcast %43 : vector<1x256xf32> to vector<8x256xf32>
    %45 = arith.mulf %42, %44 : vector<8x256xf32>
    %46 = arith.addf %41, %45 : vector<8x256xf32>
    %c35_i32 = arith.constant 35 : i32
    %47 = tpu.dynamic_rotate %8 by %c35_i32 dim 1 : vector<8x256xf32>, i32 -> vector<8x256xf32>
    %c7 = arith.constant 7 : index
    %c0_13 = arith.constant 0 : index
    %48 = vector.load %arg2[%c7, %c0_13] : memref<98x256xf32, #tpu.memory_space<vmem>>, vector<1x256xf32>
    %49 = vector.broadcast %48 : vector<1x256xf32> to vector<8x256xf32>
    %50 = arith.mulf %47, %49 : vector<8x256xf32>
    %51 = arith.addf %46, %50 : vector<8x256xf32>
    %c34_i32 = arith.constant 34 : i32
    %52 = tpu.dynamic_rotate %8 by %c34_i32 dim 1 : vector<8x256xf32>, i32 -> vector<8x256xf32>
    %c8 = arith.constant 8 : index
    %c0_14 = arith.constant 0 : index
    %53 = vector.load %arg2[%c8, %c0_14] : memref<98x256xf32, #tpu.memory_space<vmem>>, vector<1x256xf32>
    %54 = vector.broadcast %53 : vector<1x256xf32> to vector<8x256xf32>
    %55 = arith.mulf %52, %54 : vector<8x256xf32>
    %56 = arith.addf %51, %55 : vector<8x256xf32>
    %c33_i32 = arith.constant 33 : i32
    %57 = tpu.dynamic_rotate %8 by %c33_i32 dim 1 : vector<8x256xf32>, i32 -> vector<8x256xf32>
    %c9 = arith.constant 9 : index
    %c0_15 = arith.constant 0 : index
    %58 = vector.load %arg2[%c9, %c0_15] : memref<98x256xf32, #tpu.memory_space<vmem>>, vector<1x256xf32>
    %59 = vector.broadcast %58 : vector<1x256xf32> to vector<8x256xf32>
    %60 = arith.mulf %57, %59 : vector<8x256xf32>
    %61 = arith.addf %56, %60 : vector<8x256xf32>
    %c32_i32 = arith.constant 32 : i32
    %62 = tpu.dynamic_rotate %8 by %c32_i32 dim 1 : vector<8x256xf32>, i32 -> vector<8x256xf32>
    %c10 = arith.constant 10 : index
    %c0_16 = arith.constant 0 : index
    %63 = vector.load %arg2[%c10, %c0_16] : memref<98x256xf32, #tpu.memory_space<vmem>>, vector<1x256xf32>
    %64 = vector.broadcast %63 : vector<1x256xf32> to vector<8x256xf32>
    %65 = arith.mulf %62, %64 : vector<8x256xf32>
    %66 = arith.addf %61, %65 : vector<8x256xf32>
    %c31_i32 = arith.constant 31 : i32
    %67 = tpu.dynamic_rotate %8 by %c31_i32 dim 1 : vector<8x256xf32>, i32 -> vector<8x256xf32>
    %c11 = arith.constant 11 : index
    %c0_17 = arith.constant 0 : index
    %68 = vector.load %arg2[%c11, %c0_17] : memref<98x256xf32, #tpu.memory_space<vmem>>, vector<1x256xf32>
    %69 = vector.broadcast %68 : vector<1x256xf32> to vector<8x256xf32>
    %70 = arith.mulf %67, %69 : vector<8x256xf32>
    %71 = arith.addf %66, %70 : vector<8x256xf32>
    %c30_i32 = arith.constant 30 : i32
    %72 = tpu.dynamic_rotate %8 by %c30_i32 dim 1 : vector<8x256xf32>, i32 -> vector<8x256xf32>
    %c12 = arith.constant 12 : index
    %c0_18 = arith.constant 0 : index
    %73 = vector.load %arg2[%c12, %c0_18] : memref<98x256xf32, #tpu.memory_space<vmem>>, vector<1x256xf32>
    %74 = vector.broadcast %73 : vector<1x256xf32> to vector<8x256xf32>
    %75 = arith.mulf %72, %74 : vector<8x256xf32>
    %76 = arith.addf %71, %75 : vector<8x256xf32>
    %c29_i32 = arith.constant 29 : i32
    %77 = tpu.dynamic_rotate %8 by %c29_i32 dim 1 : vector<8x256xf32>, i32 -> vector<8x256xf32>
    %c13 = arith.constant 13 : index
    %c0_19 = arith.constant 0 : index
    %78 = vector.load %arg2[%c13, %c0_19] : memref<98x256xf32, #tpu.memory_space<vmem>>, vector<1x256xf32>
    %79 = vector.broadcast %78 : vector<1x256xf32> to vector<8x256xf32>
    %80 = arith.mulf %77, %79 : vector<8x256xf32>
    %81 = arith.addf %76, %80 : vector<8x256xf32>
    %c19_i32 = arith.constant 19 : i32
    %82 = tpu.dynamic_rotate %8 by %c19_i32 dim 1 : vector<8x256xf32>, i32 -> vector<8x256xf32>
    %c14 = arith.constant 14 : index
    %c0_20 = arith.constant 0 : index
    %83 = vector.load %arg2[%c14, %c0_20] : memref<98x256xf32, #tpu.memory_space<vmem>>, vector<1x256xf32>
    %84 = vector.broadcast %83 : vector<1x256xf32> to vector<8x256xf32>
    %85 = arith.mulf %82, %84 : vector<8x256xf32>
    %86 = arith.addf %81, %85 : vector<8x256xf32>
    %c18_i32 = arith.constant 18 : i32
    %87 = tpu.dynamic_rotate %8 by %c18_i32 dim 1 : vector<8x256xf32>, i32 -> vector<8x256xf32>
    %c15 = arith.constant 15 : index
    %c0_21 = arith.constant 0 : index
    %88 = vector.load %arg2[%c15, %c0_21] : memref<98x256xf32, #tpu.memory_space<vmem>>, vector<1x256xf32>
    %89 = vector.broadcast %88 : vector<1x256xf32> to vector<8x256xf32>
    %90 = arith.mulf %87, %89 : vector<8x256xf32>
    %91 = arith.addf %86, %90 : vector<8x256xf32>
    %c17_i32 = arith.constant 17 : i32
    %92 = tpu.dynamic_rotate %8 by %c17_i32 dim 1 : vector<8x256xf32>, i32 -> vector<8x256xf32>
    %c16 = arith.constant 16 : index
    %c0_22 = arith.constant 0 : index
    %93 = vector.load %arg2[%c16, %c0_22] : memref<98x256xf32, #tpu.memory_space<vmem>>, vector<1x256xf32>
    %94 = vector.broadcast %93 : vector<1x256xf32> to vector<8x256xf32>
    %95 = arith.mulf %92, %94 : vector<8x256xf32>
    %96 = arith.addf %91, %95 : vector<8x256xf32>
    %c16_i32 = arith.constant 16 : i32
    %97 = tpu.dynamic_rotate %8 by %c16_i32 dim 1 : vector<8x256xf32>, i32 -> vector<8x256xf32>
    %c17 = arith.constant 17 : index
    %c0_23 = arith.constant 0 : index
    %98 = vector.load %arg2[%c17, %c0_23] : memref<98x256xf32, #tpu.memory_space<vmem>>, vector<1x256xf32>
    %99 = vector.broadcast %98 : vector<1x256xf32> to vector<8x256xf32>
    %100 = arith.mulf %97, %99 : vector<8x256xf32>
    %101 = arith.addf %96, %100 : vector<8x256xf32>
    %c15_i32 = arith.constant 15 : i32
    %102 = tpu.dynamic_rotate %8 by %c15_i32 dim 1 : vector<8x256xf32>, i32 -> vector<8x256xf32>
    %c18 = arith.constant 18 : index
    %c0_24 = arith.constant 0 : index
    %103 = vector.load %arg2[%c18, %c0_24] : memref<98x256xf32, #tpu.memory_space<vmem>>, vector<1x256xf32>
    %104 = vector.broadcast %103 : vector<1x256xf32> to vector<8x256xf32>
    %105 = arith.mulf %102, %104 : vector<8x256xf32>
    %106 = arith.addf %101, %105 : vector<8x256xf32>
    %c14_i32 = arith.constant 14 : i32
    %107 = tpu.dynamic_rotate %8 by %c14_i32 dim 1 : vector<8x256xf32>, i32 -> vector<8x256xf32>
    %c19 = arith.constant 19 : index
    %c0_25 = arith.constant 0 : index
    %108 = vector.load %arg2[%c19, %c0_25] : memref<98x256xf32, #tpu.memory_space<vmem>>, vector<1x256xf32>
    %109 = vector.broadcast %108 : vector<1x256xf32> to vector<8x256xf32>
    %110 = arith.mulf %107, %109 : vector<8x256xf32>
    %111 = arith.addf %106, %110 : vector<8x256xf32>
    %c13_i32 = arith.constant 13 : i32
    %112 = tpu.dynamic_rotate %8 by %c13_i32 dim 1 : vector<8x256xf32>, i32 -> vector<8x256xf32>
    %c20 = arith.constant 20 : index
    %c0_26 = arith.constant 0 : index
    %113 = vector.load %arg2[%c20, %c0_26] : memref<98x256xf32, #tpu.memory_space<vmem>>, vector<1x256xf32>
    %114 = vector.broadcast %113 : vector<1x256xf32> to vector<8x256xf32>
    %115 = arith.mulf %112, %114 : vector<8x256xf32>
    %116 = arith.addf %111, %115 : vector<8x256xf32>
    %c3_i32 = arith.constant 3 : i32
    %117 = tpu.dynamic_rotate %8 by %c3_i32 dim 1 : vector<8x256xf32>, i32 -> vector<8x256xf32>
    %c21 = arith.constant 21 : index
    %c0_27 = arith.constant 0 : index
    %118 = vector.load %arg2[%c21, %c0_27] : memref<98x256xf32, #tpu.memory_space<vmem>>, vector<1x256xf32>
    %119 = vector.broadcast %118 : vector<1x256xf32> to vector<8x256xf32>
    %120 = arith.mulf %117, %119 : vector<8x256xf32>
    %121 = arith.addf %116, %120 : vector<8x256xf32>
    %c2_i32 = arith.constant 2 : i32
    %122 = tpu.dynamic_rotate %8 by %c2_i32 dim 1 : vector<8x256xf32>, i32 -> vector<8x256xf32>
    %c22 = arith.constant 22 : index
    %c0_28 = arith.constant 0 : index
    %123 = vector.load %arg2[%c22, %c0_28] : memref<98x256xf32, #tpu.memory_space<vmem>>, vector<1x256xf32>
    %124 = vector.broadcast %123 : vector<1x256xf32> to vector<8x256xf32>
    %125 = arith.mulf %122, %124 : vector<8x256xf32>
    %126 = arith.addf %121, %125 : vector<8x256xf32>
    %c1_i32_29 = arith.constant 1 : i32
    %127 = tpu.dynamic_rotate %8 by %c1_i32_29 dim 1 : vector<8x256xf32>, i32 -> vector<8x256xf32>
    %c23 = arith.constant 23 : index
    %c0_30 = arith.constant 0 : index
    %128 = vector.load %arg2[%c23, %c0_30] : memref<98x256xf32, #tpu.memory_space<vmem>>, vector<1x256xf32>
    %129 = vector.broadcast %128 : vector<1x256xf32> to vector<8x256xf32>
    %130 = arith.mulf %127, %129 : vector<8x256xf32>
    %131 = arith.addf %126, %130 : vector<8x256xf32>
    %c24 = arith.constant 24 : index
    %c0_31 = arith.constant 0 : index
    %132 = vector.load %arg2[%c24, %c0_31] : memref<98x256xf32, #tpu.memory_space<vmem>>, vector<1x256xf32>
    %133 = vector.broadcast %132 : vector<1x256xf32> to vector<8x256xf32>
    %134 = arith.mulf %8, %133 : vector<8x256xf32>
    %135 = arith.addf %131, %134 : vector<8x256xf32>
    %c255_i32 = arith.constant 255 : i32
    %136 = tpu.dynamic_rotate %8 by %c255_i32 dim 1 : vector<8x256xf32>, i32 -> vector<8x256xf32>
    %c25 = arith.constant 25 : index
    %c0_32 = arith.constant 0 : index
    %137 = vector.load %arg2[%c25, %c0_32] : memref<98x256xf32, #tpu.memory_space<vmem>>, vector<1x256xf32>
    %138 = vector.broadcast %137 : vector<1x256xf32> to vector<8x256xf32>
    %139 = arith.mulf %136, %138 : vector<8x256xf32>
    %140 = arith.addf %135, %139 : vector<8x256xf32>
    %c254_i32 = arith.constant 254 : i32
    %141 = tpu.dynamic_rotate %8 by %c254_i32 dim 1 : vector<8x256xf32>, i32 -> vector<8x256xf32>
    %c26 = arith.constant 26 : index
    %c0_33 = arith.constant 0 : index
    %142 = vector.load %arg2[%c26, %c0_33] : memref<98x256xf32, #tpu.memory_space<vmem>>, vector<1x256xf32>
    %143 = vector.broadcast %142 : vector<1x256xf32> to vector<8x256xf32>
    %144 = arith.mulf %141, %143 : vector<8x256xf32>
    %145 = arith.addf %140, %144 : vector<8x256xf32>
    %c253_i32 = arith.constant 253 : i32
    %146 = tpu.dynamic_rotate %8 by %c253_i32 dim 1 : vector<8x256xf32>, i32 -> vector<8x256xf32>
    %c27 = arith.constant 27 : index
    %c0_34 = arith.constant 0 : index
    %147 = vector.load %arg2[%c27, %c0_34] : memref<98x256xf32, #tpu.memory_space<vmem>>, vector<1x256xf32>
    %148 = vector.broadcast %147 : vector<1x256xf32> to vector<8x256xf32>
    %149 = arith.mulf %146, %148 : vector<8x256xf32>
    %150 = arith.addf %145, %149 : vector<8x256xf32>
    %c243_i32 = arith.constant 243 : i32
    %151 = tpu.dynamic_rotate %8 by %c243_i32 dim 1 : vector<8x256xf32>, i32 -> vector<8x256xf32>
    %c28 = arith.constant 28 : index
    %c0_35 = arith.constant 0 : index
    %152 = vector.load %arg2[%c28, %c0_35] : memref<98x256xf32, #tpu.memory_space<vmem>>, vector<1x256xf32>
    %153 = vector.broadcast %152 : vector<1x256xf32> to vector<8x256xf32>
    %154 = arith.mulf %151, %153 : vector<8x256xf32>
    %155 = arith.addf %150, %154 : vector<8x256xf32>
    %c242_i32 = arith.constant 242 : i32
    %156 = tpu.dynamic_rotate %8 by %c242_i32 dim 1 : vector<8x256xf32>, i32 -> vector<8x256xf32>
    %c29 = arith.constant 29 : index
    %c0_36 = arith.constant 0 : index
    %157 = vector.load %arg2[%c29, %c0_36] : memref<98x256xf32, #tpu.memory_space<vmem>>, vector<1x256xf32>
    %158 = vector.broadcast %157 : vector<1x256xf32> to vector<8x256xf32>
    %159 = arith.mulf %156, %158 : vector<8x256xf32>
    %160 = arith.addf %155, %159 : vector<8x256xf32>
    %c241_i32 = arith.constant 241 : i32
    %161 = tpu.dynamic_rotate %8 by %c241_i32 dim 1 : vector<8x256xf32>, i32 -> vector<8x256xf32>
    %c30 = arith.constant 30 : index
    %c0_37 = arith.constant 0 : index
    %162 = vector.load %arg2[%c30, %c0_37] : memref<98x256xf32, #tpu.memory_space<vmem>>, vector<1x256xf32>
    %163 = vector.broadcast %162 : vector<1x256xf32> to vector<8x256xf32>
    %164 = arith.mulf %161, %163 : vector<8x256xf32>
    %165 = arith.addf %160, %164 : vector<8x256xf32>
    %c240_i32 = arith.constant 240 : i32
    %166 = tpu.dynamic_rotate %8 by %c240_i32 dim 1 : vector<8x256xf32>, i32 -> vector<8x256xf32>
    %c31 = arith.constant 31 : index
    %c0_38 = arith.constant 0 : index
    %167 = vector.load %arg2[%c31, %c0_38] : memref<98x256xf32, #tpu.memory_space<vmem>>, vector<1x256xf32>
    %168 = vector.broadcast %167 : vector<1x256xf32> to vector<8x256xf32>
    %169 = arith.mulf %166, %168 : vector<8x256xf32>
    %170 = arith.addf %165, %169 : vector<8x256xf32>
    %c239_i32 = arith.constant 239 : i32
    %171 = tpu.dynamic_rotate %8 by %c239_i32 dim 1 : vector<8x256xf32>, i32 -> vector<8x256xf32>
    %c32 = arith.constant 32 : index
    %c0_39 = arith.constant 0 : index
    %172 = vector.load %arg2[%c32, %c0_39] : memref<98x256xf32, #tpu.memory_space<vmem>>, vector<1x256xf32>
    %173 = vector.broadcast %172 : vector<1x256xf32> to vector<8x256xf32>
    %174 = arith.mulf %171, %173 : vector<8x256xf32>
    %175 = arith.addf %170, %174 : vector<8x256xf32>
    %c238_i32 = arith.constant 238 : i32
    %176 = tpu.dynamic_rotate %8 by %c238_i32 dim 1 : vector<8x256xf32>, i32 -> vector<8x256xf32>
    %c33 = arith.constant 33 : index
    %c0_40 = arith.constant 0 : index
    %177 = vector.load %arg2[%c33, %c0_40] : memref<98x256xf32, #tpu.memory_space<vmem>>, vector<1x256xf32>
    %178 = vector.broadcast %177 : vector<1x256xf32> to vector<8x256xf32>
    %179 = arith.mulf %176, %178 : vector<8x256xf32>
    %180 = arith.addf %175, %179 : vector<8x256xf32>
    %c237_i32 = arith.constant 237 : i32
    %181 = tpu.dynamic_rotate %8 by %c237_i32 dim 1 : vector<8x256xf32>, i32 -> vector<8x256xf32>
    %c34 = arith.constant 34 : index
    %c0_41 = arith.constant 0 : index
    %182 = vector.load %arg2[%c34, %c0_41] : memref<98x256xf32, #tpu.memory_space<vmem>>, vector<1x256xf32>
    %183 = vector.broadcast %182 : vector<1x256xf32> to vector<8x256xf32>
    %184 = arith.mulf %181, %183 : vector<8x256xf32>
    %185 = arith.addf %180, %184 : vector<8x256xf32>
    %c227_i32 = arith.constant 227 : i32
    %186 = tpu.dynamic_rotate %8 by %c227_i32 dim 1 : vector<8x256xf32>, i32 -> vector<8x256xf32>
    %c35 = arith.constant 35 : index
    %c0_42 = arith.constant 0 : index
    %187 = vector.load %arg2[%c35, %c0_42] : memref<98x256xf32, #tpu.memory_space<vmem>>, vector<1x256xf32>
    %188 = vector.broadcast %187 : vector<1x256xf32> to vector<8x256xf32>
    %189 = arith.mulf %186, %188 : vector<8x256xf32>
    %190 = arith.addf %185, %189 : vector<8x256xf32>
    %c226_i32 = arith.constant 226 : i32
    %191 = tpu.dynamic_rotate %8 by %c226_i32 dim 1 : vector<8x256xf32>, i32 -> vector<8x256xf32>
    %c36 = arith.constant 36 : index
    %c0_43 = arith.constant 0 : index
    %192 = vector.load %arg2[%c36, %c0_43] : memref<98x256xf32, #tpu.memory_space<vmem>>, vector<1x256xf32>
    %193 = vector.broadcast %192 : vector<1x256xf32> to vector<8x256xf32>
    %194 = arith.mulf %191, %193 : vector<8x256xf32>
    %195 = arith.addf %190, %194 : vector<8x256xf32>
    %c225_i32 = arith.constant 225 : i32
    %196 = tpu.dynamic_rotate %8 by %c225_i32 dim 1 : vector<8x256xf32>, i32 -> vector<8x256xf32>
    %c37 = arith.constant 37 : index
    %c0_44 = arith.constant 0 : index
    %197 = vector.load %arg2[%c37, %c0_44] : memref<98x256xf32, #tpu.memory_space<vmem>>, vector<1x256xf32>
    %198 = vector.broadcast %197 : vector<1x256xf32> to vector<8x256xf32>
    %199 = arith.mulf %196, %198 : vector<8x256xf32>
    %200 = arith.addf %195, %199 : vector<8x256xf32>
    %c224_i32 = arith.constant 224 : i32
    %201 = tpu.dynamic_rotate %8 by %c224_i32 dim 1 : vector<8x256xf32>, i32 -> vector<8x256xf32>
    %c38 = arith.constant 38 : index
    %c0_45 = arith.constant 0 : index
    %202 = vector.load %arg2[%c38, %c0_45] : memref<98x256xf32, #tpu.memory_space<vmem>>, vector<1x256xf32>
    %203 = vector.broadcast %202 : vector<1x256xf32> to vector<8x256xf32>
    %204 = arith.mulf %201, %203 : vector<8x256xf32>
    %205 = arith.addf %200, %204 : vector<8x256xf32>
    %c223_i32 = arith.constant 223 : i32
    %206 = tpu.dynamic_rotate %8 by %c223_i32 dim 1 : vector<8x256xf32>, i32 -> vector<8x256xf32>
    %c39 = arith.constant 39 : index
    %c0_46 = arith.constant 0 : index
    %207 = vector.load %arg2[%c39, %c0_46] : memref<98x256xf32, #tpu.memory_space<vmem>>, vector<1x256xf32>
    %208 = vector.broadcast %207 : vector<1x256xf32> to vector<8x256xf32>
    %209 = arith.mulf %206, %208 : vector<8x256xf32>
    %210 = arith.addf %205, %209 : vector<8x256xf32>
    %c222_i32 = arith.constant 222 : i32
    %211 = tpu.dynamic_rotate %8 by %c222_i32 dim 1 : vector<8x256xf32>, i32 -> vector<8x256xf32>
    %c40 = arith.constant 40 : index
    %c0_47 = arith.constant 0 : index
    %212 = vector.load %arg2[%c40, %c0_47] : memref<98x256xf32, #tpu.memory_space<vmem>>, vector<1x256xf32>
    %213 = vector.broadcast %212 : vector<1x256xf32> to vector<8x256xf32>
    %214 = arith.mulf %211, %213 : vector<8x256xf32>
    %215 = arith.addf %210, %214 : vector<8x256xf32>
    %c221_i32 = arith.constant 221 : i32
    %216 = tpu.dynamic_rotate %8 by %c221_i32 dim 1 : vector<8x256xf32>, i32 -> vector<8x256xf32>
    %c41 = arith.constant 41 : index
    %c0_48 = arith.constant 0 : index
    %217 = vector.load %arg2[%c41, %c0_48] : memref<98x256xf32, #tpu.memory_space<vmem>>, vector<1x256xf32>
    %218 = vector.broadcast %217 : vector<1x256xf32> to vector<8x256xf32>
    %219 = arith.mulf %216, %218 : vector<8x256xf32>
    %220 = arith.addf %215, %219 : vector<8x256xf32>
    %c211_i32 = arith.constant 211 : i32
    %221 = tpu.dynamic_rotate %8 by %c211_i32 dim 1 : vector<8x256xf32>, i32 -> vector<8x256xf32>
    %c42 = arith.constant 42 : index
    %c0_49 = arith.constant 0 : index
    %222 = vector.load %arg2[%c42, %c0_49] : memref<98x256xf32, #tpu.memory_space<vmem>>, vector<1x256xf32>
    %223 = vector.broadcast %222 : vector<1x256xf32> to vector<8x256xf32>
    %224 = arith.mulf %221, %223 : vector<8x256xf32>
    %225 = arith.addf %220, %224 : vector<8x256xf32>
    %c210_i32 = arith.constant 210 : i32
    %226 = tpu.dynamic_rotate %8 by %c210_i32 dim 1 : vector<8x256xf32>, i32 -> vector<8x256xf32>
    %c43 = arith.constant 43 : index
    %c0_50 = arith.constant 0 : index
    %227 = vector.load %arg2[%c43, %c0_50] : memref<98x256xf32, #tpu.memory_space<vmem>>, vector<1x256xf32>
    %228 = vector.broadcast %227 : vector<1x256xf32> to vector<8x256xf32>
    %229 = arith.mulf %226, %228 : vector<8x256xf32>
    %230 = arith.addf %225, %229 : vector<8x256xf32>
    %c209_i32 = arith.constant 209 : i32
    %231 = tpu.dynamic_rotate %8 by %c209_i32 dim 1 : vector<8x256xf32>, i32 -> vector<8x256xf32>
    %c44 = arith.constant 44 : index
    %c0_51 = arith.constant 0 : index
    %232 = vector.load %arg2[%c44, %c0_51] : memref<98x256xf32, #tpu.memory_space<vmem>>, vector<1x256xf32>
    %233 = vector.broadcast %232 : vector<1x256xf32> to vector<8x256xf32>
    %234 = arith.mulf %231, %233 : vector<8x256xf32>
    %235 = arith.addf %230, %234 : vector<8x256xf32>
    %c208_i32 = arith.constant 208 : i32
    %236 = tpu.dynamic_rotate %8 by %c208_i32 dim 1 : vector<8x256xf32>, i32 -> vector<8x256xf32>
    %c45 = arith.constant 45 : index
    %c0_52 = arith.constant 0 : index
    %237 = vector.load %arg2[%c45, %c0_52] : memref<98x256xf32, #tpu.memory_space<vmem>>, vector<1x256xf32>
    %238 = vector.broadcast %237 : vector<1x256xf32> to vector<8x256xf32>
    %239 = arith.mulf %236, %238 : vector<8x256xf32>
    %240 = arith.addf %235, %239 : vector<8x256xf32>
    %c207_i32 = arith.constant 207 : i32
    %241 = tpu.dynamic_rotate %8 by %c207_i32 dim 1 : vector<8x256xf32>, i32 -> vector<8x256xf32>
    %c46 = arith.constant 46 : index
    %c0_53 = arith.constant 0 : index
    %242 = vector.load %arg2[%c46, %c0_53] : memref<98x256xf32, #tpu.memory_space<vmem>>, vector<1x256xf32>
    %243 = vector.broadcast %242 : vector<1x256xf32> to vector<8x256xf32>
    %244 = arith.mulf %241, %243 : vector<8x256xf32>
    %245 = arith.addf %240, %244 : vector<8x256xf32>
    %c206_i32 = arith.constant 206 : i32
    %246 = tpu.dynamic_rotate %8 by %c206_i32 dim 1 : vector<8x256xf32>, i32 -> vector<8x256xf32>
    %c47 = arith.constant 47 : index
    %c0_54 = arith.constant 0 : index
    %247 = vector.load %arg2[%c47, %c0_54] : memref<98x256xf32, #tpu.memory_space<vmem>>, vector<1x256xf32>
    %248 = vector.broadcast %247 : vector<1x256xf32> to vector<8x256xf32>
    %249 = arith.mulf %246, %248 : vector<8x256xf32>
    %250 = arith.addf %245, %249 : vector<8x256xf32>
    %c205_i32 = arith.constant 205 : i32
    %251 = tpu.dynamic_rotate %8 by %c205_i32 dim 1 : vector<8x256xf32>, i32 -> vector<8x256xf32>
    %c48 = arith.constant 48 : index
    %c0_55 = arith.constant 0 : index
    %252 = vector.load %arg2[%c48, %c0_55] : memref<98x256xf32, #tpu.memory_space<vmem>>, vector<1x256xf32>
    %253 = vector.broadcast %252 : vector<1x256xf32> to vector<8x256xf32>
    %254 = arith.mulf %251, %253 : vector<8x256xf32>
    %255 = arith.addf %250, %254 : vector<8x256xf32>
    %c51_i32_56 = arith.constant 51 : i32
    %256 = tpu.dynamic_rotate %6#1 by %c51_i32_56 dim 1 : vector<8x256xf32>, i32 -> vector<8x256xf32>
    %c49 = arith.constant 49 : index
    %c0_57 = arith.constant 0 : index
    %257 = vector.load %arg2[%c49, %c0_57] : memref<98x256xf32, #tpu.memory_space<vmem>>, vector<1x256xf32>
    %258 = vector.broadcast %257 : vector<1x256xf32> to vector<8x256xf32>
    %259 = arith.mulf %256, %258 : vector<8x256xf32>
    %260 = arith.addf %255, %259 : vector<8x256xf32>
    %c50_i32_58 = arith.constant 50 : i32
    %261 = tpu.dynamic_rotate %6#1 by %c50_i32_58 dim 1 : vector<8x256xf32>, i32 -> vector<8x256xf32>
    %c50 = arith.constant 50 : index
    %c0_59 = arith.constant 0 : index
    %262 = vector.load %arg2[%c50, %c0_59] : memref<98x256xf32, #tpu.memory_space<vmem>>, vector<1x256xf32>
    %263 = vector.broadcast %262 : vector<1x256xf32> to vector<8x256xf32>
    %264 = arith.mulf %261, %263 : vector<8x256xf32>
    %265 = arith.addf %260, %264 : vector<8x256xf32>
    %c49_i32_60 = arith.constant 49 : i32
    %266 = tpu.dynamic_rotate %6#1 by %c49_i32_60 dim 1 : vector<8x256xf32>, i32 -> vector<8x256xf32>
    %c51 = arith.constant 51 : index
    %c0_61 = arith.constant 0 : index
    %267 = vector.load %arg2[%c51, %c0_61] : memref<98x256xf32, #tpu.memory_space<vmem>>, vector<1x256xf32>
    %268 = vector.broadcast %267 : vector<1x256xf32> to vector<8x256xf32>
    %269 = arith.mulf %266, %268 : vector<8x256xf32>
    %270 = arith.addf %265, %269 : vector<8x256xf32>
    %c48_i32_62 = arith.constant 48 : i32
    %271 = tpu.dynamic_rotate %6#1 by %c48_i32_62 dim 1 : vector<8x256xf32>, i32 -> vector<8x256xf32>
    %c52 = arith.constant 52 : index
    %c0_63 = arith.constant 0 : index
    %272 = vector.load %arg2[%c52, %c0_63] : memref<98x256xf32, #tpu.memory_space<vmem>>, vector<1x256xf32>
    %273 = vector.broadcast %272 : vector<1x256xf32> to vector<8x256xf32>
    %274 = arith.mulf %271, %273 : vector<8x256xf32>
    %275 = arith.addf %270, %274 : vector<8x256xf32>
    %c47_i32_64 = arith.constant 47 : i32
    %276 = tpu.dynamic_rotate %6#1 by %c47_i32_64 dim 1 : vector<8x256xf32>, i32 -> vector<8x256xf32>
    %c53 = arith.constant 53 : index
    %c0_65 = arith.constant 0 : index
    %277 = vector.load %arg2[%c53, %c0_65] : memref<98x256xf32, #tpu.memory_space<vmem>>, vector<1x256xf32>
    %278 = vector.broadcast %277 : vector<1x256xf32> to vector<8x256xf32>
    %279 = arith.mulf %276, %278 : vector<8x256xf32>
    %280 = arith.addf %275, %279 : vector<8x256xf32>
    %c46_i32_66 = arith.constant 46 : i32
    %281 = tpu.dynamic_rotate %6#1 by %c46_i32_66 dim 1 : vector<8x256xf32>, i32 -> vector<8x256xf32>
    %c54 = arith.constant 54 : index
    %c0_67 = arith.constant 0 : index
    %282 = vector.load %arg2[%c54, %c0_67] : memref<98x256xf32, #tpu.memory_space<vmem>>, vector<1x256xf32>
    %283 = vector.broadcast %282 : vector<1x256xf32> to vector<8x256xf32>
    %284 = arith.mulf %281, %283 : vector<8x256xf32>
    %285 = arith.addf %280, %284 : vector<8x256xf32>
    %c45_i32_68 = arith.constant 45 : i32
    %286 = tpu.dynamic_rotate %6#1 by %c45_i32_68 dim 1 : vector<8x256xf32>, i32 -> vector<8x256xf32>
    %c55 = arith.constant 55 : index
    %c0_69 = arith.constant 0 : index
    %287 = vector.load %arg2[%c55, %c0_69] : memref<98x256xf32, #tpu.memory_space<vmem>>, vector<1x256xf32>
    %288 = vector.broadcast %287 : vector<1x256xf32> to vector<8x256xf32>
    %289 = arith.mulf %286, %288 : vector<8x256xf32>
    %290 = arith.addf %285, %289 : vector<8x256xf32>
    %c35_i32_70 = arith.constant 35 : i32
    %291 = tpu.dynamic_rotate %6#1 by %c35_i32_70 dim 1 : vector<8x256xf32>, i32 -> vector<8x256xf32>
    %c56 = arith.constant 56 : index
    %c0_71 = arith.constant 0 : index
    %292 = vector.load %arg2[%c56, %c0_71] : memref<98x256xf32, #tpu.memory_space<vmem>>, vector<1x256xf32>
    %293 = vector.broadcast %292 : vector<1x256xf32> to vector<8x256xf32>
    %294 = arith.mulf %291, %293 : vector<8x256xf32>
    %295 = arith.addf %290, %294 : vector<8x256xf32>
    %c34_i32_72 = arith.constant 34 : i32
    %296 = tpu.dynamic_rotate %6#1 by %c34_i32_72 dim 1 : vector<8x256xf32>, i32 -> vector<8x256xf32>
    %c57 = arith.constant 57 : index
    %c0_73 = arith.constant 0 : index
    %297 = vector.load %arg2[%c57, %c0_73] : memref<98x256xf32, #tpu.memory_space<vmem>>, vector<1x256xf32>
    %298 = vector.broadcast %297 : vector<1x256xf32> to vector<8x256xf32>
    %299 = arith.mulf %296, %298 : vector<8x256xf32>
    %300 = arith.addf %295, %299 : vector<8x256xf32>
    %c33_i32_74 = arith.constant 33 : i32
    %301 = tpu.dynamic_rotate %6#1 by %c33_i32_74 dim 1 : vector<8x256xf32>, i32 -> vector<8x256xf32>
    %c58 = arith.constant 58 : index
    %c0_75 = arith.constant 0 : index
    %302 = vector.load %arg2[%c58, %c0_75] : memref<98x256xf32, #tpu.memory_space<vmem>>, vector<1x256xf32>
    %303 = vector.broadcast %302 : vector<1x256xf32> to vector<8x256xf32>
    %304 = arith.mulf %301, %303 : vector<8x256xf32>
    %305 = arith.addf %300, %304 : vector<8x256xf32>
    %c32_i32_76 = arith.constant 32 : i32
    %306 = tpu.dynamic_rotate %6#1 by %c32_i32_76 dim 1 : vector<8x256xf32>, i32 -> vector<8x256xf32>
    %c59 = arith.constant 59 : index
    %c0_77 = arith.constant 0 : index
    %307 = vector.load %arg2[%c59, %c0_77] : memref<98x256xf32, #tpu.memory_space<vmem>>, vector<1x256xf32>
    %308 = vector.broadcast %307 : vector<1x256xf32> to vector<8x256xf32>
    %309 = arith.mulf %306, %308 : vector<8x256xf32>
    %310 = arith.addf %305, %309 : vector<8x256xf32>
    %c31_i32_78 = arith.constant 31 : i32
    %311 = tpu.dynamic_rotate %6#1 by %c31_i32_78 dim 1 : vector<8x256xf32>, i32 -> vector<8x256xf32>
    %c60 = arith.constant 60 : index
    %c0_79 = arith.constant 0 : index
    %312 = vector.load %arg2[%c60, %c0_79] : memref<98x256xf32, #tpu.memory_space<vmem>>, vector<1x256xf32>
    %313 = vector.broadcast %312 : vector<1x256xf32> to vector<8x256xf32>
    %314 = arith.mulf %311, %313 : vector<8x256xf32>
    %315 = arith.addf %310, %314 : vector<8x256xf32>
    %c30_i32_80 = arith.constant 30 : i32
    %316 = tpu.dynamic_rotate %6#1 by %c30_i32_80 dim 1 : vector<8x256xf32>, i32 -> vector<8x256xf32>
    %c61 = arith.constant 61 : index
    %c0_81 = arith.constant 0 : index
    %317 = vector.load %arg2[%c61, %c0_81] : memref<98x256xf32, #tpu.memory_space<vmem>>, vector<1x256xf32>
    %318 = vector.broadcast %317 : vector<1x256xf32> to vector<8x256xf32>
    %319 = arith.mulf %316, %318 : vector<8x256xf32>
    %320 = arith.addf %315, %319 : vector<8x256xf32>
    %c29_i32_82 = arith.constant 29 : i32
    %321 = tpu.dynamic_rotate %6#1 by %c29_i32_82 dim 1 : vector<8x256xf32>, i32 -> vector<8x256xf32>
    %c62 = arith.constant 62 : index
    %c0_83 = arith.constant 0 : index
    %322 = vector.load %arg2[%c62, %c0_83] : memref<98x256xf32, #tpu.memory_space<vmem>>, vector<1x256xf32>
    %323 = vector.broadcast %322 : vector<1x256xf32> to vector<8x256xf32>
    %324 = arith.mulf %321, %323 : vector<8x256xf32>
    %325 = arith.addf %320, %324 : vector<8x256xf32>
    %c19_i32_84 = arith.constant 19 : i32
    %326 = tpu.dynamic_rotate %6#1 by %c19_i32_84 dim 1 : vector<8x256xf32>, i32 -> vector<8x256xf32>
    %c63 = arith.constant 63 : index
    %c0_85 = arith.constant 0 : index
    %327 = vector.load %arg2[%c63, %c0_85] : memref<98x256xf32, #tpu.memory_space<vmem>>, vector<1x256xf32>
    %328 = vector.broadcast %327 : vector<1x256xf32> to vector<8x256xf32>
    %329 = arith.mulf %326, %328 : vector<8x256xf32>
    %330 = arith.addf %325, %329 : vector<8x256xf32>
    %c18_i32_86 = arith.constant 18 : i32
    %331 = tpu.dynamic_rotate %6#1 by %c18_i32_86 dim 1 : vector<8x256xf32>, i32 -> vector<8x256xf32>
    %c64 = arith.constant 64 : index
    %c0_87 = arith.constant 0 : index
    %332 = vector.load %arg2[%c64, %c0_87] : memref<98x256xf32, #tpu.memory_space<vmem>>, vector<1x256xf32>
    %333 = vector.broadcast %332 : vector<1x256xf32> to vector<8x256xf32>
    %334 = arith.mulf %331, %333 : vector<8x256xf32>
    %335 = arith.addf %330, %334 : vector<8x256xf32>
    %c17_i32_88 = arith.constant 17 : i32
    %336 = tpu.dynamic_rotate %6#1 by %c17_i32_88 dim 1 : vector<8x256xf32>, i32 -> vector<8x256xf32>
    %c65 = arith.constant 65 : index
    %c0_89 = arith.constant 0 : index
    %337 = vector.load %arg2[%c65, %c0_89] : memref<98x256xf32, #tpu.memory_space<vmem>>, vector<1x256xf32>
    %338 = vector.broadcast %337 : vector<1x256xf32> to vector<8x256xf32>
    %339 = arith.mulf %336, %338 : vector<8x256xf32>
    %340 = arith.addf %335, %339 : vector<8x256xf32>
    %c16_i32_90 = arith.constant 16 : i32
    %341 = tpu.dynamic_rotate %6#1 by %c16_i32_90 dim 1 : vector<8x256xf32>, i32 -> vector<8x256xf32>
    %c66 = arith.constant 66 : index
    %c0_91 = arith.constant 0 : index
    %342 = vector.load %arg2[%c66, %c0_91] : memref<98x256xf32, #tpu.memory_space<vmem>>, vector<1x256xf32>
    %343 = vector.broadcast %342 : vector<1x256xf32> to vector<8x256xf32>
    %344 = arith.mulf %341, %343 : vector<8x256xf32>
    %345 = arith.addf %340, %344 : vector<8x256xf32>
    %c15_i32_92 = arith.constant 15 : i32
    %346 = tpu.dynamic_rotate %6#1 by %c15_i32_92 dim 1 : vector<8x256xf32>, i32 -> vector<8x256xf32>
    %c67 = arith.constant 67 : index
    %c0_93 = arith.constant 0 : index
    %347 = vector.load %arg2[%c67, %c0_93] : memref<98x256xf32, #tpu.memory_space<vmem>>, vector<1x256xf32>
    %348 = vector.broadcast %347 : vector<1x256xf32> to vector<8x256xf32>
    %349 = arith.mulf %346, %348 : vector<8x256xf32>
    %350 = arith.addf %345, %349 : vector<8x256xf32>
    %c14_i32_94 = arith.constant 14 : i32
    %351 = tpu.dynamic_rotate %6#1 by %c14_i32_94 dim 1 : vector<8x256xf32>, i32 -> vector<8x256xf32>
    %c68 = arith.constant 68 : index
    %c0_95 = arith.constant 0 : index
    %352 = vector.load %arg2[%c68, %c0_95] : memref<98x256xf32, #tpu.memory_space<vmem>>, vector<1x256xf32>
    %353 = vector.broadcast %352 : vector<1x256xf32> to vector<8x256xf32>
    %354 = arith.mulf %351, %353 : vector<8x256xf32>
    %355 = arith.addf %350, %354 : vector<8x256xf32>
    %c13_i32_96 = arith.constant 13 : i32
    %356 = tpu.dynamic_rotate %6#1 by %c13_i32_96 dim 1 : vector<8x256xf32>, i32 -> vector<8x256xf32>
    %c69 = arith.constant 69 : index
    %c0_97 = arith.constant 0 : index
    %357 = vector.load %arg2[%c69, %c0_97] : memref<98x256xf32, #tpu.memory_space<vmem>>, vector<1x256xf32>
    %358 = vector.broadcast %357 : vector<1x256xf32> to vector<8x256xf32>
    %359 = arith.mulf %356, %358 : vector<8x256xf32>
    %360 = arith.addf %355, %359 : vector<8x256xf32>
    %c3_i32_98 = arith.constant 3 : i32
    %361 = tpu.dynamic_rotate %6#1 by %c3_i32_98 dim 1 : vector<8x256xf32>, i32 -> vector<8x256xf32>
    %c70 = arith.constant 70 : index
    %c0_99 = arith.constant 0 : index
    %362 = vector.load %arg2[%c70, %c0_99] : memref<98x256xf32, #tpu.memory_space<vmem>>, vector<1x256xf32>
    %363 = vector.broadcast %362 : vector<1x256xf32> to vector<8x256xf32>
    %364 = arith.mulf %361, %363 : vector<8x256xf32>
    %365 = arith.addf %360, %364 : vector<8x256xf32>
    %c2_i32_100 = arith.constant 2 : i32
    %366 = tpu.dynamic_rotate %6#1 by %c2_i32_100 dim 1 : vector<8x256xf32>, i32 -> vector<8x256xf32>
    %c71 = arith.constant 71 : index
    %c0_101 = arith.constant 0 : index
    %367 = vector.load %arg2[%c71, %c0_101] : memref<98x256xf32, #tpu.memory_space<vmem>>, vector<1x256xf32>
    %368 = vector.broadcast %367 : vector<1x256xf32> to vector<8x256xf32>
    %369 = arith.mulf %366, %368 : vector<8x256xf32>
    %370 = arith.addf %365, %369 : vector<8x256xf32>
    %c1_i32_102 = arith.constant 1 : i32
    %371 = tpu.dynamic_rotate %6#1 by %c1_i32_102 dim 1 : vector<8x256xf32>, i32 -> vector<8x256xf32>
    %c72 = arith.constant 72 : index
    %c0_103 = arith.constant 0 : index
    %372 = vector.load %arg2[%c72, %c0_103] : memref<98x256xf32, #tpu.memory_space<vmem>>, vector<1x256xf32>
    %373 = vector.broadcast %372 : vector<1x256xf32> to vector<8x256xf32>
    %374 = arith.mulf %371, %373 : vector<8x256xf32>
    %375 = arith.addf %370, %374 : vector<8x256xf32>
    %c73 = arith.constant 73 : index
    %c0_104 = arith.constant 0 : index
    %376 = vector.load %arg2[%c73, %c0_104] : memref<98x256xf32, #tpu.memory_space<vmem>>, vector<1x256xf32>
    %377 = vector.broadcast %376 : vector<1x256xf32> to vector<8x256xf32>
    %378 = arith.mulf %6#1, %377 : vector<8x256xf32>
    %379 = arith.addf %375, %378 : vector<8x256xf32>
    %c255_i32_105 = arith.constant 255 : i32
    %380 = tpu.dynamic_rotate %6#1 by %c255_i32_105 dim 1 : vector<8x256xf32>, i32 -> vector<8x256xf32>
    %c74 = arith.constant 74 : index
    %c0_106 = arith.constant 0 : index
    %381 = vector.load %arg2[%c74, %c0_106] : memref<98x256xf32, #tpu.memory_space<vmem>>, vector<1x256xf32>
    %382 = vector.broadcast %381 : vector<1x256xf32> to vector<8x256xf32>
    %383 = arith.mulf %380, %382 : vector<8x256xf32>
    %384 = arith.addf %379, %383 : vector<8x256xf32>
    %c254_i32_107 = arith.constant 254 : i32
    %385 = tpu.dynamic_rotate %6#1 by %c254_i32_107 dim 1 : vector<8x256xf32>, i32 -> vector<8x256xf32>
    %c75 = arith.constant 75 : index
    %c0_108 = arith.constant 0 : index
    %386 = vector.load %arg2[%c75, %c0_108] : memref<98x256xf32, #tpu.memory_space<vmem>>, vector<1x256xf32>
    %387 = vector.broadcast %386 : vector<1x256xf32> to vector<8x256xf32>
    %388 = arith.mulf %385, %387 : vector<8x256xf32>
    %389 = arith.addf %384, %388 : vector<8x256xf32>
    %c253_i32_109 = arith.constant 253 : i32
    %390 = tpu.dynamic_rotate %6#1 by %c253_i32_109 dim 1 : vector<8x256xf32>, i32 -> vector<8x256xf32>
    %c76 = arith.constant 76 : index
    %c0_110 = arith.constant 0 : index
    %391 = vector.load %arg2[%c76, %c0_110] : memref<98x256xf32, #tpu.memory_space<vmem>>, vector<1x256xf32>
    %392 = vector.broadcast %391 : vector<1x256xf32> to vector<8x256xf32>
    %393 = arith.mulf %390, %392 : vector<8x256xf32>
    %394 = arith.addf %389, %393 : vector<8x256xf32>
    %c243_i32_111 = arith.constant 243 : i32
    %395 = tpu.dynamic_rotate %6#1 by %c243_i32_111 dim 1 : vector<8x256xf32>, i32 -> vector<8x256xf32>
    %c77 = arith.constant 77 : index
    %c0_112 = arith.constant 0 : index
    %396 = vector.load %arg2[%c77, %c0_112] : memref<98x256xf32, #tpu.memory_space<vmem>>, vector<1x256xf32>
    %397 = vector.broadcast %396 : vector<1x256xf32> to vector<8x256xf32>
    %398 = arith.mulf %395, %397 : vector<8x256xf32>
    %399 = arith.addf %394, %398 : vector<8x256xf32>
    %c242_i32_113 = arith.constant 242 : i32
    %400 = tpu.dynamic_rotate %6#1 by %c242_i32_113 dim 1 : vector<8x256xf32>, i32 -> vector<8x256xf32>
    %c78 = arith.constant 78 : index
    %c0_114 = arith.constant 0 : index
    %401 = vector.load %arg2[%c78, %c0_114] : memref<98x256xf32, #tpu.memory_space<vmem>>, vector<1x256xf32>
    %402 = vector.broadcast %401 : vector<1x256xf32> to vector<8x256xf32>
    %403 = arith.mulf %400, %402 : vector<8x256xf32>
    %404 = arith.addf %399, %403 : vector<8x256xf32>
    %c241_i32_115 = arith.constant 241 : i32
    %405 = tpu.dynamic_rotate %6#1 by %c241_i32_115 dim 1 : vector<8x256xf32>, i32 -> vector<8x256xf32>
    %c79 = arith.constant 79 : index
    %c0_116 = arith.constant 0 : index
    %406 = vector.load %arg2[%c79, %c0_116] : memref<98x256xf32, #tpu.memory_space<vmem>>, vector<1x256xf32>
    %407 = vector.broadcast %406 : vector<1x256xf32> to vector<8x256xf32>
    %408 = arith.mulf %405, %407 : vector<8x256xf32>
    %409 = arith.addf %404, %408 : vector<8x256xf32>
    %c240_i32_117 = arith.constant 240 : i32
    %410 = tpu.dynamic_rotate %6#1 by %c240_i32_117 dim 1 : vector<8x256xf32>, i32 -> vector<8x256xf32>
    %c80 = arith.constant 80 : index
    %c0_118 = arith.constant 0 : index
    %411 = vector.load %arg2[%c80, %c0_118] : memref<98x256xf32, #tpu.memory_space<vmem>>, vector<1x256xf32>
    %412 = vector.broadcast %411 : vector<1x256xf32> to vector<8x256xf32>
    %413 = arith.mulf %410, %412 : vector<8x256xf32>
    %414 = arith.addf %409, %413 : vector<8x256xf32>
    %c239_i32_119 = arith.constant 239 : i32
    %415 = tpu.dynamic_rotate %6#1 by %c239_i32_119 dim 1 : vector<8x256xf32>, i32 -> vector<8x256xf32>
    %c81 = arith.constant 81 : index
    %c0_120 = arith.constant 0 : index
    %416 = vector.load %arg2[%c81, %c0_120] : memref<98x256xf32, #tpu.memory_space<vmem>>, vector<1x256xf32>
    %417 = vector.broadcast %416 : vector<1x256xf32> to vector<8x256xf32>
    %418 = arith.mulf %415, %417 : vector<8x256xf32>
    %419 = arith.addf %414, %418 : vector<8x256xf32>
    %c238_i32_121 = arith.constant 238 : i32
    %420 = tpu.dynamic_rotate %6#1 by %c238_i32_121 dim 1 : vector<8x256xf32>, i32 -> vector<8x256xf32>
    %c82 = arith.constant 82 : index
    %c0_122 = arith.constant 0 : index
    %421 = vector.load %arg2[%c82, %c0_122] : memref<98x256xf32, #tpu.memory_space<vmem>>, vector<1x256xf32>
    %422 = vector.broadcast %421 : vector<1x256xf32> to vector<8x256xf32>
    %423 = arith.mulf %420, %422 : vector<8x256xf32>
    %424 = arith.addf %419, %423 : vector<8x256xf32>
    %c237_i32_123 = arith.constant 237 : i32
    %425 = tpu.dynamic_rotate %6#1 by %c237_i32_123 dim 1 : vector<8x256xf32>, i32 -> vector<8x256xf32>
    %c83 = arith.constant 83 : index
    %c0_124 = arith.constant 0 : index
    %426 = vector.load %arg2[%c83, %c0_124] : memref<98x256xf32, #tpu.memory_space<vmem>>, vector<1x256xf32>
    %427 = vector.broadcast %426 : vector<1x256xf32> to vector<8x256xf32>
    %428 = arith.mulf %425, %427 : vector<8x256xf32>
    %429 = arith.addf %424, %428 : vector<8x256xf32>
    %c227_i32_125 = arith.constant 227 : i32
    %430 = tpu.dynamic_rotate %6#1 by %c227_i32_125 dim 1 : vector<8x256xf32>, i32 -> vector<8x256xf32>
    %c84 = arith.constant 84 : index
    %c0_126 = arith.constant 0 : index
    %431 = vector.load %arg2[%c84, %c0_126] : memref<98x256xf32, #tpu.memory_space<vmem>>, vector<1x256xf32>
    %432 = vector.broadcast %431 : vector<1x256xf32> to vector<8x256xf32>
    %433 = arith.mulf %430, %432 : vector<8x256xf32>
    %434 = arith.addf %429, %433 : vector<8x256xf32>
    %c226_i32_127 = arith.constant 226 : i32
    %435 = tpu.dynamic_rotate %6#1 by %c226_i32_127 dim 1 : vector<8x256xf32>, i32 -> vector<8x256xf32>
    %c85 = arith.constant 85 : index
    %c0_128 = arith.constant 0 : index
    %436 = vector.load %arg2[%c85, %c0_128] : memref<98x256xf32, #tpu.memory_space<vmem>>, vector<1x256xf32>
    %437 = vector.broadcast %436 : vector<1x256xf32> to vector<8x256xf32>
    %438 = arith.mulf %435, %437 : vector<8x256xf32>
    %439 = arith.addf %434, %438 : vector<8x256xf32>
    %c225_i32_129 = arith.constant 225 : i32
    %440 = tpu.dynamic_rotate %6#1 by %c225_i32_129 dim 1 : vector<8x256xf32>, i32 -> vector<8x256xf32>
    %c86 = arith.constant 86 : index
    %c0_130 = arith.constant 0 : index
    %441 = vector.load %arg2[%c86, %c0_130] : memref<98x256xf32, #tpu.memory_space<vmem>>, vector<1x256xf32>
    %442 = vector.broadcast %441 : vector<1x256xf32> to vector<8x256xf32>
    %443 = arith.mulf %440, %442 : vector<8x256xf32>
    %444 = arith.addf %439, %443 : vector<8x256xf32>
    %c224_i32_131 = arith.constant 224 : i32
    %445 = tpu.dynamic_rotate %6#1 by %c224_i32_131 dim 1 : vector<8x256xf32>, i32 -> vector<8x256xf32>
    %c87 = arith.constant 87 : index
    %c0_132 = arith.constant 0 : index
    %446 = vector.load %arg2[%c87, %c0_132] : memref<98x256xf32, #tpu.memory_space<vmem>>, vector<1x256xf32>
    %447 = vector.broadcast %446 : vector<1x256xf32> to vector<8x256xf32>
    %448 = arith.mulf %445, %447 : vector<8x256xf32>
    %449 = arith.addf %444, %448 : vector<8x256xf32>
    %c223_i32_133 = arith.constant 223 : i32
    %450 = tpu.dynamic_rotate %6#1 by %c223_i32_133 dim 1 : vector<8x256xf32>, i32 -> vector<8x256xf32>
    %c88 = arith.constant 88 : index
    %c0_134 = arith.constant 0 : index
    %451 = vector.load %arg2[%c88, %c0_134] : memref<98x256xf32, #tpu.memory_space<vmem>>, vector<1x256xf32>
    %452 = vector.broadcast %451 : vector<1x256xf32> to vector<8x256xf32>
    %453 = arith.mulf %450, %452 : vector<8x256xf32>
    %454 = arith.addf %449, %453 : vector<8x256xf32>
    %c222_i32_135 = arith.constant 222 : i32
    %455 = tpu.dynamic_rotate %6#1 by %c222_i32_135 dim 1 : vector<8x256xf32>, i32 -> vector<8x256xf32>
    %c89 = arith.constant 89 : index
    %c0_136 = arith.constant 0 : index
    %456 = vector.load %arg2[%c89, %c0_136] : memref<98x256xf32, #tpu.memory_space<vmem>>, vector<1x256xf32>
    %457 = vector.broadcast %456 : vector<1x256xf32> to vector<8x256xf32>
    %458 = arith.mulf %455, %457 : vector<8x256xf32>
    %459 = arith.addf %454, %458 : vector<8x256xf32>
    %c221_i32_137 = arith.constant 221 : i32
    %460 = tpu.dynamic_rotate %6#1 by %c221_i32_137 dim 1 : vector<8x256xf32>, i32 -> vector<8x256xf32>
    %c90 = arith.constant 90 : index
    %c0_138 = arith.constant 0 : index
    %461 = vector.load %arg2[%c90, %c0_138] : memref<98x256xf32, #tpu.memory_space<vmem>>, vector<1x256xf32>
    %462 = vector.broadcast %461 : vector<1x256xf32> to vector<8x256xf32>
    %463 = arith.mulf %460, %462 : vector<8x256xf32>
    %464 = arith.addf %459, %463 : vector<8x256xf32>
    %c211_i32_139 = arith.constant 211 : i32
    %465 = tpu.dynamic_rotate %6#1 by %c211_i32_139 dim 1 : vector<8x256xf32>, i32 -> vector<8x256xf32>
    %c91 = arith.constant 91 : index
    %c0_140 = arith.constant 0 : index
    %466 = vector.load %arg2[%c91, %c0_140] : memref<98x256xf32, #tpu.memory_space<vmem>>, vector<1x256xf32>
    %467 = vector.broadcast %466 : vector<1x256xf32> to vector<8x256xf32>
    %468 = arith.mulf %465, %467 : vector<8x256xf32>
    %469 = arith.addf %464, %468 : vector<8x256xf32>
    %c210_i32_141 = arith.constant 210 : i32
    %470 = tpu.dynamic_rotate %6#1 by %c210_i32_141 dim 1 : vector<8x256xf32>, i32 -> vector<8x256xf32>
    %c92 = arith.constant 92 : index
    %c0_142 = arith.constant 0 : index
    %471 = vector.load %arg2[%c92, %c0_142] : memref<98x256xf32, #tpu.memory_space<vmem>>, vector<1x256xf32>
    %472 = vector.broadcast %471 : vector<1x256xf32> to vector<8x256xf32>
    %473 = arith.mulf %470, %472 : vector<8x256xf32>
    %474 = arith.addf %469, %473 : vector<8x256xf32>
    %c209_i32_143 = arith.constant 209 : i32
    %475 = tpu.dynamic_rotate %6#1 by %c209_i32_143 dim 1 : vector<8x256xf32>, i32 -> vector<8x256xf32>
    %c93 = arith.constant 93 : index
    %c0_144 = arith.constant 0 : index
    %476 = vector.load %arg2[%c93, %c0_144] : memref<98x256xf32, #tpu.memory_space<vmem>>, vector<1x256xf32>
    %477 = vector.broadcast %476 : vector<1x256xf32> to vector<8x256xf32>
    %478 = arith.mulf %475, %477 : vector<8x256xf32>
    %479 = arith.addf %474, %478 : vector<8x256xf32>
    %c208_i32_145 = arith.constant 208 : i32
    %480 = tpu.dynamic_rotate %6#1 by %c208_i32_145 dim 1 : vector<8x256xf32>, i32 -> vector<8x256xf32>
    %c94 = arith.constant 94 : index
    %c0_146 = arith.constant 0 : index
    %481 = vector.load %arg2[%c94, %c0_146] : memref<98x256xf32, #tpu.memory_space<vmem>>, vector<1x256xf32>
    %482 = vector.broadcast %481 : vector<1x256xf32> to vector<8x256xf32>
    %483 = arith.mulf %480, %482 : vector<8x256xf32>
    %484 = arith.addf %479, %483 : vector<8x256xf32>
    %c207_i32_147 = arith.constant 207 : i32
    %485 = tpu.dynamic_rotate %6#1 by %c207_i32_147 dim 1 : vector<8x256xf32>, i32 -> vector<8x256xf32>
    %c95 = arith.constant 95 : index
    %c0_148 = arith.constant 0 : index
    %486 = vector.load %arg2[%c95, %c0_148] : memref<98x256xf32, #tpu.memory_space<vmem>>, vector<1x256xf32>
    %487 = vector.broadcast %486 : vector<1x256xf32> to vector<8x256xf32>
    %488 = arith.mulf %485, %487 : vector<8x256xf32>
    %489 = arith.addf %484, %488 : vector<8x256xf32>
    %c206_i32_149 = arith.constant 206 : i32
    %490 = tpu.dynamic_rotate %6#1 by %c206_i32_149 dim 1 : vector<8x256xf32>, i32 -> vector<8x256xf32>
    %c96 = arith.constant 96 : index
    %c0_150 = arith.constant 0 : index
    %491 = vector.load %arg2[%c96, %c0_150] : memref<98x256xf32, #tpu.memory_space<vmem>>, vector<1x256xf32>
    %492 = vector.broadcast %491 : vector<1x256xf32> to vector<8x256xf32>
    %493 = arith.mulf %490, %492 : vector<8x256xf32>
    %494 = arith.addf %489, %493 : vector<8x256xf32>
    %c205_i32_151 = arith.constant 205 : i32
    %495 = tpu.dynamic_rotate %6#1 by %c205_i32_151 dim 1 : vector<8x256xf32>, i32 -> vector<8x256xf32>
    %c97 = arith.constant 97 : index
    %c0_152 = arith.constant 0 : index
    %496 = vector.load %arg2[%c97, %c0_152] : memref<98x256xf32, #tpu.memory_space<vmem>>, vector<1x256xf32>
    %497 = vector.broadcast %496 : vector<1x256xf32> to vector<8x256xf32>
    %498 = arith.mulf %495, %497 : vector<8x256xf32>
    %499 = arith.addf %494, %498 : vector<8x256xf32>
    %500 = arith.negf %499 : vector<8x256xf32>
    %501 = math.exp %500 : vector<8x256xf32>
    %cst_153 = arith.constant 1.000000e+00 : f32
    %502 = vector.broadcast %cst_153 : f32 to vector<8x256xf32>
    %503 = arith.addf %502, %501 : vector<8x256xf32>
    %504 = arith.divf %502, %503 : vector<8x256xf32>
    %505 = arith.index_cast %2 : i32 to index
    %c0_154 = arith.constant 0 : index
    %506 = vector.load %arg4[%505, %c0_154] : memref<8x256xf32, #tpu.memory_space<vmem>>, vector<8x256xf32>
    tpu.vector_store %arg4[%505, %c0_154], %504 {strides = array<i32>} : memref<8x256xf32, #tpu.memory_space<vmem>>, vector<8x256xf32>,
    %c1_i32_155 = arith.constant 1 : i32
    return
  }
  func.func @transform_0(%arg0: i32) -> (i32, i32, i32) {
    %c0_i32 = arith.constant 0 : i32
    %c0_i32_0 = arith.constant 0 : i32
    %c0_i32_1 = arith.constant 0 : i32
    return %arg0, %c0_i32, %c0_i32_0 : i32, i32, i32
  }
  func.func @transform_1(%arg0: i32) -> (i32, i32) {
    %c0_i32 = arith.constant 0 : i32
    %c0_i32_0 = arith.constant 0 : i32
    %c0_i32_1 = arith.constant 0 : i32
    return %c0_i32, %c0_i32_0 : i32, i32
  }
  func.func @transform_2(%arg0: i32) -> i32 {
    %c0_i32 = arith.constant 0 : i32
    %c0_i32_0 = arith.constant 0 : i32
    return %c0_i32 : i32
  }
  func.func @transform_3(%arg0: i32) -> (i32, i32) {
    %c0_i32 = arith.constant 0 : i32
    %c0_i32_0 = arith.constant 0 : i32
    return %arg0, %c0_i32 : i32, i32
  }
}

</mosaic_0001>

<bundles_post_ra>
// kernel: tpu_custom_call.1
= control target key start
LH: loop header
LB: loop body
LE: loop exit
PB: predicated region body
PF: predicated region fallthrough
CT: control target
= control target key end

     0   :  { %s7125_s0 = inlined_call_operand.hbm [shape: f32[16,32,256], index: 0, kind: input, shape index: {}]   ;;  %s7126_s1 = inlined_call_operand.hbm [shape: f32[98,256], index: 1, kind: input, shape index: {}]   ;;  %s7127_s2 = inlined_call_operand.<no memory space> [shape: f32[1], index: 2, kind: input, shape index: {}]   ;;  %s7128_s3 = inlined_call_operand.hbm [shape: f32[16,256], index: 3, kind: output, shape index: {}]  }
   0x1   :  { %8 = sst [smem:[#allocation2]] %s7127_s2 }
   0x2   :  { %9 = vsyncpa [#allocation4], 0 }
   0x3   :  { %11 = vsyncpa [#allocation4 + $0x1], 0 }
   0x4   :  { %12 = vsyncpa [#allocation7], 0 }
   0x5   :  { %13 = vsyncpa [#allocation5], 0 }
   0x6   :  { %15 = vsyncpa [#allocation5 + $0x1], 0  ;;  %s4085_s14 = smov 0   ;;  %s4087_s15 = smov 0  }
   0x7   :  { %s4089_s16 = smov 0   ;;  %s4091_s17 = smov 0  }
   0x8 LB: > { %s4106_s2 = sadd.s32 4294967295, %s3875_s17   ;;  %s3210_s18 = sadd.s32 4294967294, %s3875_s17   ;;  %s3875_s17 = sphi %s4091_s17, %s7805_s17   ;;  %s3871_s16 = sphi %s4089_s16, %s7804_s16   ;;  %s3867_s15 = sphi %s4087_s15, %s7803_s15   ;;  %s3863_s14 = sphi %s4085_s14, %s7802_s14  }
   0x9   : > { %p41_p0 = scmp.ne.s32.totalorder %s3867_s15, %s3863_s14  ;;  %p7129_p1 = scmp.eq.s32.totalorder %s4106_s2, 0 }
   0xa   : > { %p113_p3 = scmp.eq.s32.totalorder %s3210_s18, 1  ;;  %p3211_p5 = scmp.ge.s32.totalorder %s3875_s17, 1 }
   0xb   : > { %p4115_p4 = por %p7129_p1, %p41_p0  ;;  %p120_p7 = scmp.lt.s32.totalorder %s3875_s17, 3 }
   0xc   : > { %p4120_p6 = por %p113_p3, %p41_p0  ;;  %s4009_s22 = smov [#allocation6]  }
   0xd   : > { %s7351_s19 = scalar_select %p4115_p4, 1, 0 }
   0xe   : > { %s7352_s20 = scalar_select %p4120_p6, 1, 0 }
   0xf   : > { %p4125_p8 = pnand %p3211_p5, %p120_p7  ;;  %s132_s23 = sshll.u32 %s4009_s22, 4  ;;  %s4129_s23 = int_to_ptr.vmem [resolvable:$true] %s132_s23 }
  0x10   : > { %s4141_s25 = sadd.s32 1, %s3875_s17   ;;  %s28_s26 = sadd.s32 1, %s3871_s16 }
  0x11   : > { %s7353_s21 = scalar_select %p4125_p8, 1, 0 }
  0x12   : > { %p3244_p9 = pneg %p4125_p8  ;;  %s25_s27 = ssub.s32 %s3875_s17, %s4141_s25 }
  0x13   : > { %s3615_s30 = scalar_lea.hbm %s7126_s1, 3328 }
  0x14   : > { %p4136_p11 = pnand %p3244_p9, %p7129_p1  ;;  %p3616_p12 = scmp.ne.s32.totalorder %s7126_s1, %s3615_s30 }
  0x15   : > { %p3622_p5 = scmp.lt.u32.totalorder %s3615_s30, %s7126_s1 }
  0x16   : > { %p3617_p13 = pneg %p4136_p11 }
  0x18   : > { %p3618_p0 = pnand %p3617_p13, %p3616_p12 }
  0x1a   : > { %p3619_p3 = pneg %p3618_p0 }
  0x1c   : > { %p3624_p7 = pnand %p3622_p5, %p3619_p3 }
  0x1e   : > { %3627 = shalt.err (!%p3624_p7)
}
  0x1f   : > { %s3628_s8 = scalar_lea.vmem %s4129_s23, 3328  ;;  %p3636_p2 = scmp.lt.s32.totalorder %s4129_s23, %s4129_s23 }
  0x20   : > { %p3629_p9 = scmp.ne.s32.totalorder %s4129_s23, %s3628_s8  ;;  %p3637_p6 = scmp.lt.s32.totalorder %s3628_s8, %s3628_s8 }
  0x22   : > { %p3631_p10 = pnand %p3629_p9, %p3617_p13  ;;  %p3638_p4 = por %p3637_p6, %p3636_p2 }
  0x24   : > { %p3632_p1 = pneg %p3631_p10 }
  0x26   : > { %p3639_p8 = pnand %p3638_p4, %p3632_p1 }
  0x28   : > { %3642 = shalt.err (!%p3639_p8)
}
  0x29   : > { %s4010_s9 = smov 256   ;;  %s4011_s10 = smov 16  }
  0x2a   : > { %3247 = dma.hbm_to_vmem [thread:$0]  (!%p4136_p11), %s7126_s1, 3328, %s4129_s23, [#allocation7], %s4010_s9, %s4010_s9, %s4011_s10  }
  0x2b   : > { %p26_p1 = scmp.eq.s32.totalorder %s25_s27, 0  ;;  %p35_p2 = scmp.ne.s32.totalorder %s3871_s16, %s3867_s15 }
  0x2c   : > { %p36_p4 = scmp.eq.s32.totalorder %s3875_s17, 0  ;;  %p3257_p6 = scmp.lt.s32.totalorder %s3875_s17, 2 }
  0x2d   : > { %s4175_s13 = scalar_select %p26_p1, %s3871_s16, %s28_s26  }
  0x2e   : > { %p37_p8 = por %p36_p4, %p35_p2  ;;  %p7355_p10 = scmp.eq.s32.totalorder %s4106_s2, 1 }
  0x2f   : > { %s149_s22 = sand.u32 1, %s3871_s16   ;;  %s3233_s24 = sshll.u32 %s3875_s17, 13 }
  0x30   : > { %p4179_p12 = por %p7355_p10, %p35_p2  ;;  %s3214_s28 = sshll.u32 %s149_s22, 9 }
  0x31   : > { %s4188_s4 = scalar_lea.hbm %s7125_s0, %s3233_s24  ;;  %s153_s23 = scalar_lea.vmem [#allocation3], %s3214_s28 }
  0x32   : > { %s161_s26 = sshll.u32 %s153_s23, 4  ;;  %p4190_p11 = pnand %p3257_p6, %p37_p8  ;;  %s4194_s26 = int_to_ptr.vmem [resolvable:$true] %s161_s26 }
  0x33   : > { %s4196_s5 = scalar_lea.sflag [#allocation4], %s149_s22  ;;  %s3643_s6 = scalar_lea.hbm %s4188_s4, 8192 }
  0x34   : > { %p3644_p13 = scmp.ne.s32.totalorder %s4188_s4, %s3643_s6  ;;  %p3645_p0 = pneg %p4190_p11 }
  0x35   : > { %s3648_s11 = scalar_lea.hbm %s7125_s0, 16384  ;;  %p3649_p7 = scmp.lt.u32.totalorder %s4188_s4, %s7125_s0 }
  0x36   : > { %p3646_p3 = pnand %p3645_p0, %p3644_p13  ;;  %p3650_p9 = scmp.lt.u32.totalorder %s3648_s11, %s3643_s6 }
  0x37   : > { %p3652_p2 = scmp.lt.u32.totalorder %s3643_s6, %s4188_s4 }
  0x38   : > { %p3647_p5 = pneg %p3646_p3  ;;  %p3651_p1 = por %p3650_p9, %p3649_p7 }
  0x3a   : > { %p3653_p4 = por %p3652_p2, %p3651_p1 }
  0x3c   : > { %p3654_p6 = pnand %p3653_p4, %p3647_p5 }
  0x3e   : > { %3657 = shalt.err (!%p3654_p6)
}
  0x3f   : > { %s3658_s22 = scalar_lea.vmem %s4194_s26, 8192  ;;  %s4012_s28 = smov [#allocation3]  }
  0x40   : > { %p3659_p8 = scmp.ne.s32.totalorder %s4194_s26, %s3658_s22  ;;  %s3663_s29 = sshll.u32 %s4012_s28, 4  ;;  %s3664_s29 = int_to_ptr.vmem [resolvable:$false] %s3663_s29 }
  0x41   : > { %s3665_s30 = scalar_lea.vmem %s3664_s29, 16384  ;;  %p3666_p3 = scmp.lt.s32.totalorder %s4194_s26, %s3664_s29 }
  0x42   : > { %p3661_p10 = pnand %p3659_p8, %p3645_p0  ;;  %p3667_p7 = scmp.lt.s32.totalorder %s3665_s30, %s3658_s22 }
  0x44   : > { %p3662_p13 = pneg %p3661_p10  ;;  %p3668_p9 = por %p3667_p7, %p3666_p3 }
  0x46   : > { %p3669_p1 = pnand %p3668_p9, %p3662_p13 }
  0x48   : > { %3672 = shalt.err (!%p3669_p1)
}
  0x49   : > { %3251 = dma.hbm_to_vmem [thread:$0]  (!%p4190_p11), %s4188_s4, 8192, %s4194_s26, %s4196_s5, %s4010_s9, %s4010_s9, %s4011_s10  }
  0x4a   : > { %p7358_p0 = scmp.ne.s32.totalorder %s7353_s21, 0 }
  0x4c   : > { %173 = sbr.rel (%p7358_p0) target bundleno = 739 (0x2e3), region = 32 }
  0x53   : > { %s4230_s23 = sand.u32 1, %s3867_s15   ;;  %p7359_p5 = scmp.ne.s32.totalorder %s7351_s19, 0 }
  0x54   : > { %s3219_s6 = sshll.u32 %s4230_s23, 9  ;;  %s176_s7 = scalar_lea.sflag [#allocation4], %s4230_s23 }
  0x55   : > { %s4234_s8 = scalar_lea.vmem [#allocation3], %s3219_s6 }
  0x56   : > { %3850 = dma.done.wait (%p7359_p5), %s176_s7, 8192  }
  0x57   : > { %3852 = vsyncadd (%p7359_p5), %s176_s7, 4294959104  ;;  %p7360_p11 = scmp.eq.s32.totalorder %s4106_s2, 0 }
  0x59   : > { %3854 = dma.done.wait (%p7360_p11), [#allocation7], 3328   ;;  %p7361_p2 = pmov %p7360_p11 }
  0x5a   : > { %s3221_s21 = sshll.u32 %s4230_s23, 4  ;;  %s4245_s9 = sld [smem:[#allocation2]]  ;;  %v4249_v0 = vmov -inf   ;;  %v4251_v1 = vmov -inf   ;;  %v4253_v2 = vmov -inf   ;;  %v4255_v3 = vmov -inf  }
  0x5b   : > { %3856 = vsyncadd (%p7361_p2), [#allocation7], 4294963968  ;;  %s4247_s10 = scalar_lea.vmem [#allocation8], %s3221_s21  ;;  %v4257_v4 = vmov -inf   ;;  %v4259_v5 = vmov -inf   ;;  %v4261_v6 = vmov -inf  }
  0x5c   : > { %v4263_v7 = vmov -inf   ;;  %v4265_v8 = vmov -inf   ;;  %v4267_v9 = vmov -inf   ;;  %v4269_v10 = vmov -inf   ;;  %s4313_s19 = smov 0  }
  0x5d   : > { %v4271_v11 = vmov -inf   ;;  %v4273_v12 = vmov -inf   ;;  %v4275_v13 = vmov -inf   ;;  %v4277_v14 = vmov -inf  }
  0x5e   : > { %v4279_v15 = vmov -inf   ;;  %v4281_v16 = vmov 0.0   ;;  %v4283_v17 = vmov 0.0   ;;  %v4285_v18 = vmov 0.0  }
  0x5f   : > { %v4287_v19 = vmov 0.0   ;;  %v4289_v20 = vmov 0.0   ;;  %v4291_v21 = vmov 0.0   ;;  %v4293_v22 = vmov 0.0  }
  0x60   : > { %v4295_v23 = vmov 0.0   ;;  %v4297_v24 = vmov 0.0   ;;  %v4299_v25 = vmov 0.0   ;;  %v4301_v26 = vmov 0.0  }
  0x61   : > { %v4303_v27 = vmov 0.0   ;;  %v4305_v28 = vmov 0.0   ;;  %v4307_v29 = vmov 0.0   ;;  %v4309_v30 = vmov 0.0  }
  0x62   : > { %v4311_v31 = vmov 0.0  }
  0x63 LB: >> { %7362 = vst [vmem:[#allocation12_spill] sm:$0xff] %v3879_v0  ;;  %7363 = vst [vmem:[#allocation13_spill] sm:$0xff] %v3883_v1  ;;  %s3222_s4 = sshll.u32 %s4007_s19, 3  ;;  %s213_s11 = sadd.s32 1, %s4007_s19   ;;  %s4007_s19 = sphi %s4313_s19, %s7519_s19   ;;  %v4003_v31 = vphi %v4311_v31, %v7518_v31   ;;  %v3999_v30 = vphi %v4309_v30, %v7517_v30   ;;  %v3995_v29 = vphi %v4307_v29, %v7516_v29   ;;  %v3991_v28 = vphi %v4305_v28, %v7515_v28   ;;  %v3987_v27 = vphi %v4303_v27, %v7514_v27   ;;  %v3983_v26 = vphi %v4301_v26, %v7513_v26   ;;  %v3979_v25 = vphi %v4299_v25, %v7512_v25   ;;  %v3975_v24 = vphi %v4297_v24, %v7511_v24   ;;  %v3971_v23 = vphi %v4295_v23, %v7510_v23   ;;  %v3967_v22 = vphi %v4293_v22, %v7509_v22   ;;  %v3963_v21 = vphi %v4291_v21, %v7508_v21   ;;  %v3959_v20 = vphi %v4289_v20, %v7507_v20   ;;  %v3955_v19 = vphi %v4287_v19, %v7506_v19   ;;  %v3951_v18 = vphi %v4285_v18, %v7505_v18   ;;  %v3947_v17 = vphi %v4283_v17, %v7504_v17   ;;  %v3943_v16 = vphi %v4281_v16, %v7503_v16   ;;  %v3939_v15 = vphi %v4279_v15, %v7502_v15   ;;  %v3935_v14 = vphi %v4277_v14, %v7501_v14   ;;  %v3931_v13 = vphi %v4275_v13, %v7500_v13   ;;  %v3927_v12 = vphi %v4273_v12, %v7499_v12   ;;  %v3923_v11 = vphi %v4271_v11, %v7498_v11   ;;  %v3919_v10 = vphi %v4269_v10, %v7497_v10   ;;  %v3915_v9 = vphi %v4267_v9, %v7496_v9   ;;  %v3911_v8 = vphi %v4265_v8, %v7495_v8   ;;  %v3907_v7 = vphi %v4263_v7, %v7494_v7   ;;  %v3903_v6 = vphi %v4261_v6, %v7493_v6   ;;  %v3899_v5 = vphi %v4259_v5, %v7492_v5   ;;  %v3895_v4 = vphi %v4257_v4, %v7490_v4   ;;  %v3891_v3 = vphi %v4255_v3, %v7489_v3   ;;  %v3887_v2 = vphi %v4253_v2, %v7487_v2   ;;  %v3883_v1 = vphi %v4251_v1, %v7485_v1   ;;  %v3879_v0 = vphi %v4249_v0, %v7483_v0  }
  0x64   : >> { %7364 = vst [vmem:[#allocation14_spill] sm:$0xff] %v3887_v2  ;;  %7365 = vst [vmem:[#allocation15_spill] sm:$0xff] %v3891_v3  ;;  %s247_s26 = sshra.s32 %s3222_s4, 3  ;;  %p4677_p4 = scmp.ge.s32.totalorder %s213_s11, 4  }
  0x65   : >> { %7366 = vst [vmem:[#allocation16_spill] sm:$0xff] %v3895_v4  ;;  %7367 = vst [vmem:[#allocation17_spill] sm:$0xff] %v3899_v5  ;;  %s3234_s27 = sshll.u32 %s247_s26, 4  ;;  %s7519_s19 = smov %s213_s11  ;;  %vm7316_vm0 = vcmask (%p4677_p4), 1041409   ;;  %vm7318_vm1 = vcmask (%p4677_p4), 1042434   ;;  %vm532_vm2 = vcmask (%p4677_p4), 1043459  }
  0x66   : >> { %7368 = vst [vmem:[#allocation18_spill] sm:$0xff] %v3903_v6  ;;  %7369 = vst [vmem:[#allocation19_spill] sm:$0xff] %v3907_v7  ;;  %s4416_s5 = scalar_lea.vmem %s4234_s8, %s3234_s27 [#allocation3]  ;;  %vm7324_vm3 = vcmask (%p4677_p4), 1044484   ;;  %vm7319_vm4 = vcmask (%p4677_p4), 1045509   ;;  %vm7320_vm5 = vcmask (%p4677_p4), 1046534   ;;  %vm7323_vm6 = vcmask (%p4677_p4), 1047559  }
  0x67   : >> { %7370 = vst [vmem:[#allocation20_spill] sm:$0xff] %v3911_v8  ;;  %7371 = vst [vmem:[#allocation21_spill] sm:$0xff] %v3915_v9  ;;  %v4419_v32 = vld [vmem:[%s4416_s5] sm:$0xff]  ;;  %v4422_v33 = vld [vmem:[%s4416_s5 + $0x8] sm:$0xff]  ;;  %s4013_s24 = smov (%p4677_p4), 50   ;;  %s4014_s22 = smov (%p4677_p4), 51  }
  0x68   : >> { %7372 = vst [vmem:[#allocation22_spill] sm:$0xff] %v3919_v10  ;;  %7373 = vst [vmem:[#allocation23_spill] sm:$0xff] %v3923_v11  ;;  %v4425_v34 = vld [vmem:[%s4416_s5 + $0x40] sm:$0xff]  ;;  %v4428_v35 = vld [vmem:[%s4416_s5 + $0x48] sm:$0xff]  ;;  %v7139_v40 = vrot.slane %v4419_v32, 4  ;;  %v7137_v41 = vrot.slane %v4422_v33, 4 }
  0x69   : >> { %7374 = vst [vmem:[#allocation24_spill] sm:$0xff] %v3927_v12  ;;  %7375 = vst [vmem:[#allocation25_spill] sm:$0xff] %v3931_v13  ;;  %v4431_v36 = vld [vmem:[%s4416_s5 + $0x80] sm:$0xff]  ;;  %v4434_v37 = vld [vmem:[%s4416_s5 + $0x88] sm:$0xff]  ;;  %v7136_v42 = vrot.slane %v4425_v34, 4  ;;  %v7134_v43 = vrot.slane %v4428_v35, 4 }
  0x6a   : >> { %7376 = vst [vmem:[#allocation26_spill] sm:$0xff] %v3935_v14  ;;  %7377 = vst [vmem:[#allocation27_spill] sm:$0xff] %v3939_v15  ;;  %v4437_v38 = vld [vmem:[%s4416_s5 + $0xc0] sm:$0xff]  ;;  %v4440_v39 = vld [vmem:[%s4416_s5 + $0xc8] sm:$0xff]  ;;  %v7133_v44 = vrot.slane %v4431_v36, 4  ;;  %v7132_v45 = vrot.slane %v4434_v37, 4  ;;  %v271_v48 = vadd.f32 %v7139_v40, %v4419_v32  ;;  %v277_v49 = vadd.f32 %v7137_v41, %v4422_v33 }
  0x6b   : >> { %7378 = vst [vmem:[#allocation28_spill] sm:$0xff] %v4431_v36  ;;  %7379 = vst [vmem:[#allocation29_spill] sm:$0xff] %v4434_v37  ;;  %v7135_v46 = vrot.slane %v4437_v38, 4  ;;  %v7138_v47 = vrot.slane %v4440_v39, 4  ;;  %v283_v50 = vadd.f32 %v7136_v42, %v4425_v34  ;;  %v289_v51 = vadd.f32 %v7134_v43, %v4428_v35  ;;  %v4475_v42 = vld [vmem:[%s4416_s5 + $0x100] sm:$0xff]  ;;  %v4478_v1 = vld [vmem:[%s4416_s5 + $0x108] sm:$0xff] }
  0x6c   : >> { %7380 = vst [vmem:[#allocation30_spill] sm:$0xff] %v4437_v38  ;;  %7381 = vst [vmem:[#allocation31_spill] sm:$0xff] %v4440_v39  ;;  %v295_v52 = vadd.f32 %v7133_v44, %v4431_v36  ;;  %v301_v53 = vadd.f32 %v7132_v45, %v4434_v37  ;;  %v272_v56 = vrot.slane %v271_v48, 2  ;;  %v278_v57 = vrot.slane %v277_v49, 2  ;;  %v4481_v2 = vld [vmem:[%s4416_s5 + $0x140] sm:$0xff]  ;;  %s4015_s28 = smov (%p4677_p4), 49  }
  0x6d   : >> { %v307_v54 = vadd.f32 %v7135_v46, %v4437_v38  ;;  %v313_v55 = vadd.f32 %v7138_v47, %v4440_v39  ;;  %v284_v58 = vrot.slane %v283_v50, 2  ;;  %v290_v59 = vrot.slane %v289_v51, 2  ;;  %7382 = vst [vmem:[#allocation32_spill] sm:$0xff] %v4475_v42  ;;  %7383 = vst [vmem:[#allocation33_spill] sm:$0xff] %v4478_v1  ;;  %s4016_s29 = smov (%p4677_p4), 48   ;;  %s4017_s30 = smov (%p4677_p4), 47  }
  0x6e   : >> { %v296_v60 = vrot.slane %v295_v52, 2  ;;  %v302_v61 = vrot.slane %v301_v53, 2  ;;  %v273_v45 = vadd.f32 %v272_v56, %v271_v48  ;;  %v279_v44 = vadd.f32 %v278_v57, %v277_v49  ;;  %7384 = vst [vmem:[#allocation34_spill] sm:$0xff] %v4481_v2  ;;  %v4484_v49 = vld [vmem:[%s4416_s5 + $0x148] sm:$0xff]  ;;  %s4018_s6 = smov (%p4677_p4), 46   ;;  %s4019_s7 = smov (%p4677_p4), 45  }
  0x6f   : >> { %v308_v62 = vrot.slane %v307_v54, 2  ;;  %v314_v63 = vrot.slane %v313_v55, 2  ;;  %v285_v43 = vadd.f32 %v284_v58, %v283_v50  ;;  %v291_v46 = vadd.f32 %v290_v59, %v289_v51  ;;  %7385 = vst [vmem:[#allocation35_spill] sm:$0xff] %v4484_v49  ;;  %v4487_v50 = vld [vmem:[%s4416_s5 + $0x180] sm:$0xff]  ;;  %v4490_v58 = vld [vmem:[%s4416_s5 + $0x188] sm:$0xff]  ;;  %s4020_s8 = smov (%p4677_p4), 35  }
  0x70   : >> { %v297_v41 = vadd.f32 %v296_v60, %v295_v52  ;;  %v303_v47 = vadd.f32 %v302_v61, %v301_v53  ;;  %v274_v3 = vrot.slane %v273_v45, 1  ;;  %v280_v4 = vrot.slane %v279_v44, 1  ;;  %7386 = vst [vmem:[#allocation36_spill] sm:$0xff] %v4487_v50  ;;  %7387 = vst [vmem:[#allocation37_spill] sm:$0xff] %v4490_v58  ;;  %s4021_s21 = smov (%p4677_p4), 34   ;;  %s4022_s19 = smov (%p4677_p4), 33  }
  0x71   : >> { %v309_v40 = vadd.f32 %v308_v62, %v307_v54  ;;  %v315_v0 = vadd.f32 %v314_v63, %v313_v55  ;;  %v286_v48 = vrot.slane %v285_v43, 1  ;;  %v292_v56 = vrot.slane %v291_v46, 1  ;;  %v4493_v54 = vld [vmem:[%s4416_s5 + $0x1c0] sm:$0xff]  ;;  %v4496_v55 = vld [vmem:[%s4416_s5 + $0x1c8] sm:$0xff]  ;;  %s4023_s4 = smov (%p4677_p4), 32   ;;  %s4024_s26 = smov (%p4677_p4), 31  }
  0x72   : >> { %v298_v51 = vrot.slane %v297_v41, 1  ;;  %v304_v52 = vrot.slane %v303_v47, 1  ;;  %7388 = vst [vmem:[#allocation38_spill] sm:$0xff] %v4493_v54  ;;  %7389 = vst [vmem:[#allocation39_spill] sm:$0xff] %v4496_v55  ;;  %v275_v59 = vadd.f32 %v274_v3, %v273_v45  ;;  %v281_v60 = vadd.f32 %v280_v4, %v279_v44  ;;  %s7182_s27 = smov (%p4677_p4), 30   ;;  %s7184_s5 = smov (%p4677_p4), 29  }
  0x73   : >> { %v310_v57 = vrot.slane %v309_v40, 1  ;;  %v316_v53 = vrot.slane %v315_v0, 1  ;;  %v287_v61 = vadd.f32 %v286_v48, %v285_v43  ;;  %v293_v62 = vadd.f32 %v292_v56, %v291_v46  ;;  %s7186_s11 = smov (%p4677_p4), 19   ;;  %s7188_s12 = smov (%p4677_p4), 18  }
  0x74   : >> { %v299_v63 = vadd.f32 %v298_v51, %v297_v41  ;;  %v305_v5 = vadd.f32 %v304_v52, %v303_v47  ;;  %v7144_v8 = vrot.slane %v4475_v42, 4  ;;  %v7143_v9 = vrot.slane %v4478_v1, 4 }
  0x75   : >> { %v311_v6 = vadd.f32 %v310_v57, %v309_v40  ;;  %v317_v7 = vadd.f32 %v316_v53, %v315_v0  ;;  %v7142_v10 = vrot.slane %v4481_v2, 4  ;;  %v7140_v11 = vrot.slane %v4484_v49, 4 }
  0x76   : >> { %v7141_v12 = vrot.slane %v4487_v50, 4  ;;  %v7145_v13 = vrot.slane %v4490_v58, 4  ;;  %v7148_v3 = vrot.slane %v4493_v54, 4  ;;  %v7155_v4 = vrot.slane %v4496_v55, 4 }
  0x77   : >> { %v319_v0 = vadd.f32 %v7144_v8, %v4475_v42  ;;  %v325_v40 = vadd.f32 %v7143_v9, %v4478_v1  ;;  %v331_v41 = vadd.f32 %v7142_v10, %v4481_v2  ;;  %v337_v43 = vadd.f32 %v7140_v11, %v4484_v49 }
  0x78   : >> { %v343_v44 = vadd.f32 %v7141_v12, %v4487_v50  ;;  %v349_v45 = vadd.f32 %v7145_v13, %v4490_v58  ;;  %v355_v46 = vadd.f32 %v7148_v3, %v4493_v54  ;;  %v361_v47 = vadd.f32 %v7155_v4, %v4496_v55 }
  0x79   : >> { %v320_v48 = vrot.slane %v319_v0, 2  ;;  %v326_v56 = vrot.slane %v325_v40, 2  ;;  %v332_v51 = vrot.slane %v331_v41, 2  ;;  %v338_v52 = vrot.slane %v337_v43, 2 }
  0x7a   : >> { %v344_v57 = vrot.slane %v343_v44, 2  ;;  %v350_v53 = vrot.slane %v349_v45, 2  ;;  %v356_v11 = vrot.slane %v355_v46, 2  ;;  %v362_v12 = vrot.slane %v361_v47, 2 }
  0x7b   : >> { %v321_v10 = vadd.f32 %v320_v48, %v319_v0  ;;  %v327_v9 = vadd.f32 %v326_v56, %v325_v40  ;;  %v333_v8 = vadd.f32 %v332_v51, %v331_v41  ;;  %v339_v13 = vadd.f32 %v338_v52, %v337_v43 }
  0x7c   : >> { %v345_v14 = vadd.f32 %v344_v57, %v343_v44  ;;  %v351_v15 = vadd.f32 %v350_v53, %v349_v45  ;;  %v357_v58 = vadd.f32 %v356_v11, %v355_v46  ;;  %v363_v3 = vadd.f32 %v362_v12, %v361_v47  ;;  %v7410_v11 = vld [vmem:[#allocation28_spill] sm:$0xff] }
  0x7d   : >> { %v322_v54 = vrot.slane %v321_v10, 1  ;;  %v328_v50 = vrot.slane %v327_v9, 1  ;;  %v334_v49 = vrot.slane %v333_v8, 1  ;;  %v340_v4 = vrot.slane %v339_v13, 1 }
  0x7e   : >> { %v346_v55 = vrot.slane %v345_v14, 1  ;;  %v352_v2 = vrot.slane %v351_v15, 1  ;;  %v358_v1 = vrot.slane %v357_v58, 1  ;;  %v364_v42 = vrot.slane %v363_v3, 1 }
  0x7f   : >> { %v323_v39 = vadd.f32 %v322_v54, %v321_v10  ;;  %v329_v38 = vadd.f32 %v328_v50, %v327_v9  ;;  %v335_v37 = vadd.f32 %v334_v49, %v333_v8  ;;  %v341_v36 = vadd.f32 %v340_v4, %v339_v13 }
  0x80   : >> { %v347_v0 = vadd.f32 %v346_v55, %v345_v14  ;;  %v353_v40 = vadd.f32 %v352_v2, %v351_v15  ;;  %v359_v41 = vadd.f32 %v358_v1, %v357_v58  ;;  %v365_v43 = vadd.f32 %v364_v42, %v363_v3  ;;  %v7412_v14 = vld [vmem:[#allocation29_spill] sm:$0xff] }
  0x81   : >> { %v4531_v31 = vadd.f32 %v4003_v31, %v275_v59   ;;  %v4534_v30 = vadd.f32 %v3999_v30, %v281_v60   ;;  %v4537_v29 = vadd.f32 %v3995_v29, %v287_v61   ;;  %v4540_v28 = vadd.f32 %v3991_v28, %v293_v62  }
  0x82   : >> { %v4543_v27 = vadd.f32 %v3987_v27, %v299_v63   ;;  %v4546_v26 = vadd.f32 %v3983_v26, %v305_v5   ;;  %v4549_v25 = vadd.f32 %v3979_v25, %v311_v6   ;;  %v4552_v24 = vadd.f32 %v3975_v24, %v317_v7  }
  0x83   : >> { %7390 = vst [vmem:[#allocation40_spill] sm:$0xff] %v4531_v31  ;;  %7391 = vst [vmem:[#allocation41_spill] sm:$0xff] %v4534_v30  ;;  %v7392_v46 = vmov %v4537_v29  ;;  %v7393_v47 = vmov %v4540_v28  ;;  %v4555_v23 = vadd.f32 %v3971_v23, %v323_v39   ;;  %v4558_v22 = vadd.f32 %v3967_v22, %v329_v38  }
  0x84   : >> { %v7394_v49 = vmov %v4543_v27  ;;  %v7395_v50 = vmov %v4546_v26  ;;  %v7396_v42 = vmov %v4549_v25  ;;  %v7397_v58 = vmov %v4552_v24 }
  0x85   : >> { %v7398_v54 = vmov %v4555_v23  ;;  %v7399_v55 = vmov %v4558_v22  ;;  %v4561_v21 = vadd.f32 %v3963_v21, %v335_v37   ;;  %v4564_v20 = vadd.f32 %v3959_v20, %v341_v36  }
  0x86   : >> { %v4567_v19 = vadd.f32 %v3955_v19, %v347_v0   ;;  %v4570_v18 = vadd.f32 %v3951_v18, %v353_v40   ;;  %v4573_v17 = vadd.f32 %v3947_v17, %v359_v41   ;;  %v4576_v16 = vadd.f32 %v3943_v16, %v365_v43  }
  0x87   : >> { %v7400_v59 = vmov %v4561_v21  ;;  %v7401_v60 = vmov %v4564_v20  ;;  %v7406_v1 = vrot.slane %v4419_v32, 4  ;;  %v7407_v5 = vrot.slane %v4422_v33, 4  ;;  %v7416_v20 = vld [vmem:[#allocation31_spill] sm:$0xff] }
  0x88   : >> { %v7402_v61 = vmov %v4567_v19  ;;  %v7403_v62 = vmov %v4570_v18  ;;  %v7404_v63 = vmov %v4573_v17  ;;  %v7405_v39 = vmov %v4576_v16  ;;  %v7414_v17 = vld [vmem:[#allocation30_spill] sm:$0xff] }
  0x89   : >> { %v383_v2 = vmax.f32 %v4419_v32, %v7406_v1  ;;  %v389_v6 = vmax.f32 %v4422_v33, %v7407_v5  ;;  %v7408_v7 = vrot.slane %v4425_v34, 4  ;;  %v7409_v9 = vrot.slane %v4428_v35, 4 }
  0x8a   : >> { %v7411_v12 = vrot.slane %v7410_v11, 4  ;;  %v7413_v15 = vrot.slane %v7412_v14, 4  ;;  %v7415_v18 = vrot.slane %v7414_v17, 4  ;;  %v7417_v21 = vrot.slane %v7416_v20, 4 }
  0x8b   : >> { %v395_v8 = vmax.f32 %v4425_v34, %v7408_v7  ;;  %v401_v10 = vmax.f32 %v4428_v35, %v7409_v9  ;;  %v384_v23 = vrot.slane %v383_v2, 2  ;;  %v390_v24 = vrot.slane %v389_v6, 2  ;;  %v7418_v7 = vld [vmem:[#allocation32_spill] sm:$0xff] }
  0x8c   : >> { %v407_v13 = vmax.f32 %v7410_v11, %v7411_v12  ;;  %v413_v16 = vmax.f32 %v7412_v14, %v7413_v15  ;;  %v419_v19 = vmax.f32 %v7414_v17, %v7415_v18  ;;  %v425_v22 = vmax.f32 %v7416_v20, %v7417_v21 }
  0x8d   : >> { %v396_v25 = vrot.slane %v395_v8, 2  ;;  %v402_v26 = vrot.slane %v401_v10, 2  ;;  %v385_v31 = vmax.f32 %v383_v2, %v384_v23  ;;  %v391_v32 = vmax.f32 %v389_v6, %v390_v24 }
  0x8e   : >> { %v408_v27 = vrot.slane %v407_v13, 2  ;;  %v414_v28 = vrot.slane %v413_v16, 2  ;;  %v420_v29 = vrot.slane %v419_v19, 2  ;;  %v426_v30 = vrot.slane %v425_v22, 2 }
  0x8f   : >> { %v397_v33 = vmax.f32 %v395_v8, %v396_v25  ;;  %v403_v34 = vmax.f32 %v401_v10, %v402_v26  ;;  %v386_v3 = vrot.slane %v385_v31, 1  ;;  %v392_v4 = vrot.slane %v391_v32, 1  ;;  %v7420_v10 = vld [vmem:[#allocation33_spill] sm:$0xff]  ;;  %v7430_v25 = vld [vmem:[#allocation38_spill] sm:$0xff] }
  0x90   : >> { %v409_v35 = vmax.f32 %v407_v13, %v408_v27  ;;  %v415_v36 = vmax.f32 %v413_v16, %v414_v28  ;;  %v421_v37 = vmax.f32 %v419_v19, %v420_v29  ;;  %v427_v38 = vmax.f32 %v425_v22, %v426_v30  ;;  %v7422_v13 = vld [vmem:[#allocation34_spill] sm:$0xff]  ;;  %v7424_v16 = vld [vmem:[#allocation35_spill] sm:$0xff]  ;;  %v7426_v19 = vld [vmem:[#allocation36_spill] sm:$0xff] }
  0x91   : >> { %v398_v48 = vrot.slane %v397_v33, 1  ;;  %v404_v56 = vrot.slane %v403_v34, 1  ;;  %v387_v0 = vmax.f32 %v385_v31, %v386_v3  ;;  %v393_v40 = vmax.f32 %v391_v32, %v392_v4  ;;  %v7428_v22 = vld [vmem:[#allocation37_spill] sm:$0xff]  ;;  %v7432_v28 = vld [vmem:[#allocation39_spill] sm:$0xff] }
  0x92   : >> { %v410_v51 = vrot.slane %v409_v35, 1  ;;  %v416_v52 = vrot.slane %v415_v36, 1  ;;  %v422_v57 = vrot.slane %v421_v37, 1  ;;  %v428_v53 = vrot.slane %v427_v38, 1 }
  0x93   : >> { %v399_v41 = vmax.f32 %v397_v33, %v398_v48  ;;  %v405_v43 = vmax.f32 %v403_v34, %v404_v56  ;;  %v7419_v8 = vrot.slane %v7418_v7, 4  ;;  %v7421_v11 = vrot.slane %v7420_v10, 4 }
  0x94   : >> { %v411_v1 = vmax.f32 %v409_v35, %v410_v51  ;;  %v417_v2 = vmax.f32 %v415_v36, %v416_v52  ;;  %v423_v5 = vmax.f32 %v421_v37, %v422_v57  ;;  %v429_v6 = vmax.f32 %v427_v38, %v428_v53 }
  0x95   : >> { %v431_v9 = vmax.f32 %v7418_v7, %v7419_v8  ;;  %v437_v12 = vmax.f32 %v7420_v10, %v7421_v11  ;;  %v7423_v14 = vrot.slane %v7422_v13, 4  ;;  %v7425_v17 = vrot.slane %v7424_v16, 4 }
  0x96   : >> { %v7427_v20 = vrot.slane %v7426_v19, 4  ;;  %v7429_v23 = vrot.slane %v7428_v22, 4  ;;  %v7431_v26 = vrot.slane %v7430_v25, 4  ;;  %v7433_v29 = vrot.slane %v7432_v28, 4 }
  0x97   : >> { %v443_v15 = vmax.f32 %v7422_v13, %v7423_v14  ;;  %v449_v18 = vmax.f32 %v7424_v16, %v7425_v17  ;;  %v432_v31 = vrot.slane %v431_v9, 2  ;;  %v438_v32 = vrot.slane %v437_v12, 2 }
  0x98   : >> { %v455_v21 = vmax.f32 %v7426_v19, %v7427_v20  ;;  %v461_v24 = vmax.f32 %v7428_v22, %v7429_v23  ;;  %v467_v27 = vmax.f32 %v7430_v25, %v7431_v26  ;;  %v473_v30 = vmax.f32 %v7432_v28, %v7433_v29  ;;  %v7437_v25 = vld [vmem:[#allocation26_spill] sm:$0xff]  ;;  %v7440_v26 = vld [vmem:[#allocation25_spill] sm:$0xff]  ;;  %v7446_v29 = vld [vmem:[#allocation23_spill] sm:$0xff] }
  0x99   : >> { %v444_v33 = vrot.slane %v443_v15, 2  ;;  %v450_v34 = vrot.slane %v449_v18, 2  ;;  %v433_v3 = vmax.f32 %v431_v9, %v432_v31  ;;  %v439_v4 = vmax.f32 %v437_v12, %v438_v32  ;;  %v7452_v31 = vld [vmem:[#allocation21_spill] sm:$0xff] }
  0x9a   : >> { %v456_v35 = vrot.slane %v455_v21, 2  ;;  %v462_v36 = vrot.slane %v461_v24, 2  ;;  %v468_v37 = vrot.slane %v467_v27, 2  ;;  %v474_v38 = vrot.slane %v473_v30, 2 }
  0x9b   : >> { %v445_v48 = vmax.f32 %v443_v15, %v444_v33  ;;  %v451_v56 = vmax.f32 %v449_v18, %v450_v34  ;;  %v434_v7 = vrot.slane %v433_v3, 1  ;;  %v440_v8 = vrot.slane %v439_v4, 1 }
  0x9c   : >> { %v457_v51 = vmax.f32 %v455_v21, %v456_v35  ;;  %v463_v52 = vmax.f32 %v461_v24, %v462_v36  ;;  %v469_v57 = vmax.f32 %v467_v27, %v468_v37  ;;  %v475_v53 = vmax.f32 %v473_v30, %v474_v38  ;;  %v7434_v21 = vld [vmem:[#allocation27_spill] sm:$0xff]  ;;  %v7443_v27 = vld [vmem:[#allocation24_spill] sm:$0xff]  ;;  %v7449_v30 = vld [vmem:[#allocation22_spill] sm:$0xff] }
  0x9d   : >> { %v446_v10 = vrot.slane %v445_v48, 1  ;;  %v452_v11 = vrot.slane %v451_v56, 1  ;;  %v435_v19 = vmax.f32 %v433_v3, %v434_v7  ;;  %v441_v20 = vmax.f32 %v439_v4, %v440_v8 }
  0x9e   : >> { %v458_v13 = vrot.slane %v457_v51, 1  ;;  %v464_v14 = vrot.slane %v463_v52, 1  ;;  %v470_v16 = vrot.slane %v469_v57, 1  ;;  %v476_v17 = vrot.slane %v475_v53, 1 }
  0x9f   : >> { %v447_v22 = vmax.f32 %v445_v48, %v446_v10  ;;  %v453_v23 = vmax.f32 %v451_v56, %v452_v11  ;;  %v4627_v24 = vmax.f32 %v7434_v21, %v387_v0   ;;  %v4636_v28 = vmax.f32 %v7443_v27, %v405_v43   ;;  %v7454_v0 = vld [vmem:[#allocation20_spill] sm:$0xff]  ;;  %v7463_v43 = vld [vmem:[#allocation17_spill] sm:$0xff] }
  0xa0   : >> { %v459_v9 = vmax.f32 %v457_v51, %v458_v13  ;;  %v465_v12 = vmax.f32 %v463_v52, %v464_v14  ;;  %v471_v15 = vmax.f32 %v469_v57, %v470_v16  ;;  %v477_v18 = vmax.f32 %v475_v53, %v476_v17 }
  0xa1   : >> { %7435 = vst [vmem:[#allocation42_spill] sm:$0xff] %v4627_v24  ;;  %v7436_v32 = vmov %v4627_v24  ;;  %v4630_v14 = vmax.f32 %v7437_v25, %v393_v40   ;;  %v4633_v13 = vmax.f32 %v7440_v26, %v399_v41   ;;  %7444 = vst [vmem:[#allocation45_spill] sm:$0xff] %v4636_v28  ;;  %v7445_v35 = vmov %v4636_v28  ;;  %v7457_v40 = vld [vmem:[#allocation19_spill] sm:$0xff]  ;;  %v7460_v41 = vld [vmem:[#allocation18_spill] sm:$0xff] }
  0xa2   : >> { %v4639_v11 = vmax.f32 %v7446_v29, %v411_v1   ;;  %v4642_v10 = vmax.f32 %v7449_v30, %v417_v2   ;;  %v4645_v38 = vmax.f32 %v7452_v31, %v423_v5   ;;  %v4648_v8 = vmax.f32 %v7454_v0, %v429_v6   ;;  %v7466_v1 = vld [vmem:[#allocation16_spill] sm:$0xff]  ;;  %v7469_v2 = vld [vmem:[#allocation15_spill] sm:$0xff] }
  0xa3   : >> { %7438 = vst [vmem:[#allocation43_spill] sm:$0xff] %v4630_v14  ;;  %v7439_v33 = vmov %v4630_v14  ;;  %7441 = vst [vmem:[#allocation44_spill] sm:$0xff] %v4633_v13  ;;  %v7442_v34 = vmov %v4633_v13  ;;  %v4651_v7 = vmax.f32 %v7457_v40, %v435_v19   ;;  %v4654_v6 = vmax.f32 %v7460_v41, %v441_v20   ;;  %v7517_v30 = vld [vmem:[#allocation41_spill] sm:$0xff]  ;;  %v7518_v31 = vld [vmem:[#allocation40_spill] sm:$0xff] }
  0xa4   : >> { %7447 = vst [vmem:[#allocation46_spill] sm:$0xff] %v4639_v11  ;;  %v7448_v36 = vmov %v4639_v11  ;;  %7450 = vst [vmem:[#allocation47_spill] sm:$0xff] %v4642_v10  ;;  %v7451_v37 = vmov %v4642_v10  ;;  %v7456_v48 = vmov %v4648_v8  ;;  %v4657_v5 = vmax.f32 %v7463_v43, %v447_v22   ;;  %v7472_v10 = vld [vmem:[#allocation14_spill] sm:$0xff]  ;;  %v7475_v11 = vld [vmem:[#allocation13_spill] sm:$0xff] }
  0xa5   : >> { %7453 = vst [vmem:[#allocation48_spill] sm:$0xff] %v4645_v38  ;;  %7455 = vst [vmem:[#allocation49_spill] sm:$0xff] %v4648_v8  ;;  %v7459_v56 = vmov %v4651_v7  ;;  %v7462_v51 = vmov %v4654_v6  ;;  %v4660_v4 = vmax.f32 %v7466_v1, %v453_v23   ;;  %v4663_v3 = vmax.f32 %v7469_v2, %v459_v9   ;;  %v7478_v8 = vld [vmem:[#allocation12_spill] sm:$0xff]  ;;  %v7520_v41 = vld [vmem:[#allocation40_spill] sm:$0xff] (%p4677_p4) }
  0xa6   : >> { %7458 = vst [vmem:[#allocation50_spill] sm:$0xff] %v4651_v7  ;;  %7461 = vst [vmem:[#allocation51_spill] sm:$0xff] %v4654_v6  ;;  %v4666_v2 = vmax.f32 %v7472_v10, %v465_v12   ;;  %v4669_v1 = vmax.f32 %v7475_v11, %v471_v15   ;;  %v4672_v0 = vmax.f32 %v7478_v8, %v477_v18   ;;  %v7491_v52 = vmov %v4657_v5 }
  0xa7   : >> { %7464 = vst [vmem:[#allocation52_spill] sm:$0xff] %v4657_v5  ;;  %7467 = vst [vmem:[#allocation53_spill] sm:$0xff] %v4660_v4  ;;  %v7468_v57 = vmov %v4660_v4  ;;  %v7488_v53 = vmov %v4663_v3  ;;  %v7492_v5 = vmov %v7491_v52  ;;  %v7493_v6 = vmov %v7462_v51 }
  0xa8   : >> { %7470 = vst [vmem:[#allocation54_spill] sm:$0xff] %v4663_v3  ;;  %7473 = vst [vmem:[#allocation55_spill] sm:$0xff] %v4666_v2  ;;  %v7482_v40 = vmov %v4672_v0  ;;  %v7484_v45 = vmov %v4669_v1  ;;  %v7486_v44 = vmov %v4666_v2  ;;  %v7489_v3 = vmov %v7488_v53 }
  0xa9   : >> { %7476 = vst [vmem:[#allocation56_spill] sm:$0xff] %v4669_v1  ;;  %7479 = vst [vmem:[#allocation57_spill] sm:$0xff] %v4672_v0  ;;  %v7483_v0 = vmov %v7482_v40  ;;  %v7485_v1 = vmov %v7484_v45  ;;  %v7487_v2 = vmov %v7486_v44  ;;  %v7490_v4 = vmov %v7468_v57  ;;  %212 = sbr.rel (!%p4677_p4) target bundleno = 99 (0x63), region = 187 }
  0xaa   : >> { %v7494_v7 = vmov %v7459_v56  ;;  %v7495_v8 = vmov %v7456_v48  ;;  %v7496_v9 = vmov %v4645_v38  ;;  %v7497_v10 = vmov %v7451_v37 }
  0xab   : >> { %v7498_v11 = vmov %v7448_v36  ;;  %v7499_v12 = vmov %v7445_v35  ;;  %v7500_v13 = vmov %v7442_v34  ;;  %v7501_v14 = vmov %v7439_v33 }
  0xac   : >> { %v7502_v15 = vmov %v7436_v32  ;;  %v7503_v16 = vmov %v7405_v39  ;;  %v7504_v17 = vmov %v7404_v63  ;;  %v7505_v18 = vmov %v7403_v62 }
  0xad   : >> { %v7506_v19 = vmov %v7402_v61  ;;  %v7507_v20 = vmov %v7401_v60  ;;  %v7508_v21 = vmov %v7400_v59  ;;  %v7509_v22 = vmov %v7399_v55 }
  0xae   : >> { %v7510_v23 = vmov %v7398_v54  ;;  %v7511_v24 = vmov %v7397_v58  ;;  %v7512_v25 = vmov %v7396_v42  ;;  %v7513_v26 = vmov %v7395_v50 }
  0xaf   : >> { %v7514_v27 = vmov %v7394_v49  ;;  %v7515_v28 = vmov %v7393_v47  ;;  %v7516_v29 = vmov %v7392_v46  ;;  %v4784_v43 = vmul.f32 (%p4677_p4), 0.03125, %v7520_v41 }
  0xb0   : > { %v4787_v45 = vmul.f32 0.03125, %v7392_v46  ;;  %v4790_v40 = vmul.f32 0.03125, %v7394_v49  ;;  %v4793_v53 = vmul.f32 0.03125, %v7396_v42  ;;  %v4796_v44 = vmul.f32 0.03125, %v7398_v54  ;;  %v7522_v54 = vld [vmem:[#allocation41_spill] sm:$0xff] }
  0xb1   : > { %v4799_v31 = vmul.f32 0.03125, %v7400_v59  ;;  %v4802_v52 = vmul.f32 0.03125, %v7402_v61  ;;  %v4805_v46 = vmul.f32 0.03125, %v7404_v63  ;;  %v4813_v59 = vmul.f32 0.03125, %v7522_v54 }
  0xb2   : > { %v529_v49 = vsel %vm7316_vm0, %v4787_v45, %v4784_v43  ;;  %v4816_v61 = vmul.f32 0.03125, %v7393_v47  ;;  %v4819_v5 = vmul.f32 0.03125, %v7395_v50  ;;  %v4824_v6 = vmul.f32 0.03125, %v7397_v58 }
  0xb3   : > { %7521 = vst [vmem:[#allocation40_spill] sm:$0xff] %v4805_v46  ;;  %v531_v42 = vsel %vm7318_vm1, %v4790_v40, %v529_v49  ;;  %v4827_v3 = vmul.f32 0.03125, %v7399_v55  ;;  %v4832_v47 = vmul.f32 0.03125, %v7401_v60  ;;  %v4840_v58 = vmul.f32 0.03125, %v7403_v62 }
  0xb4   : > { %v533_v63 = vsel %vm532_vm2, %v4793_v53, %v531_v42  ;;  %v542_v50 = vsel %vm7316_vm0, %v4816_v61, %v4813_v59  ;;  %v4847_v14 = vmul.f32 0.03125, %v7405_v39 }
  0xb5   : > { %v535_v4 = vsel %vm7324_vm3, %v4796_v44, %v533_v63  ;;  %7523 = vst [vmem:[#allocation41_spill] sm:$0xff] %v4840_v58  ;;  %v543_v55 = vsel %vm7318_vm1, %v4819_v5, %v542_v50 }
  0xb6   : > { %v537_v7 = vsel %vm7319_vm4, %v4799_v31, %v535_v4  ;;  %7524 = vst [vmem:[#allocation58_spill] sm:$0xff] %v4847_v14  ;;  %v544_v60 = vsel %vm532_vm2, %v4824_v6, %v543_v55 }
  0xb7   : > { %v539_v13 = vsel %vm7320_vm5, %v4802_v52, %v537_v7  ;;  %v545_v62 = vsel %vm7324_vm3, %v4827_v3, %v544_v60  ;;  %v1797_v60 = vsel %vm7316_vm0, %v7442_v34, %v7436_v32 }
  0xb8   : > { %v4853_v16 = vsel %vm7323_vm6, %v4805_v46, %v539_v13  ;;  %v546_v39 = vsel %vm7319_vm4, %v4832_v47, %v545_v62  ;;  %v1804_v13 = vsel %vm7316_vm0, %v7445_v35, %v7439_v33  ;;  %v1798_v33 = vsel %vm7318_vm1, %v7448_v36, %v1797_v60  ;;  %v5274_v46 = vld [vmem:[#allocation6 + $0x17] ss:$8 sm:$0x3] }
  0xb9   : > { %576 = vrot.lane.b32.xlu1 %v4853_v16, %s4013_s24  ;;  %551 = vrot.lane.b32.xlu0 %v4853_v16, %s4014_s22  ;;  %v547_v17 = vsel %vm7320_vm5, %v4840_v58, %v546_v39  ;;  %7555 = vst [vmem:[#allocation84_spill] sm:$0xff] %v5274_v46 }
  0xba   : > { %v4867_v19 = vsel %vm7323_vm6, %v4847_v14, %v547_v17  ;;  %v1805_v17 = vsel %vm7318_vm1, %v7451_v37, %v1804_v13  ;;  %v1799_v13 = vsel %vm532_vm2, %v4645_v38, %v1798_v33  ;;  %v555_v37 = vlaneseq  ;;  %v7539_v38 = vld [vmem:[#allocation52_spill] sm:$0xff] }
  0xbb   : > { %v1806_v32 = vsel %vm532_vm2, %v7456_v48, %v1805_v17  ;;  %v1800_v17 = vsel %vm7324_vm3, %v7459_v56, %v1799_v13  ;;  %v7542_v56 = vld [vmem:[#allocation55_spill] sm:$0xff]  ;;  %v5231_v14 = vld [vmem:[#allocation6 + $0x12] ss:$8 sm:$0x3] }
  0xbc   : > { %v1807_v60 = vsel %vm7324_vm3, %v7462_v51, %v1806_v32  ;;  %v1801_v32 = vsel %vm7319_vm4, %v7539_v38, %v1800_v17  ;;  %v563_v51 = vshrl.u32 %v555_v37, 7  ;;  %7551 = vst [vmem:[#allocation80_spill] sm:$0xff] %v5231_v14 }
  0xbd   : > { %578 = vrot.lane.b32.xlu1 %v4867_v19, %s4013_s24  ;;  %553 = vrot.lane.b32.xlu0 %v4867_v19, %s4014_s22  ;;  %v1808_v33 = vsel %vm7319_vm4, %v7468_v57, %v1807_v60  ;;  %v7543_v60 = vld [vmem:[#allocation54_spill] sm:$0xff] }
  0xbe   : > { %v1802_v57 = vsel %vm7320_vm5, %v7543_v60, %v1801_v32  ;;  %v5159_v17 = vsub.s32 0, %v563_v51  ;;  %v5161_v38 = vsub.s32 1, %v563_v51  ;;  %v5173_v32 = vld [vmem:[#allocation6 + $0x2] ss:$8 sm:$0x3]  ;;  %v7547_v51 = vld [vmem:[#allocation56_spill] sm:$0xff] }
  0xc1   : > { %602 = vrot.lane.b32.xlu1 %v4867_v19, %s4015_s28  ;;  %600 = vrot.lane.b32.xlu0 %v4853_v16, %s4015_s28 }
  0xc5   : > { %626 = vrot.lane.b32.xlu1 %v4867_v19, %s4016_s29  ;;  %624 = vrot.lane.b32.xlu0 %v4853_v16, %s4016_s29 }
  0xc9   : > { %650 = vrot.lane.b32.xlu1 %v4867_v19, %s4017_s30  ;;  %648 = vrot.lane.b32.xlu0 %v4853_v16, %s4017_s30 }
  0xcd   : > { %674 = vrot.lane.b32.xlu1 %v4867_v19, %s4018_s6  ;;  %672 = vrot.lane.b32.xlu0 %v4853_v16, %s4018_s6 }
  0xd1   : > { %698 = vrot.lane.b32.xlu1 %v4867_v19, %s4019_s7  ;;  %696 = vrot.lane.b32.xlu0 %v4853_v16, %s4019_s7 }
  0xd5   : > { %722 = vrot.lane.b32.xlu1 %v4867_v19, %s4020_s8  ;;  %720 = vrot.lane.b32.xlu0 %v4853_v16, %s4020_s8 }
  0xd9   : > { %746 = vrot.lane.b32.xlu1 %v4867_v19, %s4021_s21  ;;  %744 = vrot.lane.b32.xlu0 %v4853_v16, %s4021_s21 }
  0xdd   : > { %770 = vrot.lane.b32.xlu1 %v4867_v19, %s4022_s19  ;;  %768 = vrot.lane.b32.xlu0 %v4853_v16, %s4022_s19 }
  0xe1   : > { %794 = vrot.lane.b32.xlu1 %v4867_v19, %s4023_s4  ;;  %792 = vrot.lane.b32.xlu0 %v4853_v16, %s4023_s4 }
  0xe5   : > { %818 = vrot.lane.b32.xlu1 %v4867_v19, %s4024_s26  ;;  %816 = vrot.lane.b32.xlu0 %v4853_v16, %s4024_s26 }
  0xe9   : > { %842 = vrot.lane.b32.xlu1 %v4867_v19, %s7182_s27  ;;  %840 = vrot.lane.b32.xlu0 %v4853_v16, %s7182_s27  ;;  %s7190_s27 = smov 17  }
  0xed   : > { %866 = vrot.lane.b32.xlu1 %v4867_v19, %s7184_s5  ;;  %864 = vrot.lane.b32.xlu0 %v4853_v16, %s7184_s5  ;;  %s7192_s5 = smov 16  }
  0xf1   : > { %890 = vrot.lane.b32.xlu1 %v4867_v19, %s7186_s11  ;;  %888 = vrot.lane.b32.xlu0 %v4853_v16, %s7186_s11  ;;  %s7194_s11 = smov 15  }
  0xf5   : > { %914 = vrot.lane.b32.xlu1 %v4867_v19, %s7188_s12  ;;  %912 = vrot.lane.b32.xlu0 %v4853_v16, %s7188_s12  ;;  %s7196_s12 = smov 14  }
  0xf9   : > { %938 = vrot.lane.b32.xlu1 %v4867_v19, %s7190_s27  ;;  %936 = vrot.lane.b32.xlu0 %v4853_v16, %s7190_s27  ;;  %s7198_s27 = smov 13  }
  0xfd   : > { %962 = vrot.lane.b32.xlu1 %v4867_v19, %s7192_s5  ;;  %960 = vrot.lane.b32.xlu0 %v4853_v16, %s7192_s5  ;;  %s7200_s5 = smov 3  }
 0x101   : > { %986 = vrot.lane.b32.xlu1 %v4867_v19, %s7194_s11  ;;  %984 = vrot.lane.b32.xlu0 %v4853_v16, %s7194_s11  ;;  %s7202_s11 = smov 2  }
 0x105   : > { %1010 = vrot.lane.b32.xlu1 %v4867_v19, %s7196_s12  ;;  %1008 = vrot.lane.b32.xlu0 %v4853_v16, %s7196_s12  ;;  %s7204_s12 = smov 1  }
 0x109   : > { %1034 = vrot.lane.b32.xlu1 %v4867_v19, %s7198_s27  ;;  %1032 = vrot.lane.b32.xlu0 %v4853_v16, %s7198_s27  ;;  %s7206_s27 = smov 127  }
 0x10d   : > { %1058 = vrot.lane.b32.xlu1 %v4867_v19, %s7200_s5  ;;  %1056 = vrot.lane.b32.xlu0 %v4853_v16, %s7200_s5  ;;  %s7208_s5 = smov 126  }
 0x111   : > { %1082 = vrot.lane.b32.xlu1 %v4867_v19, %s7202_s11  ;;  %1080 = vrot.lane.b32.xlu0 %v4853_v16, %s7202_s11  ;;  %s4039_s11 = smov 125  }
 0x115   : > { %1106 = vrot.lane.b32.xlu1 %v4867_v19, %s7204_s12  ;;  %1104 = vrot.lane.b32.xlu0 %v4853_v16, %s7204_s12  ;;  %s7210_s12 = smov 115  }
 0x119   : > { %1207 = vrot.lane.b32.xlu1 %v4867_v19, %s7206_s27  ;;  %1205 = vrot.lane.b32.xlu0 %v4853_v16, %s7206_s27  ;;  %s7212_s27 = smov 114  }
 0x11d   : > { %1231 = vrot.lane.b32.xlu1 %v4867_v19, %s7208_s5  ;;  %1229 = vrot.lane.b32.xlu0 %v4853_v16, %s7208_s5  ;;  %s7214_s5 = smov 113  }
 0x121   : > { %1255 = vrot.lane.b32.xlu1 %v4867_v19, %s4039_s11  ;;  %1253 = vrot.lane.b32.xlu0 %v4853_v16, %s4039_s11 }
 0x125   : > { %1279 = vrot.lane.b32.xlu1 %v4867_v19, %s7210_s12  ;;  %1277 = vrot.lane.b32.xlu0 %v4853_v16, %s7210_s12  ;;  %s7216_s12 = smov 112  }
 0x129   : > { %1303 = vrot.lane.b32.xlu1 %v4867_v19, %s7212_s27  ;;  %1301 = vrot.lane.b32.xlu0 %v4853_v16, %s7212_s27  ;;  %s7218_s27 = smov 111  }
 0x12b   : > { %v4981_v20 = vpop.permute.xlu1 %576  ;;  %v4983_v22 = vpop.permute.xlu0 %551 }
 0x12d   : > { %1327 = vrot.lane.b32.xlu1 %v4867_v19, %s7214_s5  ;;  %1325 = vrot.lane.b32.xlu0 %v4853_v16, %s7214_s5  ;;  %s7220_s5 = smov 110  }
 0x12f   : > { %v4989_v23 = vpop.permute.xlu1 %578  ;;  %v4991_v9 = vpop.permute.xlu0 %553 }
 0x131   : > { %1351 = vrot.lane.b32.xlu1 %v4867_v19, %s7216_s12  ;;  %1349 = vrot.lane.b32.xlu0 %v4853_v16, %s7216_s12  ;;  %s7222_s12 = smov 109  }
 0x133   : > { %v4997_v12 = vpop.permute.xlu1 %602  ;;  %v4999_v15 = vpop.permute.xlu0 %600 }
 0x135   : > { %1375 = vrot.lane.b32.xlu1 %v4867_v19, %s7218_s27  ;;  %1373 = vrot.lane.b32.xlu0 %v4853_v16, %s7218_s27  ;;  %s7224_s27 = smov 99  }
 0x137   : > { %v5005_v18 = vpop.permute.xlu1 %626  ;;  %v5007_v21 = vpop.permute.xlu0 %624 }
 0x139   : > { %1399 = vrot.lane.b32.xlu1 %v4867_v19, %s7220_s5  ;;  %1397 = vrot.lane.b32.xlu0 %v4853_v16, %s7220_s5  ;;  %s7226_s5 = smov 98  }
 0x13b   : > { %v5013_v24 = vpop.permute.xlu1 %650  ;;  %v5015_v25 = vpop.permute.xlu0 %648 }
 0x13d   : > { %1423 = vrot.lane.b32.xlu1 %v4867_v19, %s7222_s12  ;;  %1421 = vrot.lane.b32.xlu0 %v4853_v16, %s7222_s12  ;;  %s7228_s12 = smov 97  }
 0x13f   : > { %v5021_v26 = vpop.permute.xlu1 %674  ;;  %v5023_v27 = vpop.permute.xlu0 %672 }
 0x141   : > { %1447 = vrot.lane.b32.xlu1 %v4867_v19, %s7224_s27  ;;  %1445 = vrot.lane.b32.xlu0 %v4853_v16, %s7224_s27  ;;  %s7230_s27 = smov 96  }
 0x143   : > { %v5029_v28 = vpop.permute.xlu1 %698  ;;  %v5031_v29 = vpop.permute.xlu0 %696 }
 0x145   : > { %1471 = vrot.lane.b32.xlu1 %v4867_v19, %s7226_s5  ;;  %1469 = vrot.lane.b32.xlu0 %v4853_v16, %s7226_s5  ;;  %s7232_s5 = smov 95  }
 0x147   : > { %v5037_v30 = vpop.permute.xlu1 %722  ;;  %v5039_v0 = vpop.permute.xlu0 %720 }
 0x149   : > { %1495 = vrot.lane.b32.xlu1 %v4867_v19, %s7228_s12  ;;  %1493 = vrot.lane.b32.xlu0 %v4853_v16, %s7228_s12  ;;  %s7234_s12 = smov 94  }
 0x14b   : > { %v5045_v1 = vpop.permute.xlu1 %746  ;;  %v5047_v2 = vpop.permute.xlu0 %744 }
 0x14d   : > { %1519 = vrot.lane.b32.xlu1 %v4867_v19, %s7230_s27  ;;  %1517 = vrot.lane.b32.xlu0 %v4853_v16, %s7230_s27  ;;  %s4053_s27 = smov 93  }
 0x14f   : > { %v5053_v10 = vpop.permute.xlu1 %770  ;;  %v5055_v11 = vpop.permute.xlu0 %768 }
 0x151   : > { %1543 = vrot.lane.b32.xlu1 %v4867_v19, %s7232_s5  ;;  %1541 = vrot.lane.b32.xlu0 %v4853_v16, %s7232_s5  ;;  %s7236_s5 = smov 83  }
 0x153   : > { %v5061_v8 = vpop.permute.xlu1 %794  ;;  %v5063_v41 = vpop.permute.xlu0 %792 }
 0x155   : > { %1567 = vrot.lane.b32.xlu1 %v4867_v19, %s7234_s12  ;;  %1565 = vrot.lane.b32.xlu0 %v4853_v16, %s7234_s12  ;;  %s7239_s12 = smov 82  }
 0x157   : > { %v5069_v49 = vpop.permute.xlu1 %818  ;;  %v5071_v42 = vpop.permute.xlu0 %816 }
 0x158   : > { %7525 = vst [vmem:[#allocation59_spill] sm:$0xff] %v5069_v49  ;;  %7526 = vst [vmem:[#allocation60_spill] sm:$0xff] %v5071_v42  ;;  %v5310_v49 = vld [vmem:[#allocation6 + $0x23] ss:$8 sm:$0x3] }
 0x159   : > { %1591 = vrot.lane.b32.xlu1 %v4867_v19, %s4053_s27  ;;  %1589 = vrot.lane.b32.xlu0 %v4853_v16, %s4053_s27  ;;  %7561 = vst [vmem:[#allocation90_spill] sm:$0xff] %v5310_v49 }
 0x15b   : > { %v5077_v54 = vpop.permute.xlu1 %842  ;;  %v5079_v63 = vpop.permute.xlu0 %840 }
 0x15c   : > { %7527 = vst [vmem:[#allocation61_spill] sm:$0xff] %v5077_v54  ;;  %7528 = vst [vmem:[#allocation62_spill] sm:$0xff] %v5079_v63  ;;  %v5241_v63 = vld [vmem:[#allocation6 + $0x13] ss:$8 sm:$0x3] }
 0x15d   : > { %1615 = vrot.lane.b32.xlu1 %v4867_v19, %s7236_s5  ;;  %1613 = vrot.lane.b32.xlu0 %v4853_v16, %s7236_s5  ;;  %s7244_s5 = smov 81   ;;  %7552 = vst [vmem:[#allocation81_spill] sm:$0xff] %v5241_v63  ;;  %v5258_v54 = vld [vmem:[#allocation6 + $0x16] ss:$8 sm:$0x3] }
 0x15e   : > { %7554 = vst [vmem:[#allocation83_spill] sm:$0xff] %v5258_v54 }
 0x15f   : > { %v5085_v4 = vpop.permute.xlu1 %866  ;;  %v5087_v50 = vpop.permute.xlu0 %864 }
 0x160   : > { %7529 = vst [vmem:[#allocation63_spill] sm:$0xff] %v5085_v4  ;;  %7530 = vst [vmem:[#allocation64_spill] sm:$0xff] %v5087_v50 }
 0x161   : > { %1639 = vrot.lane.b32.xlu1 %v4867_v19, %s7239_s12  ;;  %1637 = vrot.lane.b32.xlu0 %v4853_v16, %s7239_s12  ;;  %s7249_s12 = smov 80  }
 0x163   : > { %v5093_v7 = vpop.permute.xlu1 %890  ;;  %v5095_v55 = vpop.permute.xlu0 %888 }
 0x164   : > { %7531 = vst [vmem:[#allocation65_spill] sm:$0xff] %v5093_v7  ;;  %7532 = vst [vmem:[#allocation66_spill] sm:$0xff] %v5095_v55  ;;  %v5214_v55 = vld [vmem:[#allocation6 + $0x10] ss:$8 sm:$0x3] }
 0x165   : > { %1663 = vrot.lane.b32.xlu1 %v4867_v19, %s7244_s5  ;;  %1661 = vrot.lane.b32.xlu0 %v4853_v16, %s7244_s5  ;;  %s7258_s5 = smov 79   ;;  %v5216_v7 = vld [vmem:[#allocation6 + $0x11] ss:$8 sm:$0x3] }
 0x166   : > { %7548 = vst [vmem:[#allocation77_spill] sm:$0xff] %v5216_v7  ;;  %v5291_v7 = vld [vmem:[#allocation6 + $0x21] ss:$8 sm:$0x3] }
 0x167   : > { %v5107_v62 = vpop.permute.xlu1 %914  ;;  %v5109_v39 = vpop.permute.xlu0 %912  ;;  %7559 = vst [vmem:[#allocation88_spill] sm:$0xff] %v5291_v7 }
 0x168   : > { %7533 = vst [vmem:[#allocation67_spill] sm:$0xff] %v5107_v62  ;;  %7534 = vst [vmem:[#allocation68_spill] sm:$0xff] %v5109_v39  ;;  %v5202_v39 = vld [vmem:[#allocation6 + $0x7] ss:$8 sm:$0x3] }
 0x169   : > { %1687 = vrot.lane.b32.xlu1 %v4867_v19, %s7249_s12  ;;  %1685 = vrot.lane.b32.xlu0 %v4853_v16, %s7249_s12  ;;  %s4059_s12 = smov 78  }
 0x16b   : > { %v5121_v35 = vpop.permute.xlu1 %938  ;;  %v5123_v34 = vpop.permute.xlu0 %936 }
 0x16c   : > { %7535 = vst [vmem:[#allocation69_spill] sm:$0xff] %v5121_v35  ;;  %7536 = vst [vmem:[#allocation70_spill] sm:$0xff] %v5123_v34  ;;  %v5163_v35 = vld [vmem:[#allocation6 + $0x1] ss:$8 sm:$0x3] }
 0x16d   : > { %1711 = vrot.lane.b32.xlu1 %v4867_v19, %s7258_s5  ;;  %1709 = vrot.lane.b32.xlu0 %v4853_v16, %s7258_s5  ;;  %s4060_s5 = smov 77   ;;  %v7566_v54 = vrot.slane %v5163_v35, %v5159_v17  ;;  %v7567_v49 = vrot.slane %v5163_v35, %v5161_v38 }
 0x16f   : > { %v5135_v48 = vpop.permute.xlu1 %962  ;;  %v5137_v36 = vpop.permute.xlu0 %960 }
 0x170   : > { %7537 = vst [vmem:[#allocation71_spill] sm:$0xff] %v5135_v48  ;;  %7538 = vst [vmem:[#allocation72_spill] sm:$0xff] %v5137_v36  ;;  %v1809_v36 = vsel %vm7320_vm5, %v7542_v56, %v1808_v33  ;;  %v5153_v48 = vand.u32 127, %v555_v37  ;;  %v7544_v33 = vld [vmem:[#allocation57_spill] sm:$0xff] }
 0x171   : > { %1735 = vrot.lane.b32.xlu1 %v4867_v19, %s4059_s12  ;;  %1733 = vrot.lane.b32.xlu0 %v4853_v16, %s4059_s12  ;;  %v5169_v37 = vsel %vm7323_vm6, %v7544_v33, %v1809_v36  ;;  %v5171_v56 = vld [vmem:[#allocation6] ss:$8 sm:$0x3]  ;;  %v5188_v36 = vld [vmem:[#allocation6 + $0x5] ss:$8 sm:$0x3] }
 0x172   : > { %vm557_vm7 = vcmp.lt.s32.totalorder %v5153_v48, 51  ;;  %vm580_vm8 = vcmp.lt.s32.totalorder %v5153_v48, 50  ;;  %v569_v62 = vrot.slane %v5171_v56, %v5161_v38  ;;  %vm604_vm9 = vcmp.lt.s32.totalorder %v5153_v48, 49  ;;  %v5289_v33 = vld [vmem:[#allocation6 + $0x20] ss:$8 sm:$0x3] }
 0x173   : > { %v5147_v34 = vpop.permute.xlu1 %986  ;;  %v5149_v13 = vpop.permute.xlu0 %984  ;;  %vm7304_vm10 = vcmp.lt.s32.totalorder %v5153_v48, 48  ;;  %vm7305_vm11 = vcmp.lt.s32.totalorder %v5153_v48, 47  ;;  %7558 = vst [vmem:[#allocation87_spill] sm:$0xff] %v5289_v33  ;;  %vm7306_vm12 = vcmp.lt.s32.totalorder %v5153_v48, 46  ;;  %vm7307_vm13 = vcmp.lt.s32.totalorder %v5153_v48, 45 }
 0x174   : > { %7540 = vst [vmem:[#allocation73_spill] sm:$0xff] %v5147_v34  ;;  %7541 = vst [vmem:[#allocation74_spill] sm:$0xff] %v5149_v13  ;;  %v5181_v13 = vsel %vm7323_vm6, %v7547_v51, %v1802_v57  ;;  %v5184_v34 = vld [vmem:[#allocation6 + $0x3] ss:$8 sm:$0x3]  ;;  %vm7308_vm14 = vcmp.lt.s32.totalorder %v5153_v48, 35  ;;  %v630_v35 = vsel %vm7304_vm10, %v5005_v18, %v5007_v21 }
 0x175   : > { %1759 = vrot.lane.b32.xlu1 %v4867_v19, %s4060_s5  ;;  %1757 = vrot.lane.b32.xlu0 %v4853_v16, %s4060_s5  ;;  %v5186_v16 = vld [vmem:[#allocation6 + $0x4] ss:$8 sm:$0x3]  ;;  %v5243_v57 = vld [vmem:[#allocation6 + $0x14] ss:$8 sm:$0x3] }
 0x176   : > { %v5256_v51 = vld [vmem:[#allocation6 + $0x15] ss:$8 sm:$0x3]  ;;  %v5335_v33 = vld [vmem:[#allocation6 + $0x25] ss:$8 sm:$0x3] }
 0x177   : > { %v5175_v60 = vpop.permute.xlu1 %1010  ;;  %v5177_v19 = vpop.permute.xlu0 %1008  ;;  %7553 = vst [vmem:[#allocation82_spill] sm:$0xff] %v5256_v51  ;;  %vm7309_vm15 = vcmp.lt.s32.totalorder %v5153_v48, 34 }
 0x178   : > { %7545 = vst [vmem:[#allocation75_spill] sm:$0xff] %v5175_v60  ;;  %7546 = vst [vmem:[#allocation76_spill] sm:$0xff] %v5177_v19  ;;  %v565_v19 = vrot.slane %v5171_v56, %v5159_v17  ;;  %v5200_v60 = vld [vmem:[#allocation6 + $0x6] ss:$8 sm:$0x3]  ;;  %v559_v56 = vsel %vm557_vm7, %v4991_v9, %v4983_v22 }
 0x179   : > { %1815 = vrot.lane.b32.xlu1 %v5169_v37, %s4014_s22  ;;  %1813 = vrot.lane.b32.xlu0 %v5181_v13, %s4014_s22  ;;  %s7647_s22 = smov 19  }
 0x17a   : > { %v572_v63 = vmul.f32 %v565_v19, %v559_v56  ;;  %v5322_v56 = vld [vmem:[#allocation6 + $0x24] ss:$8 sm:$0x3] }
 0x17b   : > { %v5218_v50 = vpop.permute.xlu1 %1034  ;;  %v5220_v4 = vpop.permute.xlu0 %1032 }
 0x17c   : > { %7549 = vst [vmem:[#allocation78_spill] sm:$0xff] %v5218_v50  ;;  %7550 = vst [vmem:[#allocation79_spill] sm:$0xff] %v5220_v4  ;;  %v558_v50 = vsel %vm557_vm7, %v4983_v22, %v4991_v9  ;;  %v5301_v9 = vld [vmem:[#allocation6 + $0x22] ss:$8 sm:$0x3]  ;;  %v582_v22 = vsel %vm580_vm8, %v4989_v23, %v4981_v20 }
 0x17d   : > { %1838 = vrot.lane.b32.xlu1 %v5169_v37, %s4013_s24  ;;  %1836 = vrot.lane.b32.xlu0 %v5181_v13, %s4013_s24  ;;  %7560 = vst [vmem:[#allocation89_spill] sm:$0xff] %v5301_v9  ;;  %v1129_v4 = vld [vmem:[#allocation6 + $0x30] ss:$8 sm:$0x3]  ;;  %v573_v14 = vmul.f32 %v569_v62, %v558_v50  ;;  %v596_v19 = vmul.f32 %v7566_v54, %v582_v22  ;;  %s7640_s24 = smov 29  }
 0x17e   : > { %v5338_v62 = vrot.slane %v1129_v4, %v5159_v17  ;;  %v5353_v50 = vrot.slane %v1129_v4, %v5161_v38  ;;  %v629_v4 = vsel %vm7304_vm10, %v5007_v21, %v5005_v18  ;;  %v7568_v22 = vrot.slane %v5173_v32, %v5159_v17 }
 0x17f   : > { %v5276_v58 = vpop.permute.xlu1 %1058  ;;  %v5278_v42 = vpop.permute.xlu0 %1056  ;;  %vm7310_vm10 = vcmp.lt.s32.totalorder %v5153_v48, 33 }
 0x180   : > { %7556 = vst [vmem:[#allocation85_spill] sm:$0xff] %v5276_v58  ;;  %7557 = vst [vmem:[#allocation86_spill] sm:$0xff] %v5278_v42 }
 0x181   : > { %1861 = vrot.lane.b32.xlu1 %v5169_v37, %s4015_s28  ;;  %1859 = vrot.lane.b32.xlu0 %v5181_v13, %s4015_s28  ;;  %s7649_s28 = smov 18  }
 0x183   : > { %v5324_v58 = vpop.permute.xlu1 %1082  ;;  %v5326_v42 = vpop.permute.xlu0 %1080 }
 0x184   : > { %7562 = vst [vmem:[#allocation91_spill] sm:$0xff] %v5324_v58  ;;  %7563 = vst [vmem:[#allocation92_spill] sm:$0xff] %v5326_v42  ;;  %v581_v42 = vsel %vm580_vm8, %v4981_v20, %v4989_v23  ;;  %v7564_v58 = vstv %s4245_s9  ;;  %v5364_v23 = vld [vmem:[#allocation6 + $0x26] ss:$8 sm:$0x3]  ;;  %s7629_s9 = smov 30  }
 0x185   : > { %1884 = vrot.lane.b32.xlu1 %v5169_v37, %s4016_s29  ;;  %v574_v9 = vadd.f32 %v572_v63, %v7564_v58  ;;  %v7565_v7 = vmov %v7564_v58  ;;  %1882 = vrot.lane.b32.xlu0 %v5181_v13, %s4016_s29  ;;  %v605_v58 = vsel %vm604_vm9, %v4999_v15, %v4997_v12  ;;  %v597_v51 = vmul.f32 %v7567_v49, %v581_v42  ;;  %s7650_s29 = smov 17  }
 0x186   : > { %v575_v46 = vadd.f32 %v573_v14, %v7565_v7  ;;  %v606_v14 = vsel %vm604_vm9, %v4997_v12, %v4999_v15  ;;  %v5395_v15 = vmul.f32 %v5338_v62, %v4787_v45  ;;  %v1093_v49 = vrot.slane %v5364_v23, %v5159_v17 }
 0x187   : > { %v5380_v7 = vpop.permute.xlu1 %1106  ;;  %v5382_v20 = vpop.permute.xlu0 %1104  ;;  %v5409_v42 = vmul.f32 %v5353_v50, %v4816_v61  ;;  %v598_v45 = vadd.f32 %v596_v19, %v574_v9  ;;  %v620_v12 = vmul.f32 %v7568_v22, %v606_v14  ;;  %v7569_v63 = vrot.slane %v5173_v32, %v5161_v38 }
 0x188   : > { %v599_v54 = vadd.f32 %v597_v51, %v575_v46  ;;  %v653_v61 = vsel %vm7305_vm11, %v5015_v25, %v5013_v24  ;;  %v654_v46 = vsel %vm7305_vm11, %v5013_v24, %v5015_v25  ;;  %v1097_v21 = vrot.slane %v5364_v23, %v5161_v38 }
 0x189   : > { %1907 = vrot.lane.b32.xlu1 %v5169_v37, %s4017_s30  ;;  %v621_v18 = vmul.f32 %v7569_v63, %v605_v58  ;;  %1905 = vrot.lane.b32.xlu0 %v5181_v13, %s4017_s30  ;;  %v5434_v32 = vmul.f32 %v5338_v62, %v4790_v40  ;;  %v7570_v19 = vrot.slane %v5184_v34, %v5159_v17  ;;  %vm7311_vm11 = vcmp.lt.s32.totalorder %v5153_v48, 32  ;;  %s7651_s30 = smov 16  }
 0x18a   : > { %v7571_v14 = vrot.slane %v5184_v34, %v5161_v38  ;;  %v5449_v24 = vmul.f32 %v5338_v62, %v4784_v43  ;;  %v5453_v40 = vmul.f32 %v5353_v50, %v4819_v5  ;;  %v677_v25 = vsel %vm7306_vm12, %v5023_v27, %v5021_v26 }
 0x18b   : > { %v5436_v51 = vpop.permute.xlu1 %1207  ;;  %v5438_v9 = vpop.permute.xlu0 %1205  ;;  %v644_v58 = vmul.f32 %v7570_v19, %v630_v35  ;;  %v678_v34 = vsel %vm7306_vm12, %v5021_v26, %v5023_v27  ;;  %v5469_v43 = vmul.f32 %v5338_v62, %v4793_v53  ;;  %v622_v5 = vadd.f32 %v620_v12, %v598_v45 }
 0x18c   : > { %v645_v63 = vmul.f32 %v7571_v14, %v629_v4  ;;  %v5465_v4 = vmul.f32 %v5353_v50, %v4813_v59  ;;  %v623_v35 = vadd.f32 %v621_v18, %v599_v54  ;;  %v7572_v22 = vrot.slane %v5186_v16, %v5159_v17 }
 0x18d   : > { %1930 = vrot.lane.b32.xlu1 %v5169_v37, %s4018_s6  ;;  %v7573_v26 = vrot.slane %v5186_v16, %v5161_v38  ;;  %vm7312_vm12 = vcmp.lt.s32.totalorder %v5153_v48, 31  ;;  %1928 = vrot.lane.b32.xlu0 %v5181_v13, %s4018_s6  ;;  %v701_v53 = vsel %vm7307_vm13, %v5031_v29, %v5029_v28  ;;  %v702_v59 = vsel %vm7307_vm13, %v5029_v28, %v5031_v29  ;;  %s7652_s6 = smov 15  }
 0x18e   : > { %v668_v19 = vmul.f32 %v7572_v22, %v654_v46  ;;  %v5492_v12 = vmul.f32 %v5353_v50, %v4824_v6  ;;  %v1173_v16 = vrot.slane %v5395_v15, 7  ;;  %v646_v18 = vadd.f32 %v644_v58, %v622_v5  ;;  %v7602_v15 = vld [vmem:[#allocation65_spill] sm:$0xff] }
 0x18f   : > { %v669_v27 = vmul.f32 %v7573_v26, %v653_v61  ;;  %v5495_v45 = vpop.permute.xlu1 %1231  ;;  %v5497_v54 = vpop.permute.xlu0 %1229  ;;  %v647_v61 = vadd.f32 %v645_v63, %v623_v35  ;;  %v7574_v46 = vrot.slane %v5188_v36, %v5159_v17  ;;  %v7575_v22 = vrot.slane %v5188_v36, %v5161_v38 }
 0x190   : > { %vm7313_vm13 = vcmp.lt.s32.totalorder %v5153_v48, 30  ;;  %v725_v6 = vsel %vm7308_vm14, %v5039_v0, %v5037_v30  ;;  %v726_v29 = vsel %vm7308_vm14, %v5037_v30, %v5039_v0  ;;  %v5516_v58 = vmul.f32 %v5338_v62, %v4796_v44 }
 0x191   : > { %v692_v14 = vmul.f32 %v7574_v46, %v678_v34  ;;  %v693_v28 = vmul.f32 %v7575_v22, %v677_v25  ;;  %v5520_v36 = vmul.f32 %v5353_v50, %v4827_v3  ;;  %1953 = vrot.lane.b32.xlu1 %v5169_v37, %s4019_s7  ;;  %v670_v63 = vadd.f32 %v668_v19, %v646_v18 }
 0x192   : > { %v671_v25 = vadd.f32 %v669_v27, %v647_v61  ;;  %v7576_v34 = vrot.slane %v5200_v60, %v5159_v17  ;;  %v7577_v30 = vrot.slane %v5200_v60, %v5161_v38  ;;  %vm7314_vm14 = vcmp.lt.s32.totalorder %v5153_v48, 29  ;;  %1951 = vrot.lane.b32.xlu0 %v5181_v13, %s4019_s7  ;;  %s7653_s7 = smov 14  }
 0x193   : > { %v749_v44 = vsel %vm7309_vm15, %v5047_v2, %v5045_v1  ;;  %v750_v3 = vsel %vm7309_vm15, %v5045_v1, %v5047_v2  ;;  %v5543_v35 = vmul.f32 %v5338_v62, %v4799_v31  ;;  %v1175_v60 = vrot.slane %v5434_v32, 6  ;;  %v5546_v19 = vpop.permute.xlu1 %1255  ;;  %v5548_v26 = vpop.permute.xlu0 %1253  ;;  %v5557_v31 = vld [vmem:[#allocation6 + $0x27] ss:$8 sm:$0x3]  ;;  %v7612_v32 = vld [vmem:[#allocation69_spill] sm:$0xff] }
 0x194   : > { %v716_v5 = vmul.f32 %v7576_v34, %v702_v59  ;;  %v717_v0 = vmul.f32 %v7577_v30, %v701_v53  ;;  %v694_v27 = vadd.f32 %v692_v14, %v670_v63  ;;  %v695_v53 = vadd.f32 %v693_v28, %v671_v25 }
 0x195   : > { %v7578_v59 = vrot.slane %v5202_v39, %v5159_v17  ;;  %v7579_v61 = vrot.slane %v5202_v39, %v5161_v38  ;;  %vm7315_vm15 = vcmp.lt.s32.totalorder %v5153_v48, 19  ;;  %v773_v2 = vsel %vm7310_vm10, %v5055_v11, %v5053_v10  ;;  %1976 = vrot.lane.b32.xlu1 %v5169_v37, %s4020_s8 }
 0x196   : > { %v774_v46 = vsel %vm7310_vm10, %v5053_v10, %v5055_v11  ;;  %v5569_v14 = vmul.f32 %v5353_v50, %v4832_v47  ;;  %v5573_v39 = vmul.f32 %v5338_v62, %v4802_v52  ;;  %v718_v22 = vadd.f32 %v716_v5, %v694_v27  ;;  %1974 = vrot.lane.b32.xlu0 %v5181_v13, %s4020_s8  ;;  %s7654_s8 = smov 13  }
 0x197   : > { %v740_v18 = vmul.f32 %v7578_v59, %v726_v29  ;;  %v741_v1 = vmul.f32 %v7579_v61, %v725_v6  ;;  %v719_v28 = vadd.f32 %v717_v0, %v695_v53  ;;  %v7580_v6 = vrot.slane %v5214_v55, %v5159_v17  ;;  %v5598_v25 = vpop.permute.xlu1 %1279  ;;  %v5600_v34 = vpop.permute.xlu0 %1277  ;;  %v7582_v0 = vld [vmem:[#allocation77_spill] sm:$0xff]  ;;  %v7586_v53 = vld [vmem:[#allocation60_spill] sm:$0xff] }
 0x198   : > { %v7581_v10 = vrot.slane %v5214_v55, %v5161_v38  ;;  %vm7317_vm10 = vcmp.lt.s32.totalorder %v5153_v48, 18  ;;  %v797_v52 = vsel %vm7311_vm11, %v5063_v41, %v5061_v8  ;;  %v798_v47 = vsel %vm7311_vm11, %v5061_v8, %v5063_v41  ;;  %v7585_v41 = vld [vmem:[#allocation59_spill] sm:$0xff]  ;;  %v7587_v61 = vld [vmem:[#allocation41_spill] sm:$0xff] }
 0x199   : > { %v764_v29 = vmul.f32 %v7580_v6, %v750_v3  ;;  %v1117_v63 = vrot.slane %v5557_v31, %v5159_v17  ;;  %v742_v5 = vadd.f32 %v740_v18, %v718_v22  ;;  %v743_v30 = vadd.f32 %v741_v1, %v719_v28  ;;  %1999 = vrot.lane.b32.xlu1 %v5169_v37, %s4021_s21  ;;  %v7589_v6 = vld [vmem:[#allocation80_spill] sm:$0xff] }
 0x19a   : > { %v765_v11 = vmul.f32 %v7581_v10, %v749_v44  ;;  %v7583_v44 = vrot.slane %v7582_v0, %v5159_v17  ;;  %v7584_v27 = vrot.slane %v7582_v0, %v5161_v38  ;;  %vm940_vm11 = vcmp.lt.s32.totalorder %v5153_v48, 17  ;;  %1997 = vrot.lane.b32.xlu0 %v5181_v13, %s4021_s21  ;;  %s7655_s21 = smov 3  }
 0x19b   : > { %v821_v59 = vsel %vm7312_vm12, %v7586_v53, %v7585_v41  ;;  %v822_v18 = vsel %vm7312_vm12, %v7585_v41, %v7586_v53  ;;  %v5619_v1 = vmul.f32 %v5353_v50, %v7587_v61  ;;  %v7590_v10 = vrot.slane %v7589_v6, %v5159_v17  ;;  %v7593_v41 = vld [vmem:[#allocation62_spill] sm:$0xff] }
 0x19c   : > { %v788_v3 = vmul.f32 %v7583_v44, %v774_v46  ;;  %v789_v8 = vmul.f32 %v7584_v27, %v773_v2  ;;  %v7588_v46 = vld [vmem:[#allocation40_spill] sm:$0xff]  ;;  %v766_v2 = vadd.f32 %v764_v29, %v742_v5  ;;  %v767_v28 = vadd.f32 %v765_v11, %v743_v30  ;;  %v7594_v11 = vld [vmem:[#allocation58_spill] sm:$0xff]  ;;  %v5649_v5 = vpop.permute.xlu1 %1303  ;;  %v5651_v30 = vpop.permute.xlu0 %1301 }
 0x19d   : > { %v5623_v22 = vmul.f32 %v5338_v62, %v7588_v46  ;;  %v812_v0 = vmul.f32 %v7590_v10, %v798_v47  ;;  %v7591_v44 = vrot.slane %v7589_v6, %v5161_v38  ;;  %vm964_vm12 = vcmp.lt.s32.totalorder %v5153_v48, 16  ;;  %v7592_v62 = vld [vmem:[#allocation61_spill] sm:$0xff]  ;;  %2022 = vrot.lane.b32.xlu1 %v5169_v37, %s4022_s19 }
 0x19e   : > { %v845_v53 = vsel %vm7313_vm13, %v7593_v41, %v7592_v62  ;;  %v846_v29 = vsel %vm7313_vm13, %v7592_v62, %v7593_v41  ;;  %v5646_v47 = vmul.f32 %v5353_v50, %v7594_v11  ;;  %v790_v61 = vadd.f32 %v788_v3, %v766_v2  ;;  %v7595_v6 = vld [vmem:[#allocation81_spill] sm:$0xff]  ;;  %v7598_v50 = vld [vmem:[#allocation63_spill] sm:$0xff]  ;;  %v7599_v41 = vld [vmem:[#allocation64_spill] sm:$0xff]  ;;  %2020 = vrot.lane.b32.xlu0 %v5181_v13, %s4022_s19  ;;  %s7656_s19 = smov 2  }
 0x19f   : > { %v813_v27 = vmul.f32 %v7591_v44, %v797_v52  ;;  %v1187_v52 = vrot.slane %v5409_v42, 7  ;;  %v791_v46 = vadd.f32 %v789_v8, %v767_v28  ;;  %v7596_v10 = vrot.slane %v7595_v6, %v5159_v17 }
 0x1a0   : > { %v7597_v55 = vrot.slane %v7595_v6, %v5161_v38  ;;  %vm988_vm13 = vcmp.lt.s32.totalorder %v5153_v48, 15  ;;  %v869_v42 = vsel %vm7314_vm14, %v7599_v41, %v7598_v50  ;;  %v870_v3 = vsel %vm7314_vm14, %v7598_v50, %v7599_v41 }
 0x1a1   : > { %v836_v44 = vmul.f32 %v7596_v10, %v822_v18  ;;  %v1174_v8 = vsel %vm7316_vm0, %v1173_v16, %v5449_v24  ;;  %v1177_v18 = vrot.slane %v5469_v43, 5  ;;  %v7600_v2 = vrot.slane %v5243_v57, %v5159_v17  ;;  %v7603_v24 = vld [vmem:[#allocation66_spill] sm:$0xff]  ;;  %2045 = vrot.lane.b32.xlu1 %v5169_v37, %s4023_s4 }
 0x1a2   : > { %v837_v62 = vmul.f32 %v7597_v55, %v821_v59  ;;  %v814_v55 = vadd.f32 %v812_v0, %v790_v61  ;;  %v815_v59 = vadd.f32 %v813_v27, %v791_v46  ;;  %v7601_v11 = vrot.slane %v5243_v57, %v5161_v38  ;;  %v5695_v27 = vpop.permute.xlu1 %1327  ;;  %v7604_v46 = vld [vmem:[#allocation82_spill] sm:$0xff]  ;;  %2043 = vrot.lane.b32.xlu0 %v5181_v13, %s4023_s4  ;;  %s7657_s4 = smov 1  }
 0x1a3   : > { %v860_v28 = vmul.f32 %v7600_v2, %v846_v29  ;;  %vm1012_vm14 = vcmp.lt.s32.totalorder %v5153_v48, 14  ;;  %v893_v43 = vsel %vm7315_vm15, %v7603_v24, %v7602_v15  ;;  %v894_v16 = vsel %vm7315_vm15, %v7602_v15, %v7603_v24 }
 0x1a4   : > { %v861_v6 = vmul.f32 %v7601_v11, %v845_v53  ;;  %v1188_v0 = vsel %vm7316_vm0, %v1187_v52, %v5465_v4  ;;  %v1189_v57 = vrot.slane %v5453_v40, 6  ;;  %v5697_v53 = vpop.permute.xlu0 %1325  ;;  %v838_v29 = vadd.f32 %v836_v44, %v814_v55  ;;  %v7607_v11 = vld [vmem:[#allocation67_spill] sm:$0xff]  ;;  %v7608_v4 = vld [vmem:[#allocation68_spill] sm:$0xff] }
 0x1a5   : > { %v839_v61 = vadd.f32 %v837_v62, %v815_v59  ;;  %v7605_v10 = vrot.slane %v7604_v46, %v5159_v17  ;;  %v7606_v41 = vrot.slane %v7604_v46, %v5161_v38  ;;  %vm1036_vm15 = vcmp.lt.s32.totalorder %v5153_v48, 13  ;;  %v7609_v55 = vld [vmem:[#allocation83_spill] sm:$0xff]  ;;  %2068 = vrot.lane.b32.xlu1 %v5169_v37, %s4024_s26 }
 0x1a6   : > { %v917_v40 = vsel %vm7317_vm10, %v7608_v4, %v7607_v11  ;;  %v918_v52 = vsel %vm7317_vm10, %v7607_v11, %v7608_v4  ;;  %v1176_v44 = vsel %vm7318_vm1, %v1175_v60, %v1174_v8  ;;  %v1179_v62 = vrot.slane %v5516_v58, 4  ;;  %v7613_v58 = vld [vmem:[#allocation70_spill] sm:$0xff]  ;;  %2066 = vrot.lane.b32.xlu0 %v5181_v13, %s4024_s26  ;;  %s7658_s26 = smov 127  }
 0x1a7   : > { %v884_v50 = vmul.f32 %v7605_v10, %v870_v3  ;;  %v885_v2 = vmul.f32 %v7606_v41, %v869_v42  ;;  %v862_v42 = vadd.f32 %v860_v28, %v838_v29  ;;  %v863_v3 = vadd.f32 %v861_v6, %v839_v61  ;;  %v7614_v61 = vld [vmem:[#allocation84_spill] sm:$0xff] }
 0x1a8   : > { %v7610_v59 = vrot.slane %v7609_v55, %v5159_v17  ;;  %v7611_v24 = vrot.slane %v7609_v55, %v5161_v38  ;;  %vm7325_vm0 = vcmp.lt.s32.totalorder %v5153_v48, 3  ;;  %v941_v60 = vsel %vm940_vm11, %v7613_v58, %v7612_v32  ;;  %v5748_v55 = vpop.permute.xlu0 %1349 }
 0x1a9   : > { %v942_v8 = vsel %vm940_vm11, %v7612_v32, %v7613_v58  ;;  %v1190_v28 = vsel %vm7318_vm1, %v1189_v57, %v1188_v0  ;;  %v1191_v6 = vrot.slane %v5492_v12, 5  ;;  %v887_v29 = vadd.f32 %v885_v2, %v863_v3  ;;  %v7618_v0 = vld [vmem:[#allocation72_spill] sm:$0xff]  ;;  %2091 = vrot.lane.b32.xlu1 %v5169_v37, %s7629_s9 }
 0x1aa   : > { %v908_v15 = vmul.f32 %v7610_v59, %v894_v16  ;;  %v909_v46 = vmul.f32 %v7611_v24, %v893_v43  ;;  %v5739_v43 = vpop.permute.xlu1 %1351  ;;  %v886_v16 = vadd.f32 %v884_v50, %v862_v42  ;;  %v7615_v10 = vrot.slane %v7614_v61, %v5159_v17  ;;  %v7617_v59 = vld [vmem:[#allocation71_spill] sm:$0xff]  ;;  %2089 = vrot.lane.b32.xlu0 %v5181_v13, %s7629_s9  ;;  %s7659_s9 = smov 126  }
 0x1ab   : > { %v7616_v11 = vrot.slane %v7614_v61, %v5161_v38  ;;  %vm7322_vm10 = vcmp.lt.s32.totalorder %v5153_v48, 2  ;;  %v965_v12 = vsel %vm964_vm12, %v7618_v0, %v7617_v59  ;;  %v966_v57 = vsel %vm964_vm12, %v7617_v59, %v7618_v0  ;;  %v7619_v42 = vld [vmem:[#allocation87_spill] sm:$0xff]  ;;  %v7624_v61 = vld [vmem:[#allocation88_spill] sm:$0xff] }
 0x1ac   : > { %v932_v41 = vmul.f32 %v7615_v10, %v918_v52  ;;  %v1178_v50 = vsel %vm532_vm2, %v1177_v18, %v1176_v44  ;;  %v1181_v2 = vrot.slane %v5543_v35, 3  ;;  %v911_v52 = vadd.f32 %v909_v46, %v887_v29  ;;  %v7622_v18 = vld [vmem:[#allocation73_spill] sm:$0xff]  ;;  %v7623_v35 = vld [vmem:[#allocation74_spill] sm:$0xff] }
 0x1ad   : > { %v933_v4 = vmul.f32 %v7616_v11, %v917_v40  ;;  %v910_v40 = vadd.f32 %v908_v15, %v886_v16  ;;  %v7620_v3 = vrot.slane %v7619_v42, %v5159_v17  ;;  %v7621_v32 = vrot.slane %v7619_v42, %v5161_v38  ;;  %v5789_v42 = vpop.permute.xlu0 %1373  ;;  %2114 = vrot.lane.b32.xlu1 %v5169_v37, %s7640_s24 }
 0x1ae   : > { %vm7321_vm1 = vcmp.lt.s32.totalorder %v5153_v48, 1  ;;  %v989_v44 = vsel %vm988_vm13, %v7623_v35, %v7622_v18  ;;  %v990_v15 = vsel %vm988_vm13, %v7622_v18, %v7623_v35  ;;  %v1192_v46 = vsel %vm532_vm2, %v1191_v6, %v1190_v28  ;;  %2112 = vrot.lane.b32.xlu0 %v5181_v13, %s7640_s24  ;;  %s7661_s24 = smov 114  }
 0x1af   : > { %v956_v24 = vmul.f32 %v7620_v3, %v942_v8  ;;  %v957_v58 = vmul.f32 %v7621_v32, %v941_v60  ;;  %v1193_v8 = vrot.slane %v5520_v36, 4  ;;  %v5781_v60 = vpop.permute.xlu1 %1375  ;;  %v934_v16 = vadd.f32 %v932_v41, %v910_v40  ;;  %v7627_v3 = vld [vmem:[#allocation75_spill] sm:$0xff]  ;;  %v7628_v32 = vld [vmem:[#allocation76_spill] sm:$0xff] }
 0x1b0   : > { %v935_v29 = vadd.f32 %v933_v4, %v911_v52  ;;  %v7625_v10 = vrot.slane %v7624_v61, %v5159_v17  ;;  %v7626_v59 = vrot.slane %v7624_v61, %v5161_v38  ;;  %v1013_v28 = vsel %vm1012_vm14, %v7628_v32, %v7627_v3  ;;  %v7633_v61 = vld [vmem:[#allocation78_spill] sm:$0xff] }
 0x1b1   : > { %v1014_v36 = vsel %vm1012_vm14, %v7627_v3, %v7628_v32  ;;  %v1180_v6 = vsel %vm7324_vm3, %v1179_v62, %v1178_v50  ;;  %v1183_v41 = vrot.slane %v5573_v39, 2  ;;  %v958_v4 = vadd.f32 %v956_v24, %v934_v16  ;;  %v7634_v62 = vld [vmem:[#allocation79_spill] sm:$0xff]  ;;  %2137 = vrot.lane.b32.xlu1 %v5169_v37, %s7647_s22 }
 0x1b2   : > { %v980_v11 = vmul.f32 %v7625_v10, %v966_v57  ;;  %v981_v0 = vmul.f32 %v7626_v59, %v965_v12  ;;  %v959_v12 = vadd.f32 %v957_v58, %v935_v29  ;;  %v7630_v57 = vld [vmem:[#allocation89_spill] sm:$0xff]  ;;  %v1037_v39 = vsel %vm1036_vm15, %v7634_v62, %v7633_v61  ;;  %v7635_v29 = vld [vmem:[#allocation90_spill] sm:$0xff]  ;;  %2135 = vrot.lane.b32.xlu0 %v5181_v13, %s7647_s22  ;;  %s7662_s22 = smov 113  }
 0x1b3   : > { %v7631_v40 = vrot.slane %v7630_v57, %v5159_v17  ;;  %v7632_v18 = vrot.slane %v7630_v57, %v5161_v38  ;;  %v1038_v50 = vsel %vm1036_vm15, %v7633_v61, %v7634_v62  ;;  %v1194_v24 = vsel %vm7324_vm3, %v1193_v8, %v1192_v46  ;;  %v5829_v57 = vpop.permute.xlu0 %1397  ;;  %v7643_v62 = vld [vmem:[#allocation91_spill] sm:$0xff] }
 0x1b4   : > { %v1195_v58 = vrot.slane %v5569_v14, 3  ;;  %v983_v16 = vadd.f32 %v981_v0, %v959_v12  ;;  %v7636_v10 = vrot.slane %v7635_v29, %v5159_v17  ;;  %v7637_v3 = vrot.slane %v7635_v29, %v5161_v38 }
 0x1b5   : > { %v1004_v52 = vmul.f32 %v7631_v40, %v990_v15  ;;  %v1005_v35 = vmul.f32 %v7632_v18, %v989_v44  ;;  %v5821_v15 = vpop.permute.xlu1 %1399  ;;  %v982_v44 = vadd.f32 %v980_v11, %v958_v4  ;;  %v7638_v40 = vld [vmem:[#allocation85_spill] sm:$0xff]  ;;  %v7639_v18 = vld [vmem:[#allocation86_spill] sm:$0xff]  ;;  %v1182_v8 = vsel %vm7319_vm4, %v1181_v2, %v1180_v6  ;;  %v7644_v2 = vld [vmem:[#allocation92_spill] sm:$0xff]  ;;  %2160 = vrot.lane.b32.xlu1 %v5169_v37, %s7649_s28 }
 0x1b6   : > { %v1028_v59 = vmul.f32 %v7636_v10, %v1014_v36  ;;  %v1029_v32 = vmul.f32 %v7637_v3, %v1013_v28  ;;  %v1061_v46 = vsel %vm7325_vm0, %v7639_v18, %v7638_v40  ;;  %v1062_v14 = vsel %vm7325_vm0, %v7638_v40, %v7639_v18  ;;  %v5869_v3 = vld [vmem:[#allocation6 + $0x31] ss:$8 sm:$0x3]  ;;  %v5891_v18 = vld [vmem:[#allocation6 + $0x32] ss:$8 sm:$0x3]  ;;  %2158 = vrot.lane.b32.xlu0 %v5181_v13, %s7649_s28 }
 0x1b7   : > { %v1185_v11 = vrot.slane %v5623_v22, 1  ;;  %v1006_v0 = vadd.f32 %v1004_v52, %v982_v44  ;;  %v1007_v28 = vadd.f32 %v1005_v35, %v983_v16  ;;  %v7641_v36 = vrot.slane %v5322_v56, %v5159_v17  ;;  %v5871_v40 = vpop.permute.xlu0 %1421  ;;  %s7663_s28 = smov 112  }
 0x1b8   : > { %v7642_v12 = vrot.slane %v5322_v56, %v5161_v38  ;;  %v1085_v22 = vsel %vm7322_vm10, %v7644_v2, %v7643_v62  ;;  %v1086_v6 = vsel %vm7322_vm10, %v7643_v62, %v7644_v2  ;;  %v1196_v52 = vsel %vm7319_vm4, %v1195_v58, %v1194_v24 }
 0x1b9   : > { %v1052_v4 = vmul.f32 %v7641_v36, %v1038_v50  ;;  %v1197_v35 = vrot.slane %v5619_v1, 2  ;;  %v5861_v50 = vpop.permute.xlu1 %1423  ;;  %v1030_v56 = vadd.f32 %v1028_v59, %v1006_v0  ;;  %v7645_v44 = vrot.slane %v5335_v33, %v5159_v17  ;;  %v5911_v36 = vld [vmem:[#allocation6 + $0x34] ss:$8 sm:$0x3]  ;;  %2183 = vrot.lane.b32.xlu1 %v5169_v37, %s7650_s29 }
 0x1ba   : > { %v1053_v61 = vmul.f32 %v7642_v12, %v1037_v39  ;;  %v1031_v39 = vadd.f32 %v1029_v32, %v1007_v28  ;;  %v7646_v29 = vrot.slane %v5335_v33, %v5161_v38  ;;  %v1184_v24 = vsel %vm7320_vm5, %v1183_v41, %v1182_v8  ;;  %v5909_v28 = vld [vmem:[#allocation6 + $0x33] ss:$8 sm:$0x3]  ;;  %2181 = vrot.lane.b32.xlu0 %v5181_v13, %s7650_s29  ;;  %s7664_s29 = smov 111  }
 0x1bb   : > { %v1076_v16 = vmul.f32 %v7645_v44, %v1062_v14  ;;  %v1199_v1 = vrot.slane %v5646_v47, 1  ;;  %v1109_v58 = vsel %vm7321_vm1, %v5382_v20, %v5380_v7  ;;  %v1110_v59 = vsel %vm7321_vm1, %v5380_v7, %v5382_v20 }
 0x1bc   : > { %v1077_v10 = vmul.f32 %v7646_v29, %v1061_v46  ;;  %v1054_v33 = vadd.f32 %v1052_v4, %v1030_v56  ;;  %v1055_v32 = vadd.f32 %v1053_v61, %v1031_v39  ;;  %v1100_v41 = vmul.f32 %v1093_v49, %v1086_v6  ;;  %v5913_v4 = vpop.permute.xlu0 %1445  ;;  %v5943_v29 = vld [vmem:[#allocation6 + $0x37] ss:$8 sm:$0x3] }
 0x1bd   : > { %v1101_v47 = vmul.f32 %v1097_v21, %v1085_v22  ;;  %v1198_v20 = vsel %vm7320_vm5, %v1197_v35, %v1196_v52  ;;  %vm7327_vm4 = vcmp.lt.s32.totalorder %v5153_v48, 127  ;;  %v1218_v7 = vrot.slane %v5869_v3, %v5159_v17  ;;  %v5901_v49 = vpop.permute.xlu1 %1447  ;;  %v5925_v22 = vld [vmem:[#allocation6 + $0x35] ss:$8 sm:$0x3]  ;;  %2206 = vrot.lane.b32.xlu1 %v5169_v37, %s7651_s30 }
 0x1be   : > { %v1222_v46 = vrot.slane %v5869_v3, %v5161_v38  ;;  %v1078_v14 = vadd.f32 %v1076_v16, %v1054_v33  ;;  %v1079_v23 = vadd.f32 %v1077_v10, %v1055_v32  ;;  %v1124_v21 = vmul.f32 %v1117_v63, %v1110_v59  ;;  %v5936_v35 = vld [vmem:[#allocation6 + $0x36] ss:$8 sm:$0x3]  ;;  %2204 = vrot.lane.b32.xlu0 %v5181_v13, %s7651_s30  ;;  %s7667_s30 = smov 110  }
 0x1bf   : > { %v7648_v8 = vrot.slane %v5557_v31, %v5161_v38  ;;  %v1186_v12 = vsel %vm7323_vm6, %v1185_v11, %v1184_v24  ;;  %vm7326_vm5 = vcmp.lt.s32.totalorder %v5153_v48, 126  ;;  %v1242_v61 = vrot.slane %v5891_v18, %v5159_v17 }
 0x1c0   : > { %v1246_v63 = vrot.slane %v5891_v18, %v5161_v38  ;;  %v1102_v31 = vadd.f32 %v1100_v41, %v1078_v14  ;;  %v1103_v62 = vadd.f32 %v1101_v47, %v1079_v23  ;;  %v1200_v2 = vsel %vm7323_vm6, %v1199_v1, %v1198_v20  ;;  %v5945_v10 = vpop.permute.xlu0 %1469 }
 0x1c1   : > { %v1125_v0 = vmul.f32 %v7648_v8, %v1109_v58  ;;  %vm7328_vm1 = vcmp.lt.s32.totalorder %v5153_v48, 125  ;;  %v1266_v11 = vrot.slane %v5909_v28, %v5159_v17  ;;  %v1270_v6 = vrot.slane %v5909_v28, %v5161_v38  ;;  %v5938_v56 = vpop.permute.xlu1 %1471  ;;  %v5985_v8 = vld [vmem:[#allocation6 + $0x41] ss:$8 sm:$0x3]  ;;  %2229 = vrot.lane.b32.xlu1 %v5169_v37, %s7652_s6 }
 0x1c2   : > { %vm7329_vm10 = vcmp.lt.s32.totalorder %v5153_v48, 115  ;;  %v1290_v52 = vrot.slane %v5911_v36, %v5159_v17  ;;  %v1126_v39 = vadd.f32 %v1124_v21, %v1102_v31  ;;  %v1294_v16 = vrot.slane %v5911_v36, %v5161_v38  ;;  %2227 = vrot.lane.b32.xlu0 %v5181_v13, %s7652_s6  ;;  %s7670_s6 = smov 109  }
 0x1c3   : > { %v1127_v44 = vadd.f32 %v1125_v0, %v1103_v62  ;;  %vm7330_vm6 = vcmp.lt.s32.totalorder %v5153_v48, 114  ;;  %v1210_v3 = vsel %vm7327_vm4, %v5438_v9, %v5436_v51  ;;  %v1211_v24 = vsel %vm7327_vm4, %v5436_v51, %v5438_v9  ;;  %v5967_v51 = vld [vmem:[#allocation6 + $0x40] ss:$8 sm:$0x3] }
 0x1c4   : > { %v1314_v1 = vrot.slane %v5925_v22, %v5159_v17  ;;  %v1318_v58 = vrot.slane %v5925_v22, %v5161_v38  ;;  %vm1329_vm3 = vcmp.lt.s32.totalorder %v5153_v48, 113  ;;  %v1338_v59 = vrot.slane %v5936_v35, %v5159_v17  ;;  %v5987_v0 = vpop.permute.xlu0 %1493 }
 0x1c5   : > { %v1342_v33 = vrot.slane %v5936_v35, %v5161_v38  ;;  %vm7331_vm0 = vcmp.lt.s32.totalorder %v5153_v48, 112  ;;  %v1234_v9 = vsel %vm7326_vm5, %v5497_v54, %v5495_v45  ;;  %v1235_v32 = vsel %vm7326_vm5, %v5495_v45, %v5497_v54  ;;  %v5983_v18 = vpop.permute.xlu1 %1495  ;;  %2252 = vrot.lane.b32.xlu1 %v5169_v37, %s7653_s7 }
 0x1c6   : > { %v1362_v41 = vrot.slane %v5943_v29, %v5159_v17  ;;  %v1366_v47 = vrot.slane %v5943_v29, %v5161_v38  ;;  %v1203_v20 = vadd.f32 %v1186_v12, %v1126_v39  ;;  %v1204_v14 = vadd.f32 %v1200_v2, %v1127_v44  ;;  %v6005_v12 = vld [vmem:[#allocation6 + $0x42] ss:$8 sm:$0x3]  ;;  %v6024_v44 = vld [vmem:[#allocation6 + $0x43] ss:$8 sm:$0x3]  ;;  %2250 = vrot.lane.b32.xlu0 %v5181_v13, %s7653_s7 }
 0x1c7   : > { %v1225_v23 = vmul.f32 %v1218_v7, %v1210_v3  ;;  %v1226_v21 = vmul.f32 %v1222_v46, %v1211_v24  ;;  %v1258_v45 = vsel %vm7328_vm1, %v5548_v26, %v5546_v19  ;;  %v1259_v54 = vsel %vm7328_vm1, %v5546_v19, %v5548_v26  ;;  %s7673_s7 = smov 99  }
 0x1c8   : > { %vm7332_vm5 = vcmp.lt.s32.totalorder %v5153_v48, 111  ;;  %v1386_v7 = vrot.slane %v5967_v51, %v5159_v17  ;;  %v1249_v46 = vmul.f32 %v1242_v61, %v1234_v9  ;;  %v1250_v28 = vmul.f32 %v1246_v63, %v1235_v32  ;;  %v6026_v3 = vpop.permute.xlu0 %1517 }
 0x1c9   : > { %v1390_v36 = vrot.slane %v5967_v51, %v5161_v38  ;;  %vm7333_vm4 = vcmp.lt.s32.totalorder %v5153_v48, 110  ;;  %v1282_v19 = vsel %vm7329_vm10, %v5600_v34, %v5598_v25  ;;  %v1283_v26 = vsel %vm7329_vm10, %v5598_v25, %v5600_v34  ;;  %v6021_v31 = vpop.permute.xlu1 %1519  ;;  %2275 = vrot.lane.b32.xlu1 %v5169_v37, %s7654_s8 }
 0x1ca   : > { %v1410_v61 = vrot.slane %v5985_v8, %v5159_v17  ;;  %v1414_v63 = vrot.slane %v5985_v8, %v5161_v38  ;;  %v1227_v62 = vadd.f32 %v1225_v23, %v1203_v20  ;;  %v1228_v2 = vadd.f32 %v1226_v21, %v1204_v14  ;;  %v6043_v14 = vld [vmem:[#allocation6 + $0x44] ss:$8 sm:$0x3]  ;;  %2273 = vrot.lane.b32.xlu0 %v5181_v13, %s7654_s8  ;;  %s7676_s8 = smov 98  }
 0x1cb   : > { %v1273_v22 = vmul.f32 %v1266_v11, %v1258_v45  ;;  %v1274_v39 = vmul.f32 %v1270_v6, %v1259_v54  ;;  %vm7334_vm1 = vcmp.lt.s32.totalorder %v5153_v48, 109  ;;  %v1306_v25 = vsel %vm7330_vm6, %v5651_v30, %v5649_v5 }
 0x1cc   : > { %v1307_v34 = vsel %vm7330_vm6, %v5649_v5, %v5651_v30  ;;  %v1434_v11 = vrot.slane %v6005_v12, %v5159_v17  ;;  %v1438_v6 = vrot.slane %v6005_v12, %v5161_v38  ;;  %v1251_v24 = vadd.f32 %v1249_v46, %v1227_v62 }
 0x1cd   : > { %v1252_v9 = vadd.f32 %v1250_v28, %v1228_v2  ;;  %v1297_v32 = vmul.f32 %v1290_v52, %v1282_v19  ;;  %v1298_v20 = vmul.f32 %v1294_v16, %v1283_v26  ;;  %vm7335_vm10 = vcmp.lt.s32.totalorder %v5153_v48, 99  ;;  %v6059_v23 = vpop.permute.xlu1 %1543  ;;  %v6062_v28 = vld [vmem:[#allocation6 + $0x45] ss:$8 sm:$0x3]  ;;  %v6064_v19 = vpop.permute.xlu0 %1541  ;;  %2298 = vrot.lane.b32.xlu1 %v5169_v37, %s7655_s21 }
 0x1ce   : > { %v1330_v5 = vsel %vm1329_vm3, %v5697_v53, %v5695_v27  ;;  %v1331_v30 = vsel %vm1329_vm3, %v5695_v27, %v5697_v53  ;;  %v1458_v52 = vrot.slane %v6024_v44, %v5159_v17  ;;  %v1462_v16 = vrot.slane %v6024_v44, %v5161_v38  ;;  %2296 = vrot.lane.b32.xlu0 %v5181_v13, %s7655_s21  ;;  %s7679_s21 = smov 97  }
 0x1cf   : > { %v1275_v21 = vadd.f32 %v1273_v22, %v1251_v24  ;;  %v1276_v45 = vadd.f32 %v1274_v39, %v1252_v9  ;;  %v1321_v54 = vmul.f32 %v1314_v1, %v1306_v25  ;;  %v1322_v46 = vmul.f32 %v1318_v58, %v1307_v34 }
 0x1d0   : > { %vm7336_vm6 = vcmp.lt.s32.totalorder %v5153_v48, 98  ;;  %v1354_v27 = vsel %vm7331_vm0, %v5748_v55, %v5739_v43  ;;  %v1355_v53 = vsel %vm7331_vm0, %v5739_v43, %v5748_v55  ;;  %v1482_v1 = vrot.slane %v6043_v14, %v5159_v17  ;;  %v6087_v43 = vld [vmem:[#allocation6 + $0x46] ss:$8 sm:$0x3] }
 0x1d1   : > { %v1486_v58 = vrot.slane %v6043_v14, %v5161_v38  ;;  %v1299_v26 = vadd.f32 %v1297_v32, %v1275_v21  ;;  %v1300_v62 = vadd.f32 %v1298_v20, %v1276_v45  ;;  %v1345_v2 = vmul.f32 %v1338_v59, %v1330_v5  ;;  %v6103_v39 = vpop.permute.xlu1 %1567  ;;  %2321 = vrot.lane.b32.xlu1 %v5169_v37, %s7656_s19 }
 0x1d2   : > { %v1346_v22 = vmul.f32 %v1342_v33, %v1331_v30  ;;  %vm1497_vm0 = vcmp.lt.s32.totalorder %v5153_v48, 97  ;;  %v1378_v55 = vsel %vm7332_vm5, %v5789_v42, %v5781_v60  ;;  %v1379_v59 = vsel %vm7332_vm5, %v5781_v60, %v5789_v42  ;;  %v6112_v60 = vld [vmem:[#allocation6 + $0x47] ss:$8 sm:$0x3]  ;;  %v6114_v42 = vpop.permute.xlu0 %1565  ;;  %2319 = vrot.lane.b32.xlu0 %v5181_v13, %s7656_s19  ;;  %s7682_s19 = smov 96  }
 0x1d3   : > { %v1506_v35 = vrot.slane %v6062_v28, %v5159_v17  ;;  %v1510_v33 = vrot.slane %v6062_v28, %v5161_v38  ;;  %v1323_v25 = vadd.f32 %v1321_v54, %v1299_v26  ;;  %v1324_v34 = vadd.f32 %v1322_v46, %v1300_v62 }
 0x1d4   : > { %v1369_v24 = vmul.f32 %v1362_v41, %v1354_v27  ;;  %v1370_v9 = vmul.f32 %v1366_v47, %v1355_v53  ;;  %vm7337_vm5 = vcmp.lt.s32.totalorder %v5153_v48, 96  ;;  %v1402_v32 = vsel %vm7333_vm4, %v5829_v57, %v5821_v15 }
 0x1d5   : > { %v1403_v41 = vsel %vm7333_vm4, %v5821_v15, %v5829_v57  ;;  %v1530_v29 = vrot.slane %v6087_v43, %v5159_v17  ;;  %v1534_v47 = vrot.slane %v6087_v43, %v5161_v38  ;;  %v1347_v20 = vadd.f32 %v1345_v2, %v1323_v25  ;;  %v6137_v15 = vld [vmem:[#allocation6 + $0x50] ss:$8 sm:$0x3]  ;;  %v6153_v45 = vpop.permute.xlu1 %1591  ;;  %2344 = vrot.lane.b32.xlu1 %v5169_v37, %s7657_s4 }
 0x1d6   : > { %v1348_v5 = vadd.f32 %v1346_v22, %v1324_v34  ;;  %v1393_v30 = vmul.f32 %v1386_v7, %v1378_v55  ;;  %v1394_v21 = vmul.f32 %v1390_v36, %v1379_v59  ;;  %vm7338_vm4 = vcmp.lt.s32.totalorder %v5153_v48, 95  ;;  %2342 = vrot.lane.b32.xlu0 %v5181_v13, %s7657_s4  ;;  %s7685_s4 = smov 95  }
 0x1d7   : > { %v1426_v57 = vsel %vm7334_vm1, %v5871_v40, %v5861_v50  ;;  %v1427_v7 = vsel %vm7334_vm1, %v5861_v50, %v5871_v40  ;;  %v1554_v51 = vrot.slane %v6112_v60, %v5159_v17  ;;  %v1558_v36 = vrot.slane %v6112_v60, %v5161_v38  ;;  %v6162_v50 = vld [vmem:[#allocation6 + $0x51] ss:$8 sm:$0x3]  ;;  %v6164_v40 = vpop.permute.xlu0 %1589 }
 0x1d8   : > { %v1371_v54 = vadd.f32 %v1369_v24, %v1347_v20  ;;  %v1372_v46 = vadd.f32 %v1370_v9, %v1348_v5  ;;  %v1417_v27 = vmul.f32 %v1410_v61, %v1402_v32  ;;  %v1418_v53 = vmul.f32 %v1414_v63, %v1403_v41  ;;  %v6205_v24 = vld [vmem:[#allocation6 + $0x52] ss:$8 sm:$0x3] }
 0x1d9   : > { %vm1569_vm1 = vcmp.lt.s32.totalorder %v5153_v48, 94  ;;  %v1450_v26 = vsel %vm7335_vm10, %v5913_v4, %v5901_v49  ;;  %v1451_v61 = vsel %vm7335_vm10, %v5901_v49, %v5913_v4  ;;  %v1578_v8 = vrot.slane %v6137_v15, %v5159_v17  ;;  %v1616_v12 = vpop.permute.xlu1 %1615  ;;  %2444 = vrot.lane.b32.xlu1 %v5169_v37, %s7658_s26 }
 0x1da   : > { %v1582_v63 = vrot.slane %v6137_v15, %v5161_v38  ;;  %v1395_v62 = vadd.f32 %v1393_v30, %v1371_v54  ;;  %v1396_v2 = vadd.f32 %v1394_v21, %v1372_v46  ;;  %v1441_v22 = vmul.f32 %v1434_v11, %v1426_v57  ;;  %2442 = vrot.lane.b32.xlu0 %v5181_v13, %s7658_s26  ;;  %s7688_s26 = smov 94  }
 0x1db   : > { %v1442_v55 = vmul.f32 %v1438_v6, %v1427_v7  ;;  %v1474_v49 = vsel %vm7336_vm6, %v5945_v10, %v5938_v56  ;;  %v1475_v4 = vsel %vm7336_vm6, %v5938_v56, %v5945_v10  ;;  %vm7339_vm10 = vcmp.lt.s32.totalorder %v5153_v48, 93  ;;  %v1614_v9 = vpop.permute.xlu0 %1613 }
 0x1dc   : > { %v1602_v11 = vrot.slane %v6162_v50, %v5159_v17  ;;  %v1419_v6 = vadd.f32 %v1417_v27, %v1395_v62  ;;  %v1420_v59 = vadd.f32 %v1418_v53, %v1396_v2  ;;  %v1465_v25 = vmul.f32 %v1458_v52, %v1450_v26  ;;  %v6288_v2 = vld [vmem:[#allocation6 + $0x55] ss:$8 sm:$0x3] }
 0x1dd   : > { %v1466_v34 = vmul.f32 %v1462_v16, %v1451_v61  ;;  %v1498_v56 = vsel %vm1497_vm0, %v5987_v0, %v5983_v18  ;;  %v1499_v10 = vsel %vm1497_vm0, %v5983_v18, %v5987_v0  ;;  %v1606_v52 = vrot.slane %v6162_v50, %v5161_v38  ;;  %v6228_v18 = vld [vmem:[#allocation6 + $0x53] ss:$8 sm:$0x3]  ;;  %2467 = vrot.lane.b32.xlu1 %v5169_v37, %s7659_s9 }
 0x1de   : > { %vm7340_vm6 = vcmp.lt.s32.totalorder %v5153_v48, 83  ;;  %v1443_v44 = vadd.f32 %v1441_v22, %v1419_v6  ;;  %v1444_v16 = vadd.f32 %v1442_v55, %v1420_v59  ;;  %v1489_v32 = vmul.f32 %v1482_v1, %v1474_v49  ;;  %2465 = vrot.lane.b32.xlu0 %v5181_v13, %s7659_s9  ;;  %s7693_s9 = smov 83  }
 0x1df   : > { %v1490_v41 = vmul.f32 %v1486_v58, %v1475_v4  ;;  %v1522_v0 = vsel %vm7337_vm5, %v6026_v3, %v6021_v31  ;;  %v1523_v20 = vsel %vm7337_vm5, %v6021_v31, %v6026_v3  ;;  %v1626_v1 = vrot.slane %v6205_v24, %v5159_v17  ;;  %v1640_v58 = vpop.permute.xlu1 %1639  ;;  %v1638_v7 = vpop.permute.xlu0 %1637 }
 0x1e0   : > { %v1630_v14 = vrot.slane %v6205_v24, %v5161_v38  ;;  %v1467_v5 = vadd.f32 %v1465_v25, %v1443_v44  ;;  %v1468_v30 = vadd.f32 %v1466_v34, %v1444_v16  ;;  %v1513_v21 = vmul.f32 %v1506_v35, %v1498_v56  ;;  %v1717_v34 = vld [vmem:[#allocation6 + $0x56] ss:$8 sm:$0x3] }
 0x1e1   : > { %v1514_v57 = vmul.f32 %v1510_v33, %v1499_v10  ;;  %v1546_v31 = vsel %vm7338_vm4, %v6064_v19, %v6059_v23  ;;  %v1547_v3 = vsel %vm7338_vm4, %v6059_v23, %v6064_v19  ;;  %vm1641_vm5 = vcmp.lt.s32.totalorder %v5153_v48, 82  ;;  %v6269_v23 = vld [vmem:[#allocation6 + $0x54] ss:$8 sm:$0x3]  ;;  %2490 = vrot.lane.b32.xlu1 %v5169_v37, %s4039_s11 }
 0x1e2   : > { %v1650_v35 = vrot.slane %v6228_v18, %v5159_v17  ;;  %v1491_v28 = vadd.f32 %v1489_v32, %v1467_v5  ;;  %v1492_v33 = vadd.f32 %v1490_v41, %v1468_v30  ;;  %v1537_v54 = vmul.f32 %v1530_v29, %v1522_v0  ;;  %2488 = vrot.lane.b32.xlu0 %v5181_v13, %s4039_s11  ;;  %s7660_s11 = smov 115  }
 0x1e3   : > { %v1538_v46 = vmul.f32 %v1534_v47, %v1523_v20  ;;  %v1570_v19 = vsel %vm1569_vm1, %v6114_v42, %v6103_v39  ;;  %v1571_v27 = vsel %vm1569_vm1, %v6103_v39, %v6114_v42  ;;  %v1654_v29 = vrot.slane %v6228_v18, %v5161_v38  ;;  %v1664_v43 = vpop.permute.xlu1 %1663  ;;  %v1662_v62 = vpop.permute.xlu0 %1661 }
 0x1e4   : > { %vm7341_vm4 = vcmp.lt.s32.totalorder %v5153_v48, 81  ;;  %v1515_v47 = vadd.f32 %v1513_v21, %v1491_v28  ;;  %v1516_v53 = vadd.f32 %v1514_v57, %v1492_v33  ;;  %v1561_v26 = vmul.f32 %v1554_v51, %v1546_v31 }
 0x1e5   : > { %v1562_v61 = vmul.f32 %v1558_v36, %v1547_v3  ;;  %v1594_v39 = vsel %vm7339_vm10, %v6164_v40, %v6153_v45  ;;  %v1595_v42 = vsel %vm7339_vm10, %v6153_v45, %v6164_v40  ;;  %v1674_v51 = vrot.slane %v6269_v23, %v5159_v17  ;;  %2513 = vrot.lane.b32.xlu1 %v5169_v37, %s7660_s11 }
 0x1e6   : > { %v1678_v60 = vrot.slane %v6269_v23, %v5161_v38  ;;  %v1539_v36 = vadd.f32 %v1537_v54, %v1515_v47  ;;  %v1540_v22 = vadd.f32 %v1538_v46, %v1516_v53  ;;  %v1585_v55 = vmul.f32 %v1578_v8, %v1570_v19  ;;  %2511 = vrot.lane.b32.xlu0 %v5181_v13, %s7660_s11  ;;  %s7699_s11 = smov 81  }
 0x1e7   : > { %v1586_v49 = vmul.f32 %v1582_v63, %v1571_v27  ;;  %v1618_v45 = vsel %vm7340_vm6, %v1614_v9, %v1616_v12  ;;  %v1619_v40 = vsel %vm7340_vm6, %v1616_v12, %v1614_v9  ;;  %v1688_v4 = vpop.permute.xlu1 %1687  ;;  %vm7342_vm10 = vcmp.lt.s32.totalorder %v5153_v48, 80  ;;  %v1686_v25 = vpop.permute.xlu0 %1685 }
 0x1e8   : > { %v1698_v6 = vrot.slane %v6288_v2, %v5159_v17  ;;  %v1563_v8 = vadd.f32 %v1561_v26, %v1539_v36  ;;  %v1564_v59 = vadd.f32 %v1562_v61, %v1540_v22  ;;  %v1609_v15 = vmul.f32 %v1602_v11, %v1594_v39 }
 0x1e9   : > { %v1610_v63 = vmul.f32 %v1606_v52, %v1595_v42  ;;  %v1642_v24 = vsel %vm1641_vm5, %v1638_v7, %v1640_v58  ;;  %v1643_v12 = vsel %vm1641_vm5, %v1640_v58, %v1638_v7  ;;  %v1702_v9 = vrot.slane %v6288_v2, %v5161_v38  ;;  %v1741_v52 = vld [vmem:[#allocation6 + $0x57] ss:$8 sm:$0x3]  ;;  %2536 = vrot.lane.b32.xlu1 %v5169_v37, %s7661_s24 }
 0x1ea   : > { %vm1713_vm6 = vcmp.lt.s32.totalorder %v5153_v48, 79  ;;  %v1587_v56 = vadd.f32 %v1585_v55, %v1563_v8  ;;  %v1588_v50 = vadd.f32 %v1586_v49, %v1564_v59  ;;  %v1633_v11 = vmul.f32 %v1626_v1, %v1618_v45  ;;  %2534 = vrot.lane.b32.xlu0 %v5181_v13, %s7661_s24  ;;  %s7700_s24 = smov 80  }
 0x1eb   : > { %v1634_v10 = vmul.f32 %v1630_v14, %v1619_v40  ;;  %v1666_v44 = vsel %vm7341_vm4, %v1662_v62, %v1664_v43  ;;  %v1667_v16 = vsel %vm7341_vm4, %v1664_v43, %v1662_v62  ;;  %v1712_v32 = vpop.permute.xlu1 %1711  ;;  %v1722_v41 = vrot.slane %v1717_v34, %v5159_v17  ;;  %v1710_v14 = vpop.permute.xlu0 %1709 }
 0x1ec   : > { %v1726_v18 = vrot.slane %v1717_v34, %v5161_v38  ;;  %v1611_v0 = vadd.f32 %v1609_v15, %v1587_v56  ;;  %v1612_v20 = vadd.f32 %v1610_v63, %v1588_v50  ;;  %v1657_v58 = vmul.f32 %v1650_v35, %v1642_v24  ;;  %v1765_v35 = vld [vmem:[#allocation6 + $0x60] ss:$8 sm:$0x3]  ;;  %v1843_v34 = vld [vmem:[#allocation6 + $0x62] ss:$8 sm:$0x3] }
 0x1ed   : > { %v1658_v1 = vmul.f32 %v1654_v29, %v1643_v12  ;;  %v1690_v5 = vsel %vm7342_vm10, %v1686_v25, %v1688_v4  ;;  %v1691_v30 = vsel %vm7342_vm10, %v1688_v4, %v1686_v25  ;;  %vm1737_vm4 = vcmp.lt.s32.totalorder %v5153_v48, 78  ;;  %2559 = vrot.lane.b32.xlu1 %v5169_v37, %s7662_s22 }
 0x1ee   : > { %v1746_v21 = vrot.slane %v1741_v52, %v5159_v17  ;;  %v1635_v57 = vadd.f32 %v1633_v11, %v1611_v0  ;;  %v1636_v7 = vadd.f32 %v1634_v10, %v1612_v20  ;;  %v1681_v31 = vmul.f32 %v1674_v51, %v1666_v44  ;;  %v1820_v51 = vld [vmem:[#allocation6 + $0x61] ss:$8 sm:$0x3]  ;;  %2557 = vrot.lane.b32.xlu0 %v5181_v13, %s7662_s22  ;;  %v1866_v0 = vld [vmem:[#allocation6 + $0x63] ss:$8 sm:$0x3] }
 0x1ef   : > { %v1682_v3 = vmul.f32 %v1678_v60, %v1667_v16  ;;  %v1714_v28 = vsel %vm1713_vm6, %v1710_v14, %v1712_v32  ;;  %v1715_v33 = vsel %vm1713_vm6, %v1712_v32, %v1710_v14  ;;  %v1736_v54 = vpop.permute.xlu1 %1735  ;;  %v1750_v46 = vrot.slane %v1741_v52, %v5161_v38  ;;  %v1734_v43 = vpop.permute.xlu0 %1733  ;;  %s7701_s22 = smov 79  }
 0x1f0   : > { %vm1761_vm10 = vcmp.lt.s32.totalorder %v5153_v48, 77  ;;  %v1659_v23 = vadd.f32 %v1657_v58, %v1635_v57  ;;  %v1660_v19 = vadd.f32 %v1658_v1, %v1636_v7  ;;  %v1705_v27 = vmul.f32 %v1698_v6, %v1690_v5 }
 0x1f1   : > { %v1706_v29 = vmul.f32 %v1702_v9, %v1691_v30  ;;  %v1738_v47 = vsel %vm1737_vm4, %v1734_v43, %v1736_v54  ;;  %v1739_v53 = vsel %vm1737_vm4, %v1736_v54, %v1734_v43  ;;  %v1770_v26 = vrot.slane %v1765_v35, %v5159_v17  ;;  %2582 = vrot.lane.b32.xlu1 %v5169_v37, %s7663_s28 }
 0x1f2   : > { %v1774_v61 = vrot.slane %v1765_v35, %v5161_v38  ;;  %v1683_v62 = vadd.f32 %v1681_v31, %v1659_v23  ;;  %v1684_v2 = vadd.f32 %v1682_v3, %v1660_v19  ;;  %v1729_v39 = vmul.f32 %v1722_v41, %v1714_v28  ;;  %2580 = vrot.lane.b32.xlu0 %v5181_v13, %s7663_s28  ;;  %v1889_v3 = vld [vmem:[#allocation6 + $0x64] ss:$8 sm:$0x3] }
 0x1f3   : > { %v1730_v42 = vmul.f32 %v1726_v18, %v1715_v33  ;;  %v1760_v60 = vpop.permute.xlu1 %1759  ;;  %v1753_v55 = vmul.f32 %v1746_v21, %v1738_v47  ;;  %v1754_v49 = vmul.f32 %v1750_v46, %v1739_v53  ;;  %v1758_v45 = vpop.permute.xlu0 %1757  ;;  %v1825_v6 = vrot.slane %v1820_v51, %v5159_v17  ;;  %v1912_v47 = vld [vmem:[#allocation6 + $0x65] ss:$8 sm:$0x3] }
 0x1f4   : > { %v1707_v36 = vadd.f32 %v1705_v27, %v1683_v62  ;;  %v1708_v22 = vadd.f32 %v1706_v29, %v1684_v2  ;;  %v1762_v40 = vsel %vm1761_vm10, %v1758_v45, %v1760_v60  ;;  %v1763_v4 = vsel %vm1761_vm10, %v1760_v60, %v1758_v45 }
 0x1f5   : > { %v1829_v8 = vrot.slane %v1820_v51, %v5161_v38  ;;  %v1777_v63 = vmul.f32 %v1770_v26, %v1762_v40  ;;  %v1778_v25 = vmul.f32 %v1774_v61, %v1763_v4  ;;  %v1848_v10 = vrot.slane %v1843_v34, %v5159_v17  ;;  %2605 = vrot.lane.b32.xlu1 %v5169_v37, %s7664_s29 }
 0x1f6   : > { %v1731_v59 = vadd.f32 %v1729_v39, %v1707_v36  ;;  %v1732_v15 = vadd.f32 %v1730_v42, %v1708_v22  ;;  %v1852_v52 = vrot.slane %v1843_v34, %v5161_v38  ;;  %v1871_v57 = vrot.slane %v1866_v0, %v5159_v17  ;;  %2603 = vrot.lane.b32.xlu0 %v5181_v13, %s7664_s29  ;;  %v1935_v22 = vld [vmem:[#allocation6 + $0x66] ss:$8 sm:$0x3] }
 0x1f7   : > { %v1816_v24 = vpop.permute.xlu1 %1815  ;;  %v1814_v56 = vpop.permute.xlu0 %1813  ;;  %v1875_v7 = vrot.slane %v1866_v0, %v5161_v38  ;;  %v1894_v27 = vrot.slane %v1889_v3, %v5159_v17  ;;  %v1898_v29 = vrot.slane %v1889_v3, %v5161_v38  ;;  %v1917_v51 = vrot.slane %v1912_v47, %v5159_v17 }
 0x1f8   : > { %v1755_v12 = vadd.f32 %v1753_v55, %v1731_v59  ;;  %v1756_v9 = vadd.f32 %v1754_v49, %v1732_v15  ;;  %v1817_v50 = vsel %vm557_vm7, %v1814_v56, %v1816_v24  ;;  %v1818_v11 = vsel %vm557_vm7, %v1816_v24, %v1814_v56 }
 0x1f9   : > { %v1832_v32 = vmul.f32 %v1825_v6, %v1818_v11  ;;  %v1833_v41 = vmul.f32 %v1829_v8, %v1817_v50  ;;  %vm7665_vm7 = vcmp.lt.s32.totalorder %v5153_v48, 48  ;;  %2628 = vrot.lane.b32.xlu1 %v5169_v37, %s7667_s30  ;;  %v1921_v60 = vrot.slane %v1912_v47, %v5161_v38 }
 0x1fa   : > { %v1779_v44 = vadd.f32 %v1777_v63, %v1755_v12  ;;  %v1780_v16 = vadd.f32 %v1778_v25, %v1756_v9  ;;  %2626 = vrot.lane.b32.xlu0 %v5181_v13, %s7667_s30  ;;  %v1940_v59 = vrot.slane %v1935_v22, %v5159_v17  ;;  %v1944_v15 = vrot.slane %v1935_v22, %v5161_v38  ;;  %v1958_v25 = vld [vmem:[#allocation6 + $0x67] ss:$8 sm:$0x3] }
 0x1fb   : > { %v1839_v18 = vpop.permute.xlu1 %1838  ;;  %v1837_v1 = vpop.permute.xlu0 %1836 }
 0x1fc   : > { %v1834_v20 = vadd.f32 %v1832_v32, %v1779_v44  ;;  %v1835_v58 = vadd.f32 %v1833_v41, %v1780_v16  ;;  %v1840_v14 = vsel %vm580_vm8, %v1837_v1, %v1839_v18  ;;  %v1841_v5 = vsel %vm580_vm8, %v1839_v18, %v1837_v1  ;;  %vm7666_vm8 = vmmov %vm7665_vm7  ;;  %v1981_v16 = vld [vmem:[#allocation6 + $0x70] ss:$8 sm:$0x3] }
 0x1fd   : > { %v1855_v30 = vmul.f32 %v1848_v10, %v1841_v5  ;;  %v1856_v21 = vmul.f32 %v1852_v52, %v1840_v14  ;;  %2651 = vrot.lane.b32.xlu1 %v5169_v37, %s7670_s6  ;;  %v1963_v10 = vrot.slane %v1958_v25, %v5159_v17  ;;  %v1967_v52 = vrot.slane %v1958_v25, %v5161_v38 }
 0x1fe   : > { %2649 = vrot.lane.b32.xlu0 %v5181_v13, %s7670_s6  ;;  %v1986_v14 = vrot.slane %v1981_v16, %v5159_v17  ;;  %v1990_v5 = vrot.slane %v1981_v16, %v5161_v38  ;;  %s3012_s6 = scalar_lea.sflag [#allocation5], %s4230_s23 }
 0x1ff   : > { %v1862_v31 = vpop.permute.xlu1 %1861  ;;  %v1857_v35 = vadd.f32 %v1855_v30, %v1834_v20  ;;  %v1858_v28 = vadd.f32 %v1856_v21, %v1835_v58  ;;  %v1860_v33 = vpop.permute.xlu0 %1859  ;;  %v2004_v21 = vld [vmem:[#allocation6 + $0x71] ss:$8 sm:$0x3] }
 0x200   : > { %v1863_v54 = vsel %vm604_vm9, %v1860_v33, %v1862_v31  ;;  %v1864_v46 = vsel %vm604_vm9, %v1862_v31, %v1860_v33  ;;  %vm7668_vm9 = vcmp.lt.s32.totalorder %v5153_v48, 47 }
 0x201   : > { %v1878_v23 = vmul.f32 %v1871_v57, %v1864_v46  ;;  %v1879_v19 = vmul.f32 %v1875_v7, %v1863_v54  ;;  %2674 = vrot.lane.b32.xlu1 %v5169_v37, %s7673_s7  ;;  %v2009_v54 = vrot.slane %v2004_v21, %v5159_v17  ;;  %v2013_v46 = vrot.slane %v2004_v21, %v5161_v38 }
 0x202   : > { %2672 = vrot.lane.b32.xlu0 %v5181_v13, %s7673_s7 }
 0x203   : > { %v1885_v43 = vpop.permute.xlu1 %1884  ;;  %v1880_v53 = vadd.f32 %v1878_v23, %v1857_v35  ;;  %v1881_v26 = vadd.f32 %v1879_v19, %v1858_v28  ;;  %v1883_v61 = vpop.permute.xlu0 %1882  ;;  %v2027_v19 = vld [vmem:[#allocation6 + $0x72] ss:$8 sm:$0x3] }
 0x204   : > { %v1886_v62 = vsel %vm7665_vm7, %v1883_v61, %v1885_v43  ;;  %v1887_v2 = vsel %vm7666_vm8, %v1885_v43, %v1883_v61  ;;  %vm7669_vm7 = vmmov %vm7668_vm9  ;;  %vm7671_vm8 = vcmp.lt.s32.totalorder %v5153_v48, 46 }
 0x205   : > { %v1901_v39 = vmul.f32 %v1894_v27, %v1887_v2  ;;  %v1902_v42 = vmul.f32 %v1898_v29, %v1886_v62  ;;  %2697 = vrot.lane.b32.xlu1 %v5169_v37, %s7676_s8  ;;  %v2032_v62 = vrot.slane %v2027_v19, %v5159_v17  ;;  %v2036_v2 = vrot.slane %v2027_v19, %v5161_v38 }
 0x206   : > { %2695 = vrot.lane.b32.xlu0 %v5181_v13, %s7676_s8 }
 0x207   : > { %v1908_v36 = vpop.permute.xlu1 %1907  ;;  %v1903_v55 = vadd.f32 %v1901_v39, %v1880_v53  ;;  %v1904_v49 = vadd.f32 %v1902_v42, %v1881_v26  ;;  %v1906_v45 = vpop.permute.xlu0 %1905  ;;  %v2050_v42 = vld [vmem:[#allocation6 + $0x73] ss:$8 sm:$0x3] }
 0x208   : > { %v1909_v40 = vsel %vm7668_vm9, %v1906_v45, %v1908_v36  ;;  %v1910_v4 = vsel %vm7669_vm7, %v1908_v36, %v1906_v45  ;;  %vm7672_vm9 = vmmov %vm7671_vm8  ;;  %vm7674_vm7 = vcmp.lt.s32.totalorder %v5153_v48, 45 }
 0x209   : > { %v1924_v6 = vmul.f32 %v1917_v51, %v1910_v4  ;;  %v1925_v8 = vmul.f32 %v1921_v60, %v1909_v40  ;;  %2720 = vrot.lane.b32.xlu1 %v5169_v37, %s7679_s21  ;;  %v2055_v40 = vrot.slane %v2050_v42, %v5159_v17  ;;  %v2059_v4 = vrot.slane %v2050_v42, %v5161_v38 }
 0x20a   : > { %2718 = vrot.lane.b32.xlu0 %v5181_v13, %s7679_s21 }
 0x20b   : > { %v1931_v63 = vpop.permute.xlu1 %1930  ;;  %v1926_v34 = vadd.f32 %v1924_v6, %v1903_v55  ;;  %v1927_v24 = vadd.f32 %v1925_v8, %v1904_v49  ;;  %v1929_v12 = vpop.permute.xlu0 %1928  ;;  %v2073_v8 = vld [vmem:[#allocation6 + $0x74] ss:$8 sm:$0x3] }
 0x20c   : > { %v1932_v9 = vsel %vm7671_vm8, %v1929_v12, %v1931_v63  ;;  %v1933_v56 = vsel %vm7672_vm9, %v1931_v63, %v1929_v12  ;;  %vm7675_vm8 = vmmov %vm7674_vm7  ;;  %vm7677_vm9 = vcmp.lt.s32.totalorder %v5153_v48, 35 }
 0x20d   : > { %v1947_v50 = vmul.f32 %v1940_v59, %v1933_v56  ;;  %v1948_v11 = vmul.f32 %v1944_v15, %v1932_v9  ;;  %2743 = vrot.lane.b32.xlu1 %v5169_v37, %s7682_s19  ;;  %v2078_v9 = vrot.slane %v2073_v8, %v5159_v17  ;;  %v2082_v56 = vrot.slane %v2073_v8, %v5161_v38 }
 0x20e   : > { %2741 = vrot.lane.b32.xlu0 %v5181_v13, %s7682_s19 }
 0x20f   : > { %v1954_v44 = vpop.permute.xlu1 %1953  ;;  %v1949_v32 = vadd.f32 %v1947_v50, %v1926_v34  ;;  %v1950_v41 = vadd.f32 %v1948_v11, %v1927_v24  ;;  %v1952_v18 = vpop.permute.xlu0 %1951  ;;  %v2096_v11 = vld [vmem:[#allocation6 + $0x75] ss:$8 sm:$0x3] }
 0x210   : > { %v1955_v0 = vsel %vm7674_vm7, %v1952_v18, %v1954_v44  ;;  %v1956_v20 = vsel %vm7675_vm8, %v1954_v44, %v1952_v18  ;;  %vm7678_vm7 = vmmov %vm7677_vm9  ;;  %vm7680_vm8 = vcmp.lt.s32.totalorder %v5153_v48, 34 }
 0x211   : > { %v1970_v58 = vmul.f32 %v1963_v10, %v1956_v20  ;;  %v1971_v1 = vmul.f32 %v1967_v52, %v1955_v0  ;;  %2766 = vrot.lane.b32.xlu1 %v5169_v37, %s7685_s4  ;;  %v2101_v0 = vrot.slane %v2096_v11, %v5159_v17  ;;  %v2105_v20 = vrot.slane %v2096_v11, %v5161_v38 }
 0x212   : > { %2764 = vrot.lane.b32.xlu0 %v5181_v13, %s7685_s4 }
 0x213   : > { %v1977_v30 = vpop.permute.xlu1 %1976  ;;  %v1972_v57 = vadd.f32 %v1970_v58, %v1949_v32  ;;  %v1973_v7 = vadd.f32 %v1971_v1, %v1950_v41  ;;  %v1975_v31 = vpop.permute.xlu0 %1974  ;;  %v2119_v1 = vld [vmem:[#allocation6 + $0x76] ss:$8 sm:$0x3] }
 0x214   : > { %v1978_v3 = vsel %vm7677_vm9, %v1975_v31, %v1977_v30  ;;  %v1979_v35 = vsel %vm7678_vm7, %v1977_v30, %v1975_v31  ;;  %vm7681_vm9 = vmmov %vm7680_vm8  ;;  %vm7683_vm7 = vcmp.lt.s32.totalorder %v5153_v48, 33 }
 0x215   : > { %v1993_v28 = vmul.f32 %v1986_v14, %v1979_v35  ;;  %v1994_v33 = vmul.f32 %v1990_v5, %v1978_v3  ;;  %2789 = vrot.lane.b32.xlu1 %v5169_v37, %s7688_s26  ;;  %v2124_v3 = vrot.slane %v2119_v1, %v5159_v17  ;;  %v2128_v35 = vrot.slane %v2119_v1, %v5161_v38 }
 0x216   : > { %2787 = vrot.lane.b32.xlu0 %v5181_v13, %s7688_s26 }
 0x217   : > { %v2000_v23 = vpop.permute.xlu1 %1999  ;;  %v1995_v27 = vadd.f32 %v1993_v28, %v1972_v57  ;;  %v1996_v29 = vadd.f32 %v1994_v33, %v1973_v7  ;;  %v1998_v43 = vpop.permute.xlu0 %1997  ;;  %v2142_v33 = vld [vmem:[#allocation6 + $0x77] ss:$8 sm:$0x3] }
 0x218   : > { %v2001_v47 = vsel %vm7680_vm8, %v1998_v43, %v2000_v23  ;;  %v2002_v53 = vsel %vm7681_vm9, %v2000_v23, %v1998_v43  ;;  %vm7684_vm8 = vmmov %vm7683_vm7  ;;  %vm7686_vm9 = vcmp.lt.s32.totalorder %v5153_v48, 32 }
 0x219   : > { %v2016_v26 = vmul.f32 %v2009_v54, %v2002_v53  ;;  %v2017_v61 = vmul.f32 %v2013_v46, %v2001_v47  ;;  %2812 = vrot.lane.b32.xlu1 %v5169_v37, %s4053_s27  ;;  %v2147_v47 = vrot.slane %v2142_v33, %v5159_v17  ;;  %v2151_v53 = vrot.slane %v2142_v33, %v5161_v38 }
 0x21a   : > { %2810 = vrot.lane.b32.xlu0 %v5181_v13, %s4053_s27  ;;  %s7696_s27 = smov 82  }
 0x21b   : > { %v2023_v39 = vpop.permute.xlu1 %2022  ;;  %v2018_v51 = vadd.f32 %v2016_v26, %v1995_v27  ;;  %v2019_v60 = vadd.f32 %v2017_v61, %v1996_v29  ;;  %v2021_v36 = vpop.permute.xlu0 %2020 }
 0x21c   : > { %v2024_v22 = vsel %vm7683_vm7, %v2021_v36, %v2023_v39  ;;  %v2025_v55 = vsel %vm7684_vm8, %v2023_v39, %v2021_v36  ;;  %vm7687_vm7 = vmmov %vm7686_vm9  ;;  %vm7689_vm8 = vcmp.lt.s32.totalorder %v5153_v48, 31 }
 0x21d   : > { %v2039_v49 = vmul.f32 %v2032_v62, %v2025_v55  ;;  %v2040_v45 = vmul.f32 %v2036_v2, %v2024_v22  ;;  %2835 = vrot.lane.b32.xlu1 %v5169_v37, %s7693_s9 }
 0x21e   : > { %2833 = vrot.lane.b32.xlu0 %v5181_v13, %s7693_s9 }
 0x21f   : > { %v2046_v6 = vpop.permute.xlu1 %2045  ;;  %v2041_v59 = vadd.f32 %v2039_v49, %v2018_v51  ;;  %v2042_v15 = vadd.f32 %v2040_v45, %v2019_v60  ;;  %v2044_v63 = vpop.permute.xlu0 %2043 }
 0x220   : > { %v2047_v25 = vsel %vm7686_vm9, %v2044_v63, %v2046_v6  ;;  %v2048_v34 = vsel %vm7687_vm7, %v2046_v6, %v2044_v63  ;;  %vm7690_vm9 = vmmov %vm7689_vm8  ;;  %vm7691_vm7 = vcmp.lt.s32.totalorder %v5153_v48, 30 }
 0x221   : > { %v2062_v24 = vmul.f32 %v2055_v40, %v2048_v34  ;;  %v2063_v12 = vmul.f32 %v2059_v4, %v2047_v25  ;;  %2858 = vrot.lane.b32.xlu1 %v5169_v37, %s7696_s27 }
 0x222   : > { %2856 = vrot.lane.b32.xlu0 %v5181_v13, %s7696_s27 }
 0x223   : > { %v2069_v50 = vpop.permute.xlu1 %2068  ;;  %v2064_v10 = vadd.f32 %v2062_v24, %v2041_v59  ;;  %v2065_v52 = vadd.f32 %v2063_v12, %v2042_v15  ;;  %v2067_v44 = vpop.permute.xlu0 %2066 }
 0x224   : > { %v2070_v16 = vsel %vm7689_vm8, %v2067_v44, %v2069_v50  ;;  %v2071_v32 = vsel %vm7690_vm9, %v2069_v50, %v2067_v44  ;;  %vm7692_vm8 = vmmov %vm7691_vm7  ;;  %vm7694_vm9 = vcmp.lt.s32.totalorder %v5153_v48, 29  ;;  %v2366_v44 = vld [vmem:[#allocation6 + $0x91] ss:$8 sm:$0x3] }
 0x225   : > { %v2085_v41 = vmul.f32 %v2078_v9, %v2071_v32  ;;  %v2086_v18 = vmul.f32 %v2082_v56, %v2070_v16  ;;  %2881 = vrot.lane.b32.xlu1 %v5169_v37, %s7699_s11  ;;  %v6599_v1 = vrot.slane %v2366_v44, %v5161_v38 }
 0x226   : > { %2879 = vrot.lane.b32.xlu0 %v5181_v13, %s7699_s11 }
 0x227   : > { %v2092_v58 = vpop.permute.xlu1 %2091  ;;  %v2087_v14 = vadd.f32 %v2085_v41, %v2064_v10  ;;  %v2088_v5 = vadd.f32 %v2086_v18, %v2065_v52  ;;  %v2090_v30 = vpop.permute.xlu0 %2089  ;;  %v2165_v41 = vld [vmem:[#allocation6 + $0x80] ss:$8 sm:$0x3]  ;;  %v6591_v18 = vld [vmem:[#allocation6 + $0x81] ss:$8 sm:$0x3] }
 0x228   : > { %v2093_v21 = vsel %vm7691_vm7, %v2090_v30, %v2092_v58  ;;  %v2094_v57 = vsel %vm7692_vm8, %v2092_v58, %v2090_v30  ;;  %vm7695_vm7 = vmmov %vm7694_vm9  ;;  %vm7697_vm8 = vcmp.lt.s32.totalorder %v5153_v48, 19  ;;  %v6596_v58 = vld [vmem:[#allocation6 + $0x83] ss:$8 sm:$0x3]  ;;  %v2170_v30 = vrot.slane %v2165_v41, %v5159_v17 }
 0x229   : > { %v2108_v7 = vmul.f32 %v2101_v0, %v2094_v57  ;;  %v2109_v31 = vmul.f32 %v2105_v20, %v2093_v21  ;;  %2904 = vrot.lane.b32.xlu1 %v5169_v37, %s7700_s24  ;;  %v2371_v0 = vrot.slane %v2366_v44, %v5159_v17  ;;  %v6594_v20 = vld [vmem:[#allocation6 + $0x82] ss:$8 sm:$0x3]  ;;  %v2174_v21 = vrot.slane %v2165_v41, %v5161_v38 }
 0x22a   : > { %2902 = vrot.lane.b32.xlu0 %v5181_v13, %s7700_s24  ;;  %v2193_v57 = vrot.slane %v6591_v18, %v5159_v17  ;;  %v2220_v33 = vrot.slane %v6594_v20, %v5161_v38  ;;  %v7709_v44 = vld [vmem:[#allocation42_spill] sm:$0xff] }
 0x22b   : > { %v2115_v28 = vpop.permute.xlu1 %2114  ;;  %v2110_v54 = vadd.f32 %v2108_v7, %v2087_v14  ;;  %v2111_v46 = vadd.f32 %v2109_v31, %v2088_v5  ;;  %v2113_v23 = vpop.permute.xlu0 %2112  ;;  %v6601_v14 = vld [vmem:[#allocation6 + $0x84] ss:$8 sm:$0x3]  ;;  %v2197_v7 = vrot.slane %v6591_v18, %v5161_v38  ;;  %v6611_v31 = vld [vmem:[#allocation6 + $0x85] ss:$8 sm:$0x3]  ;;  %v2378_v41 = vmul.f32 %v2371_v0, %v7709_v44 }
 0x22c   : > { %v2116_v19 = vsel %vm7694_vm9, %v2113_v23, %v2115_v28  ;;  %v2117_v27 = vsel %vm7695_vm7, %v2115_v28, %v2113_v23  ;;  %vm7698_vm9 = vmmov %vm7697_vm8  ;;  %v2216_v28 = vrot.slane %v6594_v20, %v5159_v17  ;;  %v7706_v23 = vld [vmem:[#allocation44_spill] sm:$0xff]  ;;  %v7710_v18 = vld [vmem:[#allocation46_spill] sm:$0xff]  ;;  %vm7718_vm7 = vcmp.lt.s32.totalorder %v5153_v48, 18 }
 0x22d   : > { %v2131_v29 = vmul.f32 %v2124_v3, %v2117_v27  ;;  %v2132_v43 = vmul.f32 %v2128_v35, %v2116_v19  ;;  %2927 = vrot.lane.b32.xlu1 %v5169_v37, %s7701_s22  ;;  %v6613_v3 = vld [vmem:[#allocation6 + $0x86] ss:$8 sm:$0x3]  ;;  %v2380_v19 = vmul.f32 %v2371_v0, %v7706_v23  ;;  %v2382_v20 = vmul.f32 %v2371_v0, %v7710_v18 }
 0x22e   : > { %2925 = vrot.lane.b32.xlu0 %v5181_v13, %s7701_s22  ;;  %v7716_v27 = vld [vmem:[#allocation50_spill] sm:$0xff] }
 0x22f   : > { %v2138_v26 = vpop.permute.xlu1 %2137  ;;  %v2133_v61 = vadd.f32 %v2131_v29, %v2110_v54  ;;  %v2134_v62 = vadd.f32 %v2132_v43, %v2111_v46  ;;  %v2136_v2 = vpop.permute.xlu0 %2135  ;;  %v6623_v46 = vld [vmem:[#allocation6 + $0x87] ss:$8 sm:$0x3]  ;;  %v7715_v29 = vld [vmem:[#allocation49_spill] sm:$0xff]  ;;  %v2386_v54 = vmul.f32 %v2371_v0, %v7716_v27 }
 0x230   : > { %v2139_v39 = vsel %vm7697_vm8, %v2136_v2, %v2138_v26  ;;  %v2140_v42 = vsel %vm7698_vm9, %v2138_v26, %v2136_v2  ;;  %v7713_v2 = vld [vmem:[#allocation47_spill] sm:$0xff]  ;;  %v7714_v26 = vld [vmem:[#allocation48_spill] sm:$0xff]  ;;  %vm7719_vm8 = vmmov %vm7718_vm7  ;;  %vm7725_vm9 = vcmask 1041409  }
 0x231   : > { %v2154_v51 = vmul.f32 %v2147_v47, %v2140_v42  ;;  %v2155_v60 = vmul.f32 %v2151_v53, %v2139_v39  ;;  %2950 = vrot.lane.b32.xlu1 %v5169_v37, %s4059_s12  ;;  %v7707_v47 = vld [vmem:[#allocation45_spill] sm:$0xff]  ;;  %v2384_v43 = vmul.f32 %v2371_v0, %v7714_v26  ;;  %v2410_v42 = vrot.slane %v2380_v19, 7 }
 0x232   : > { %2948 = vrot.lane.b32.xlu0 %v5181_v13, %s4059_s12  ;;  %v2381_v53 = vmul.f32 %v6599_v1, %v7707_v47  ;;  %v7712_v47 = vld [vmem:[#allocation43_spill] sm:$0xff]  ;;  %s3026_s12 = sshll.u32 %s4247_s10, 4  ;;  %s7081_s12 = int_to_ptr.vmem [resolvable:$true] %s3026_s12 }
 0x233   : > { %v6523_v36 = vpop.permute.xlu1 %2160  ;;  %v6525_v22 = vadd.f32 %v2154_v51, %v2133_v61  ;;  %v6527_v55 = vadd.f32 %v2155_v60, %v2134_v62  ;;  %v6529_v49 = vpop.permute.xlu0 %2158  ;;  %v6648_v60 = vld [vmem:[#allocation6 + $0x90] ss:$8 sm:$0x3]  ;;  %v2379_v62 = vmul.f32 %v6599_v1, %v7712_v47  ;;  %v2383_v61 = vmul.f32 %v6599_v1, %v7713_v2  ;;  %s3673_s7 = scalar_lea.vmem %s7081_s12, 256 }
 0x234   : > { %v2385_v51 = vmul.f32 %v6599_v1, %v7715_v29  ;;  %v2424_v18 = vrot.slane %v2381_v53, 7  ;;  %v2162_v47 = vsel %vm7718_vm7, %v6529_v49, %v6523_v36  ;;  %v2163_v19 = vsel %vm7719_vm8, %v6523_v36, %v6529_v49  ;;  %v7721_v2 = vld [vmem:[#allocation52_spill] sm:$0xff]  ;;  %vm7727_vm7 = vmmov %vm7725_vm9  ;;  %p3674_p6 = scmp.ne.s32.totalorder %s7081_s12, %s3673_s7 }
 0x235   : > { %2973 = vrot.lane.b32.xlu1 %v5169_v37, %s4060_s5  ;;  %v6681_v53 = vmul.f32 %v2371_v0, %v7721_v2  ;;  %v2411_v27 = vsel %vm7725_vm9, %v2410_v42, %v2378_v41  ;;  %v2177_v29 = vmul.f32 %v2170_v30, %v2163_v19  ;;  %v2414_v30 = vrot.slane %v2384_v43, 5 }
 0x236   : > { %2971 = vrot.lane.b32.xlu0 %v5181_v13, %s4060_s5  ;;  %s3235_s5 = sshll.u32 %s4106_s2, 8  ;;  %p3675_p8 = pnand %p3674_p6, %p4179_p12 }
 0x237   : > { %v6535_v45 = vpop.permute.xlu1 %2183  ;;  %v6537_v40 = vpop.permute.xlu0 %2181  ;;  %s7079_s30 = scalar_lea.hbm %s7128_s3, %s3235_s5  ;;  %s4061_s2 = smov [#allocation8]  }
 0x238   : > { %v2185_v49 = vsel %vm940_vm11, %v6537_v40, %v6535_v45  ;;  %v2186_v2 = vsel %vm940_vm11, %v6535_v45, %v6537_v40  ;;  %v7728_v40 = vld [vmem:[#allocation56_spill] sm:$0xff]  ;;  %vm7730_vm11 = vcmask 1042434   ;;  %p3676_p10 = pneg %p3675_p8  ;;  %s3677_s8 = sshll.u32 %s4061_s2, 4  ;;  %s3678_s8 = int_to_ptr.vmem [resolvable:$false] %s3677_s8 }
 0x239   : > { %v2200_v42 = vmul.f32 %v2193_v57, %v2186_v2  ;;  %v2201_v41 = vmul.f32 %v2197_v7, %v2185_v49  ;;  %v2428_v57 = vrot.slane %v2385_v51, 5  ;;  %s3679_s21 = scalar_lea.vmem %s3678_s8, 512  ;;  %p3680_p13 = scmp.lt.s32.totalorder %s7081_s12, %s3678_s8 }
 0x23a   : > { %p3681_p3 = scmp.lt.s32.totalorder %s3679_s21, %s3673_s7 }
 0x23b   : > { %v6543_v4 = vpop.permute.xlu1 %2206  ;;  %v6545_v6 = vpop.permute.xlu0 %2204 }
 0x23c   : > { %v2209_v45 = vsel %vm964_vm12, %v6543_v4, %v6545_v6  ;;  %p3682_p7 = por %p3681_p3, %p3680_p13 }
 0x23e   : > { %p3683_p9 = pnand %p3682_p7, %p3676_p10 }
 0x23f   : > { %v6551_v8 = vpop.permute.xlu1 %2229  ;;  %v6553_v59 = vpop.permute.xlu0 %2227 }
 0x243   : > { %v6559_v15 = vpop.permute.xlu1 %2252  ;;  %v6561_v63 = vpop.permute.xlu0 %2250 }
 0x244   : > { %v2255_v49 = vsel %vm1012_vm14, %v6559_v15, %v6561_v63 }
 0x247   : > { %v6563_v25 = vpop.permute.xlu1 %2275  ;;  %v6565_v34 = vpop.permute.xlu0 %2273 }
 0x24b   : > { %v6567_v24 = vpop.permute.xlu1 %2298  ;;  %v6569_v12 = vpop.permute.xlu0 %2296 }
 0x24f   : > { %v6571_v9 = vpop.permute.xlu1 %2321  ;;  %v6573_v56 = vpop.permute.xlu0 %2319 }
 0x253   : > { %v6575_v37 = vpop.permute.xlu1 %2344  ;;  %v6577_v50 = vpop.permute.xlu0 %2342 }
 0x257   : > { %v6579_v13 = vpop.permute.xlu1 %2444  ;;  %v6581_v11 = vpop.permute.xlu0 %2442 }
 0x25b   : > { %v6583_v10 = vpop.permute.xlu1 %2467  ;;  %v6585_v52 = vpop.permute.xlu0 %2465 }
 0x25f   : > { %v6587_v16 = vpop.permute.xlu1 %2490  ;;  %v6589_v32 = vpop.permute.xlu0 %2488 }
 0x260   : > { %7702 = vst [vmem:[#allocation77_spill] sm:$0xff] %v6587_v16  ;;  %7703 = vst [vmem:[#allocation59_spill] sm:$0xff] %v6589_v32  ;;  %v2412_v32 = vrot.slane %v2382_v20, 6  ;;  %v2208_v16 = vsel %vm964_vm12, %v6545_v6, %v6543_v4  ;;  %v2231_v4 = vsel %vm988_vm13, %v6553_v59, %v6551_v8  ;;  %v2232_v6 = vsel %vm988_vm13, %v6551_v8, %v6553_v59 }
 0x261   : > { %vm7731_vm12 = vmmov %vm7730_vm11  ;;  %v2224_v43 = vmul.f32 %v2220_v33, %v2208_v16  ;;  %v2416_v59 = vrot.slane %v2386_v54, 4  ;;  %vm7736_vm13 = vcmp.lt.s32.totalorder %v5153_v48, 3 }
 0x263   : > { %v6603_v5 = vpop.permute.xlu1 %2513  ;;  %v6615_v35 = vpop.permute.xlu0 %2511 }
 0x264   : > { %7704 = vst [vmem:[#allocation60_spill] sm:$0xff] %v6603_v5  ;;  %7705 = vst [vmem:[#allocation41_spill] sm:$0xff] %v6615_v35  ;;  %v7723_v35 = vld [vmem:[#allocation54_spill] sm:$0xff] }
 0x265   : > { %v6688_v5 = vmul.f32 %v2371_v0, %v7723_v35  ;;  %v7726_v35 = vld [vmem:[#allocation55_spill] sm:$0xff] }
 0x266   : > { %v6703_v20 = vmul.f32 %v6599_v1, %v7726_v35 }
 0x267   : > { %v6642_v39 = vpop.permute.xlu1 %2536  ;;  %v6652_v23 = vpop.permute.xlu0 %2534 }
 0x268   : > { %7708 = vst [vmem:[#allocation40_spill] sm:$0xff] %v6642_v39  ;;  %7711 = vst [vmem:[#allocation80_spill] sm:$0xff] %v6652_v23  ;;  %v7717_v39 = vld [vmem:[#allocation51_spill] sm:$0xff] }
 0x269   : > { %v6664_v44 = vmul.f32 %v6599_v1, %v7717_v39  ;;  %v7722_v39 = vld [vmem:[#allocation53_spill] sm:$0xff] }
 0x26a   : > { %v6685_v23 = vmul.f32 %v6599_v1, %v7722_v39  ;;  %v2426_v39 = vrot.slane %v2383_v61, 6  ;;  %v6715_v61 = vmul.f32 %v2371_v0, %v7728_v40 }
 0x26b   : > { %v6678_v26 = vpop.permute.xlu1 %2559  ;;  %v6690_v36 = vpop.permute.xlu0 %2557 }
 0x26c   : > { %7720 = vst [vmem:[#allocation61_spill] sm:$0xff] %v6678_v26  ;;  %7724 = vst [vmem:[#allocation62_spill] sm:$0xff] %v6690_v36  ;;  %v2178_v26 = vmul.f32 %v2174_v21, %v2162_v47  ;;  %v2425_v36 = vsel %vm7727_vm7, %v2424_v18, %v2379_v62  ;;  %v7729_v47 = vld [vmem:[#allocation57_spill] sm:$0xff]  ;;  %v2413_v18 = vsel %vm7730_vm11, %v2412_v32, %v2411_v27  ;;  %vm7746_vm7 = vcmp.lt.s32.totalorder %v5153_v48, 1 }
 0x26d   : > { %v6721_v62 = vmul.f32 %v6599_v1, %v7729_v47  ;;  %v2427_v0 = vsel %vm7731_vm12, %v2426_v39, %v2425_v36  ;;  %v2179_v1 = vadd.f32 %v2177_v29, %v6525_v22  ;;  %v2223_v32 = vmul.f32 %v2216_v28, %v2209_v45  ;;  %vm7747_vm11 = vmmov %vm7746_vm7 }
 0x26e   : > { %v2180_v7 = vadd.f32 %v2178_v26, %v6527_v55  ;;  %v2254_v27 = vsel %vm1012_vm14, %v6561_v63, %v6559_v15  ;;  %v2415_v8 = vsel %vm532_vm2, %v2414_v30, %v2413_v18  ;;  %v7732_v55 = vrot.slane %v6596_v58, %v5159_v17 }
 0x26f   : > { %v6717_v21 = vpop.permute.xlu1 %2582  ;;  %v6724_v19 = vpop.permute.xlu0 %2580  ;;  %v2202_v22 = vadd.f32 %v2200_v42, %v2179_v1  ;;  %v7733_v28 = vrot.slane %v6596_v58, %v5161_v38  ;;  %v2277_v15 = vsel %vm1036_vm15, %v6565_v34, %v6563_v25  ;;  %v2278_v63 = vsel %vm1036_vm15, %v6563_v25, %v6565_v34 }
 0x270   : > { %v2203_v29 = vadd.f32 %v2201_v41, %v2180_v7  ;;  %v2246_v16 = vmul.f32 %v7732_v55, %v2232_v6  ;;  %v2429_v54 = vsel %vm532_vm2, %v2428_v57, %v2427_v0  ;;  %v2430_v36 = vrot.slane %v6664_v44, 4  ;;  %vm7737_vm2 = vmmov %vm7736_vm13 }
 0x271   : > { %v2247_v33 = vmul.f32 %v7733_v28, %v2231_v4  ;;  %v2225_v2 = vadd.f32 %v2223_v32, %v2202_v22  ;;  %v7734_v58 = vrot.slane %v6601_v14, %v5159_v17  ;;  %v7735_v45 = vrot.slane %v6601_v14, %v5161_v38 }
 0x272   : > { %v2226_v39 = vadd.f32 %v2224_v43, %v2203_v29  ;;  %v2300_v30 = vsel %vm7736_vm13, %v6569_v12, %v6567_v24  ;;  %v2301_v25 = vsel %vm7737_vm2, %v6567_v24, %v6569_v12  ;;  %vm7738_vm14 = vcmask 1044484  }
 0x273   : > { %v6746_v51 = vpop.permute.xlu1 %2605  ;;  %v6754_v26 = vpop.permute.xlu0 %2603  ;;  %v2269_v35 = vmul.f32 %v7734_v58, %v2255_v49  ;;  %v2270_v40 = vmul.f32 %v7735_v45, %v2254_v27  ;;  %v2417_v34 = vsel %vm7738_vm14, %v2416_v59, %v2415_v8  ;;  %v2418_v44 = vrot.slane %v6681_v53, 3  ;;  %vm7743_vm9 = vmmov %vm7738_vm14 }
 0x274   : > { %v2248_v41 = vadd.f32 %v2246_v16, %v2225_v2  ;;  %v2249_v47 = vadd.f32 %v2247_v33, %v2226_v39  ;;  %v7739_v14 = vrot.slane %v6611_v31, %v5159_v17  ;;  %v7740_v4 = vrot.slane %v6611_v31, %v5161_v38  ;;  %v2449_v2 = vld [vmem:[#allocation6 + $0x92] ss:$8 sm:$0x3] }
 0x275   : > { %vm7741_vm15 = vcmp.lt.s32.totalorder %v5153_v48, 2  ;;  %v2431_v53 = vsel %vm7743_vm9, %v2430_v36, %v2429_v54  ;;  %v2432_v57 = vrot.slane %v6685_v23, 3  ;;  %v7744_v31 = vrot.slane %v6613_v3, %v5159_v17 }
 0x276   : > { %v2292_v18 = vmul.f32 %v7739_v14, %v2278_v63  ;;  %v2293_v6 = vmul.f32 %v7740_v4, %v2277_v15  ;;  %v2323_v24 = vsel %vm7741_vm15, %v6573_v56, %v6571_v9  ;;  %vm7742_vm8 = vmmov %vm7741_vm15  ;;  %v2271_v1 = vadd.f32 %v2269_v35, %v2248_v41  ;;  %v2495_v41 = vld [vmem:[#allocation6 + $0x94] ss:$8 sm:$0x3] }
 0x277   : > { %v6782_v42 = vpop.permute.xlu1 %2628  ;;  %v6790_v0 = vpop.permute.xlu0 %2626  ;;  %v2324_v12 = vsel %vm7742_vm8, %v6571_v9, %v6573_v56  ;;  %v2272_v7 = vadd.f32 %v2270_v40, %v2249_v47  ;;  %v2315_v32 = vmul.f32 %v7744_v31, %v2301_v25  ;;  %v7745_v43 = vrot.slane %v6613_v3, %v5161_v38  ;;  %v2472_v25 = vld [vmem:[#allocation6 + $0x93] ss:$8 sm:$0x3] }
 0x278   : > { %v2346_v49 = vsel %vm7746_vm7, %v6577_v50, %v6575_v37  ;;  %v2347_v9 = vsel %vm7747_vm11, %v6575_v37, %v6577_v50  ;;  %v2420_v56 = vrot.slane %v6688_v5, 2  ;;  %v2434_v23 = vrot.slane %v6703_v20, 2 }
 0x279   : > { %v2316_v27 = vmul.f32 %v7745_v43, %v2300_v30  ;;  %v2294_v59 = vadd.f32 %v2292_v18, %v2271_v1  ;;  %v2295_v22 = vadd.f32 %v2293_v6, %v2272_v7  ;;  %v7748_v3 = vrot.slane %v6623_v46, %v5159_v17  ;;  %v2518_v1 = vld [vmem:[#allocation6 + $0x95] ss:$8 sm:$0x3] }
 0x27a   : > { %v7749_v55 = vrot.slane %v6623_v46, %v5161_v38  ;;  %vm7750_vm12 = vcmask 1045509   ;;  %v7752_v33 = vrot.slane %v6648_v60, %v5159_v17  ;;  %v7753_v63 = vrot.slane %v6648_v60, %v5161_v38 }
 0x27b   : > { %v6818_v8 = vpop.permute.xlu1 %2651  ;;  %v2338_v29 = vmul.f32 %v7748_v3, %v2324_v12  ;;  %v6826_v28 = vpop.permute.xlu0 %2649  ;;  %v2419_v37 = vsel %vm7750_vm12, %v2418_v44, %v2417_v34  ;;  %vm7751_vm13 = vmmov %vm7750_vm12  ;;  %v2317_v5 = vadd.f32 %v2315_v32, %v2294_v59  ;;  %v2318_v20 = vadd.f32 %v2316_v27, %v2295_v22  ;;  %v2541_v27 = vld [vmem:[#allocation6 + $0x96] ss:$8 sm:$0x3] }
 0x27c   : > { %v2339_v16 = vmul.f32 %v7749_v55, %v2323_v24  ;;  %v2433_v50 = vsel %vm7751_vm13, %v2432_v57, %v2431_v53  ;;  %v2361_v15 = vmul.f32 %v7752_v33, %v2347_v9  ;;  %v2362_v54 = vmul.f32 %v7753_v63, %v2346_v49  ;;  %v7762_v49 = vld [vmem:[#allocation77_spill] sm:$0xff]  ;;  %v7763_v9 = vld [vmem:[#allocation59_spill] sm:$0xff] }
 0x27d   : > { %v2422_v36 = vrot.slane %v6715_v61, 1  ;;  %v2436_v46 = vrot.slane %v6721_v62, 1  ;;  %v2340_v58 = vadd.f32 %v2338_v29, %v2317_v5  ;;  %vm7754_vm2 = vcmask 1046534   ;;  %v2564_v29 = vld [vmem:[#allocation6 + $0x97] ss:$8 sm:$0x3] }
 0x27e   : > { %v2341_v35 = vadd.f32 %v2339_v16, %v2318_v20  ;;  %v2421_v45 = vsel %vm7754_vm2, %v2420_v56, %v2419_v37  ;;  %vm7755_vm14 = vmmov %vm7754_vm2  ;;  %v2454_v60 = vrot.slane %v2449_v2, %v5159_v17  ;;  %v2458_v61 = vrot.slane %v2449_v2, %v5161_v38  ;;  %v7766_v16 = vld [vmem:[#allocation60_spill] sm:$0xff]  ;;  %v7767_v37 = vld [vmem:[#allocation41_spill] sm:$0xff] }
 0x27f   : > { %v6838_v39 = vpop.permute.xlu1 %2674  ;;  %v2435_v40 = vsel %vm7755_vm14, %v2434_v23, %v2433_v50  ;;  %v6842_v30 = vpop.permute.xlu0 %2672  ;;  %v2363_v34 = vadd.f32 %v2361_v15, %v2340_v58  ;;  %vm7756_vm15 = vcmask 1047559   ;;  %vm7758_vm9 = vcmp.lt.s32.totalorder %v5153_v48, 127  ;;  %v7770_v2 = vld [vmem:[#allocation40_spill] sm:$0xff] }
 0x280   : > { %v2364_v44 = vadd.f32 %v2362_v54, %v2341_v35  ;;  %v2423_v62 = vsel %vm7756_vm15, %v2422_v36, %v2421_v45  ;;  %vm7757_vm8 = vmmov %vm7756_vm15  ;;  %v2446_v14 = vsel %vm7758_vm9, %v6581_v11, %v6579_v13  ;;  %v2477_v6 = vrot.slane %v2472_v25, %v5159_v17  ;;  %v7771_v58 = vld [vmem:[#allocation80_spill] sm:$0xff] }
 0x281   : > { %v2437_v47 = vsel %vm7757_vm8, %v2436_v46, %v2435_v40  ;;  %vm7759_vm7 = vmmov %vm7758_vm9  ;;  %v2481_v24 = vrot.slane %v2472_v25, %v5161_v38  ;;  %vm7760_vm11 = vcmp.lt.s32.totalorder %v5153_v48, 126  ;;  %v2440_v7 = vadd.f32 %v2423_v62, %v2363_v34  ;;  %v2587_v46 = vld [vmem:[#allocation6 + $0xa0] ss:$8 sm:$0x3] }
 0x282   : > { %v2447_v18 = vsel %vm7759_vm7, %v6579_v13, %v6581_v11  ;;  %v2469_v53 = vsel %vm7760_vm11, %v6585_v52, %v6583_v10  ;;  %vm7761_vm12 = vmmov %vm7760_vm11  ;;  %v2500_v13 = vrot.slane %v2495_v41, %v5159_v17  ;;  %v2504_v11 = vrot.slane %v2495_v41, %v5161_v38  ;;  %v2610_v62 = vld [vmem:[#allocation6 + $0xa1] ss:$8 sm:$0x3] }
 0x283   : > { %v6856_v4 = vpop.permute.xlu1 %2697  ;;  %v6860_v12 = vpop.permute.xlu0 %2695  ;;  %v2470_v57 = vsel %vm7761_vm12, %v6583_v10, %v6585_v52  ;;  %v2441_v31 = vadd.f32 %v2437_v47, %v2364_v44  ;;  %v2461_v32 = vmul.f32 %v2454_v60, %v2446_v14  ;;  %v2462_v43 = vmul.f32 %v2458_v61, %v2447_v18  ;;  %v7774_v14 = vld [vmem:[#allocation61_spill] sm:$0xff]  ;;  %v7775_v18 = vld [vmem:[#allocation62_spill] sm:$0xff] }
 0x284   : > { %vm7764_vm13 = vcmp.lt.s32.totalorder %v5153_v48, 125  ;;  %v2484_v23 = vmul.f32 %v2477_v6, %v2469_v53  ;;  %v2485_v59 = vmul.f32 %v2481_v24, %v2470_v57  ;;  %v2523_v22 = vrot.slane %v2518_v1, %v5159_v17 }
 0x285   : > { %v2492_v56 = vsel %vm7764_vm13, %v7763_v9, %v7762_v49  ;;  %vm7765_vm2 = vmmov %vm7764_vm13  ;;  %v2527_v3 = vrot.slane %v2518_v1, %v5161_v38  ;;  %vm7768_vm14 = vcmp.lt.s32.totalorder %v5153_v48, 115  ;;  %v2546_v20 = vrot.slane %v2541_v27, %v5159_v17 }
 0x286   : > { %v2493_v10 = vsel %vm7765_vm2, %v7762_v49, %v7763_v9  ;;  %v2515_v50 = vsel %vm7768_vm14, %v7767_v37, %v7766_v16  ;;  %vm7769_vm15 = vmmov %vm7768_vm14  ;;  %v2550_v33 = vrot.slane %v2541_v27, %v5161_v38  ;;  %v2463_v15 = vadd.f32 %v2461_v32, %v2440_v7 }
 0x287   : > { %v6880_v52 = vpop.permute.xlu1 %2720  ;;  %v6884_v55 = vpop.permute.xlu0 %2718  ;;  %v2516_v5 = vsel %vm7769_vm15, %v7766_v16, %v7767_v37  ;;  %v2464_v63 = vadd.f32 %v2462_v43, %v2441_v31  ;;  %v2507_v54 = vmul.f32 %v2500_v13, %v2492_v56  ;;  %v2508_v36 = vmul.f32 %v2504_v11, %v2493_v10  ;;  %v2633_v31 = vld [vmem:[#allocation6 + $0xa2] ss:$8 sm:$0x3] }
 0x288   : > { %vm7772_vm8 = vcmp.lt.s32.totalorder %v5153_v48, 114  ;;  %v2569_v40 = vrot.slane %v2564_v29, %v5159_v17  ;;  %v2573_v25 = vrot.slane %v2564_v29, %v5161_v38  ;;  %v2486_v44 = vadd.f32 %v2484_v23, %v2463_v15 }
 0x289   : > { %v2538_v35 = vsel %vm7772_vm8, %v7771_v58, %v7770_v2  ;;  %vm7773_vm9 = vmmov %vm7772_vm8  ;;  %v2487_v60 = vadd.f32 %v2485_v59, %v2464_v63  ;;  %v2530_v61 = vmul.f32 %v2523_v22, %v2515_v50  ;;  %v2531_v41 = vmul.f32 %v2527_v3, %v2516_v5  ;;  %v2656_v22 = vld [vmem:[#allocation6 + $0xa3] ss:$8 sm:$0x3] }
 0x28a   : > { %v2539_v45 = vsel %vm7773_vm9, %v7770_v2, %v7771_v58  ;;  %v2561_v6 = vsel %vm1329_vm3, %v7775_v18, %v7774_v14  ;;  %v2562_v24 = vsel %vm1329_vm3, %v7774_v14, %v7775_v18  ;;  %v2592_v53 = vrot.slane %v2587_v46, %v5159_v17 }
 0x28b   : > { %v6906_v34 = vpop.permute.xlu1 %2743  ;;  %v6908_v47 = vpop.permute.xlu0 %2741  ;;  %v2596_v57 = vrot.slane %v2587_v46, %v5161_v38  ;;  %v2509_v13 = vadd.f32 %v2507_v54, %v2486_v44  ;;  %v2510_v11 = vadd.f32 %v2508_v36, %v2487_v60  ;;  %v2553_v1 = vmul.f32 %v2546_v20, %v2538_v35  ;;  %v2702_v35 = vld [vmem:[#allocation6 + $0xa5] ss:$8 sm:$0x3] }
 0x28c   : > { %v2554_v7 = vmul.f32 %v2550_v33, %v2539_v45  ;;  %vm7776_vm7 = vcmp.lt.s32.totalorder %v5153_v48, 112  ;;  %v2615_v27 = vrot.slane %v2610_v62, %v5159_v17  ;;  %v2619_v49 = vrot.slane %v2610_v62, %v5161_v38  ;;  %v2679_v33 = vld [vmem:[#allocation6 + $0xa4] ss:$8 sm:$0x3] }
 0x28d   : > { %v2584_v32 = vsel %vm7776_vm7, %v6724_v19, %v6717_v21  ;;  %vm7777_vm11 = vmmov %vm7776_vm7  ;;  %v2532_v56 = vadd.f32 %v2530_v61, %v2509_v13  ;;  %v2533_v10 = vadd.f32 %v2531_v41, %v2510_v11  ;;  %v2576_v23 = vmul.f32 %v2569_v40, %v2561_v6  ;;  %v2725_v62 = vld [vmem:[#allocation6 + $0xa6] ss:$8 sm:$0x3]  ;;  %v2748_v11 = vld [vmem:[#allocation6 + $0xa7] ss:$8 sm:$0x3] }
 0x28e   : > { %v2585_v43 = vsel %vm7777_vm11, %v6717_v21, %v6724_v19  ;;  %v2577_v59 = vmul.f32 %v2573_v25, %v2562_v24  ;;  %vm7778_vm3 = vcmp.lt.s32.totalorder %v5153_v48, 111  ;;  %v2638_v19 = vrot.slane %v2633_v31, %v5159_v17 }
 0x28f   : > { %v6930_v9 = vpop.permute.xlu1 %2766  ;;  %v6932_v3 = vpop.permute.xlu0 %2764  ;;  %v2607_v29 = vsel %vm7778_vm3, %v6754_v26, %v6746_v51  ;;  %vm7779_vm12 = vmmov %vm7778_vm3  ;;  %v2642_v16 = vrot.slane %v2633_v31, %v5161_v38  ;;  %v2555_v37 = vadd.f32 %v2553_v1, %v2532_v56  ;;  %v2556_v50 = vadd.f32 %v2554_v7, %v2533_v10  ;;  %v2771_v56 = vld [vmem:[#allocation6 + $0xb0] ss:$8 sm:$0x3] }
 0x290   : > { %v2608_v21 = vsel %vm7779_vm12, %v6746_v51, %v6754_v26  ;;  %v2599_v5 = vmul.f32 %v2592_v53, %v2584_v32  ;;  %v2600_v20 = vmul.f32 %v2596_v57, %v2585_v43  ;;  %vm7780_vm13 = vcmp.lt.s32.totalorder %v5153_v48, 110 }
 0x291   : > { %v2630_v15 = vsel %vm7780_vm13, %v6790_v0, %v6782_v42  ;;  %vm7781_vm2 = vmmov %vm7780_vm13  ;;  %v2661_v51 = vrot.slane %v2656_v22, %v5159_v17  ;;  %v2665_v26 = vrot.slane %v2656_v22, %v5161_v38  ;;  %v2578_v36 = vadd.f32 %v2576_v23, %v2555_v37 }
 0x292   : > { %v2631_v63 = vsel %vm7781_vm2, %v6782_v42, %v6790_v0  ;;  %v2579_v46 = vadd.f32 %v2577_v59, %v2556_v50  ;;  %v2622_v2 = vmul.f32 %v2615_v27, %v2607_v29  ;;  %v2623_v58 = vmul.f32 %v2619_v49, %v2608_v21 }
 0x293   : > { %v6954_v54 = vpop.permute.xlu1 %2789  ;;  %v6956_v45 = vpop.permute.xlu0 %2787  ;;  %vm7782_vm14 = vcmp.lt.s32.totalorder %v5153_v48, 109  ;;  %v2684_v0 = vrot.slane %v2679_v33, %v5159_v17  ;;  %v2688_v25 = vrot.slane %v2679_v33, %v5161_v38  ;;  %v2601_v44 = vadd.f32 %v2599_v5, %v2578_v36 }
 0x294   : > { %v2653_v40 = vsel %vm7782_vm14, %v6826_v28, %v6818_v8  ;;  %vm7783_vm15 = vmmov %vm7782_vm14  ;;  %v2602_v60 = vadd.f32 %v2600_v20, %v2579_v46  ;;  %v2645_v61 = vmul.f32 %v2638_v19, %v2630_v15  ;;  %v2646_v41 = vmul.f32 %v2642_v16, %v2631_v63  ;;  %v2794_v16 = vld [vmem:[#allocation6 + $0xb1] ss:$8 sm:$0x3] }
 0x295   : > { %v2654_v42 = vsel %vm7783_vm15, %v6818_v8, %v6826_v28  ;;  %vm7784_vm8 = vcmp.lt.s32.totalorder %v5153_v48, 99  ;;  %v2707_v8 = vrot.slane %v2702_v35, %v5159_v17  ;;  %v2711_v28 = vrot.slane %v2702_v35, %v5161_v38 }
 0x296   : > { %v2676_v14 = vsel %vm7784_vm8, %v6842_v30, %v6838_v39  ;;  %vm7785_vm9 = vmmov %vm7784_vm8  ;;  %v2624_v24 = vadd.f32 %v2622_v2, %v2601_v44  ;;  %v2625_v53 = vadd.f32 %v2623_v58, %v2602_v60  ;;  %v2668_v57 = vmul.f32 %v2661_v51, %v2653_v40  ;;  %v2817_v51 = vld [vmem:[#allocation6 + $0xb2] ss:$8 sm:$0x3] }
 0x297   : > { %v2677_v18 = vsel %vm7785_vm9, %v6838_v39, %v6842_v30  ;;  %v2813_v6 = vpop.permute.xlu1 %2812  ;;  %v2669_v13 = vmul.f32 %v2665_v26, %v2654_v42  ;;  %v2811_v1 = vpop.permute.xlu0 %2810  ;;  %vm7786_vm7 = vcmp.lt.s32.totalorder %v5153_v48, 98  ;;  %v2730_v30 = vrot.slane %v2725_v62, %v5159_v17  ;;  %v2840_v42 = vld [vmem:[#allocation6 + $0xb3] ss:$8 sm:$0x3] }
 0x298   : > { %v2699_v7 = vsel %vm7786_vm7, %v6860_v12, %v6856_v4  ;;  %vm7787_vm11 = vmmov %vm7786_vm7  ;;  %v2734_v31 = vrot.slane %v2725_v62, %v5161_v38  ;;  %v2647_v32 = vadd.f32 %v2645_v61, %v2624_v24  ;;  %v2648_v43 = vadd.f32 %v2646_v41, %v2625_v53 }
 0x299   : > { %v2700_v39 = vsel %vm7787_vm11, %v6856_v4, %v6860_v12  ;;  %v2691_v27 = vmul.f32 %v2684_v0, %v2676_v14  ;;  %v2692_v49 = vmul.f32 %v2688_v25, %v2677_v18  ;;  %v2722_v10 = vsel %vm1497_vm0, %v6884_v55, %v6880_v52  ;;  %v2863_v14 = vld [vmem:[#allocation6 + $0xb4] ss:$8 sm:$0x3] }
 0x29a   : > { %v2723_v23 = vsel %vm1497_vm0, %v6880_v52, %v6884_v55  ;;  %v2753_v4 = vrot.slane %v2748_v11, %v5159_v17  ;;  %v2757_v12 = vrot.slane %v2748_v11, %v5161_v38  ;;  %v2670_v22 = vadd.f32 %v2668_v57, %v2647_v32  ;;  %v2886_v11 = vld [vmem:[#allocation6 + $0xb5] ss:$8 sm:$0x3] }
 0x29b   : > { %v2836_v59 = vpop.permute.xlu1 %2835  ;;  %v2671_v29 = vadd.f32 %v2669_v13, %v2648_v43  ;;  %v2714_v21 = vmul.f32 %v2707_v8, %v2699_v7  ;;  %v2715_v19 = vmul.f32 %v2711_v28, %v2700_v39  ;;  %v2834_v37 = vpop.permute.xlu0 %2833  ;;  %vm7788_vm3 = vcmp.lt.s32.totalorder %v5153_v48, 96 }
 0x29c   : > { %v2745_v50 = vsel %vm7788_vm3, %v6908_v47, %v6906_v34  ;;  %vm7789_vm0 = vmmov %vm7788_vm3  ;;  %v2776_v55 = vrot.slane %v2771_v56, %v5159_v17  ;;  %v2780_v5 = vrot.slane %v2771_v56, %v5161_v38  ;;  %v2693_v20 = vadd.f32 %v2691_v27, %v2670_v22 }
 0x29d   : > { %v2746_v52 = vsel %vm7789_vm0, %v6906_v34, %v6908_v47  ;;  %v2694_v33 = vadd.f32 %v2692_v49, %v2671_v29  ;;  %v2737_v15 = vmul.f32 %v2730_v30, %v2722_v10  ;;  %v2738_v63 = vmul.f32 %v2734_v31, %v2723_v23  ;;  %v2909_v49 = vld [vmem:[#allocation6 + $0xb6] ss:$8 sm:$0x3] }
 0x29e   : > { %vm7790_vm12 = vcmp.lt.s32.totalorder %v5153_v48, 95  ;;  %v2799_v34 = vrot.slane %v2794_v16, %v5159_v17  ;;  %v2803_v47 = vrot.slane %v2794_v16, %v5161_v38  ;;  %v2716_v2 = vadd.f32 %v2714_v21, %v2693_v20  ;;  %v2932_v16 = vld [vmem:[#allocation6 + $0xb7] ss:$8 sm:$0x3] }
 0x29f   : > { %v2768_v26 = vsel %vm7790_vm12, %v6932_v3, %v6930_v9  ;;  %vm7791_vm13 = vmmov %vm7790_vm12  ;;  %v2859_v46 = vpop.permute.xlu1 %2858  ;;  %v2717_v58 = vadd.f32 %v2715_v19, %v2694_v33  ;;  %v2760_v35 = vmul.f32 %v2753_v4, %v2745_v50  ;;  %v2761_v40 = vmul.f32 %v2757_v12, %v2746_v52  ;;  %v2857_v0 = vpop.permute.xlu0 %2856 }
 0x2a0   : > { %v2769_v36 = vsel %vm7791_vm13, %v6930_v9, %v6932_v3  ;;  %v2791_v25 = vsel %vm1569_vm1, %v6956_v45, %v6954_v54  ;;  %v2792_v9 = vsel %vm1569_vm1, %v6954_v54, %v6956_v45  ;;  %v2822_v3 = vrot.slane %v2817_v51, %v5159_v17 }
 0x2a1   : > { %v2826_v44 = vrot.slane %v2817_v51, %v5161_v38  ;;  %v2739_v60 = vadd.f32 %v2737_v15, %v2716_v2  ;;  %v2740_v61 = vadd.f32 %v2738_v63, %v2717_v58  ;;  %v2783_v41 = vmul.f32 %v2776_v55, %v2768_v26  ;;  %v2955_v63 = vld [vmem:[#allocation6 + $0xc0] ss:$8 sm:$0x3] }
 0x2a2   : > { %v2784_v62 = vmul.f32 %v2780_v5, %v2769_v36  ;;  %vm7792_vm2 = vcmp.lt.s32.totalorder %v5153_v48, 93  ;;  %v2845_v28 = vrot.slane %v2840_v42, %v5159_v17  ;;  %v2849_v24 = vrot.slane %v2840_v42, %v5161_v38 }
 0x2a3   : > { %v2814_v18 = vsel %vm7792_vm2, %v2811_v1, %v2813_v6  ;;  %vm7793_vm14 = vmmov %vm7792_vm2  ;;  %v2882_v54 = vpop.permute.xlu1 %2881  ;;  %v2762_v45 = vadd.f32 %v2760_v35, %v2739_v60  ;;  %v2763_v53 = vadd.f32 %v2761_v40, %v2740_v61  ;;  %v2806_v57 = vmul.f32 %v2799_v34, %v2791_v25  ;;  %v2880_v7 = vpop.permute.xlu0 %2879 }
 0x2a4   : > { %v2815_v8 = vsel %vm7793_vm14, %v2813_v6, %v2811_v1  ;;  %v2807_v13 = vmul.f32 %v2803_v47, %v2792_v9  ;;  %vm7794_vm1 = vcmp.lt.s32.totalorder %v5153_v48, 83  ;;  %v2868_v31 = vrot.slane %v2863_v14, %v5159_v17 }
 0x2a5   : > { %v2837_v39 = vsel %vm7794_vm1, %v2834_v37, %v2836_v59  ;;  %vm7795_vm15 = vmmov %vm7794_vm1  ;;  %v2872_v6 = vrot.slane %v2863_v14, %v5161_v38  ;;  %v2785_v1 = vadd.f32 %v2783_v41, %v2762_v45  ;;  %v2786_v32 = vadd.f32 %v2784_v62, %v2763_v53  ;;  %v2978_v41 = vld [vmem:[#allocation6 + $0xc1] ss:$8 sm:$0x3] }
 0x2a6   : > { %v2838_v30 = vsel %vm7795_vm15, %v2836_v59, %v2834_v37  ;;  %v2829_v43 = vmul.f32 %v2822_v3, %v2814_v18  ;;  %v2830_v27 = vmul.f32 %v2826_v44, %v2815_v8  ;;  %v2860_v56 = vsel %vm1641_vm5, %v2857_v0, %v2859_v46 }
 0x2a7   : > { %v2861_v10 = vsel %vm1641_vm5, %v2859_v46, %v2857_v0  ;;  %v2891_v23 = vrot.slane %v2886_v11, %v5159_v17  ;;  %v2895_v4 = vrot.slane %v2886_v11, %v5161_v38  ;;  %v2905_v12 = vpop.permute.xlu1 %2904  ;;  %v2808_v59 = vadd.f32 %v2806_v57, %v2785_v1  ;;  %v2903_v19 = vpop.permute.xlu0 %2902 }
 0x2a8   : > { %v2809_v22 = vadd.f32 %v2807_v13, %v2786_v32  ;;  %v2852_v29 = vmul.f32 %v2845_v28, %v2837_v39  ;;  %v2853_v21 = vmul.f32 %v2849_v24, %v2838_v30  ;;  %vm7796_vm8 = vcmp.lt.s32.totalorder %v5153_v48, 81 }
 0x2a9   : > { %v2883_v37 = vsel %vm7796_vm8, %v2880_v7, %v2882_v54  ;;  %vm7797_vm9 = vmmov %vm7796_vm8  ;;  %v2914_v52 = vrot.slane %v2909_v49, %v5159_v17  ;;  %v2918_v55 = vrot.slane %v2909_v49, %v5161_v38  ;;  %v2831_v5 = vadd.f32 %v2829_v43, %v2808_v59 }
 0x2aa   : > { %v2884_v50 = vsel %vm7797_vm9, %v2882_v54, %v2880_v7  ;;  %v2832_v20 = vadd.f32 %v2830_v27, %v2809_v22  ;;  %v2875_v33 = vmul.f32 %v2868_v31, %v2860_v56  ;;  %v2876_v15 = vmul.f32 %v2872_v6, %v2861_v10 }
 0x2ab   : > { %vm7798_vm5 = vcmp.lt.s32.totalorder %v5153_v48, 80  ;;  %v2928_v36 = vpop.permute.xlu1 %2927  ;;  %v2937_v34 = vrot.slane %v2932_v16, %v5159_v17  ;;  %v2941_v47 = vrot.slane %v2932_v16, %v5161_v38  ;;  %v2854_v46 = vadd.f32 %v2852_v29, %v2831_v5  ;;  %v2926_v40 = vpop.permute.xlu0 %2925 }
 0x2ac   : > { %v2906_v51 = vsel %vm7798_vm5, %v2903_v19, %v2905_v12  ;;  %vm7799_vm7 = vmmov %vm7798_vm5  ;;  %v2855_v2 = vadd.f32 %v2853_v21, %v2832_v20  ;;  %v2898_v58 = vmul.f32 %v2891_v23, %v2883_v37  ;;  %v2899_v35 = vmul.f32 %v2895_v4, %v2884_v50 }
 0x2ad   : > { %v2907_v26 = vsel %vm7799_vm7, %v2905_v12, %v2903_v19  ;;  %v2929_v42 = vsel %vm1713_vm6, %v2926_v40, %v2928_v36  ;;  %v2930_v0 = vsel %vm1713_vm6, %v2928_v36, %v2926_v40  ;;  %v2960_v25 = vrot.slane %v2955_v63, %v5159_v17 }
 0x2ae   : > { %v2964_v9 = vrot.slane %v2955_v63, %v5161_v38  ;;  %v2877_v3 = vadd.f32 %v2875_v33, %v2854_v46  ;;  %v2878_v44 = vadd.f32 %v2876_v15, %v2855_v2  ;;  %v2921_v60 = vmul.f32 %v2914_v52, %v2906_v51 }
 0x2af   : > { %v2922_v61 = vmul.f32 %v2918_v55, %v2907_v26  ;;  %v2951_v62 = vpop.permute.xlu1 %2950  ;;  %v2944_v8 = vmul.f32 %v2937_v34, %v2929_v42  ;;  %v2945_v28 = vmul.f32 %v2941_v47, %v2930_v0  ;;  %v2949_v24 = vpop.permute.xlu0 %2948  ;;  %v2983_v53 = vrot.slane %v2978_v41, %v5159_v17 }
 0x2b0   : > { %v2900_v14 = vadd.f32 %v2898_v58, %v2877_v3  ;;  %v2901_v18 = vadd.f32 %v2899_v35, %v2878_v44  ;;  %v2952_v54 = vsel %vm1737_vm4, %v2949_v24, %v2951_v62  ;;  %v2953_v45 = vsel %vm1737_vm4, %v2951_v62, %v2949_v24 }
 0x2b1   : > { %v2987_v57 = vrot.slane %v2978_v41, %v5161_v38  ;;  %v2967_v7 = vmul.f32 %v2960_v25, %v2952_v54  ;;  %v2968_v39 = vmul.f32 %v2964_v9, %v2953_v45 }
 0x2b2   : > { %v2923_v13 = vadd.f32 %v2921_v60, %v2900_v14  ;;  %v2924_v11 = vadd.f32 %v2922_v61, %v2901_v18 }
 0x2b3   : > { %v2974_v30 = vpop.permute.xlu1 %2973  ;;  %v2972_v1 = vpop.permute.xlu0 %2971 }
 0x2b4   : > { %v2946_v31 = vadd.f32 %v2944_v8, %v2923_v13  ;;  %v2947_v6 = vadd.f32 %v2945_v28, %v2924_v11  ;;  %v2975_v32 = vsel %vm1761_vm10, %v2972_v1, %v2974_v30  ;;  %v2976_v43 = vsel %vm1761_vm10, %v2974_v30, %v2972_v1 }
 0x2b5   : > { %v2990_v17 = vmul.f32 %v2983_v53, %v2975_v32  ;;  %v2991_v38 = vmul.f32 %v2987_v57, %v2976_v43 }
 0x2b6   : > { %v2969_v27 = vadd.f32 %v2967_v7, %v2946_v31  ;;  %v2970_v49 = vadd.f32 %v2968_v39, %v2947_v6 }
 0x2b8   : > { %v2992_v56 = vadd.f32 %v2990_v17, %v2969_v27  ;;  %v2993_v10 = vadd.f32 %v2991_v38, %v2970_v49 }
 0x2ba   : > { %v3225_v23 = vmul.f32 -1.442695, %v2992_v56  ;;  %v3226_v4 = vmul.f32 -1.442695, %v2993_v10 }
 0x2bc   : > { %3607 = vpow2.f32 %v3225_v23 }
 0x2bd   : > { %3609 = vpow2.f32 %v3226_v4 }
 0x2c6   : > { %v3608_v12 = vpop.eup %3607 }
 0x2c7   : > { %v3610_v59 = vpop.eup %3609  ;;  %v3000_v48 = vadd.f32 1.0, %v3608_v12 }
 0x2c8   : > { %v3001_v22 = vadd.f32 1.0, %v3610_v59 }
 0x2c9   : > { %3611 = vrcp.f32 %v3000_v48 }
 0x2ca   : > { %3613 = vrcp.f32 %v3001_v22 }
 0x2d3   : > { %v3612_v29 = vpop.eup %3611 }
 0x2d4   : > { %v3614_v21 = vpop.eup %3613  ;;  %3009 = vst [vmem:[%s4247_s10] sm:$0xff] %v3612_v29 }
 0x2d5   : > { %3010 = vst [vmem:[%s4247_s10 + $0x8] sm:$0xff] %v3614_v21 }
 0x2d6   : > { %3686 = shalt.err (!%p3683_p9)
}
 0x2d7   : > { %s3687_s23 = scalar_lea.hbm %s7079_s30, 256  ;;  %s3691_s4 = scalar_lea.hbm %s7128_s3, 512 }
 0x2d8   : > { %p3688_p1 = scmp.ne.s32.totalorder %s7079_s30, %s3687_s23  ;;  %p3692_p11 = scmp.lt.u32.totalorder %s7079_s30, %s7128_s3 }
 0x2d9   : > { %p3693_p2 = scmp.lt.u32.totalorder %s3691_s4, %s3687_s23  ;;  %p3695_p6 = scmp.lt.u32.totalorder %s3687_s23, %s7079_s30 }
 0x2da   : > { %p3689_p0 = pnand %p3688_p1, %p4179_p12 }
 0x2db   : > { %p3694_p4 = por %p3693_p2, %p3692_p11 }
 0x2dc   : > { %p3690_p5 = pneg %p3689_p0 }
 0x2dd   : > { %p3696_p8 = por %p3695_p6, %p3694_p4 }
 0x2df   : > { %p3697_p10 = pnand %p3696_p8, %p3690_p5 }
 0x2e1   : > { %3700 = shalt.err (!%p3697_p10)
}
 0x2e2   : > { %3242 = dma.vmem_to_hbm [thread:$0]  (%p4179_p12), %s7081_s12, 256, %s7079_s30, %s3012_s6  }
 0x2e3 PF: > { %s3038_s27 = sand.u32 1, %s3863_s14   ;;  %p7800_p13 = scmp.ne.s32.totalorder %s7352_s20, 0 }
 0x2e4   : > { %p7801_p3 = scmp.ge.s32.totalorder %s3875_s17, 2  ;;  %s3039_s11 = scalar_lea.sflag [#allocation5], %s3038_s27 }
 0x2e6   : > { %p3253_p7 = pnand %p7801_p3, %p7800_p13 }
 0x2e8   : > { %3858 = dma.done.wait (!%p3253_p7), %s3039_s11, 256  }
 0x2e9   : > { %3860 = vsyncadd (!%p3253_p7), %s3039_s11, 4294967040  ;;  %p18_p9 = scmp.ge.s32.totalorder %s4141_s25, 4   ;;  %s7802_s14 = smov %s3867_s15 }
 0x2ea   : > { %s7803_s15 = smov %s3871_s16  ;;  %s7804_s16 = smov %s4175_s13 }
 0x2eb   : > { %s7805_s17 = smov %s4141_s25  ;;  %20 = sbr.rel (!%p18_p9) target bundleno = 8 (0x8), region = 198 }
 0x2f2   :  { %3044 = vsyncpa [#allocation4], 1 }
 0x2f3   :  { %3046 = vsyncpa [#allocation4 + $0x1], 1 }
 0x2f4   :  { %3047 = vsyncpa [#allocation7], 1 }
 0x2f5   :  { %3048 = vsyncpa [#allocation5], 1 }
 0x2f6   :  { %3050 = vsyncpa [#allocation5 + $0x1], 1 }

</bundles_post_ra>
